<compile_context>
chip_gen: v5e
topology: v5e:2x2
jax: 0.10.0
libtpu: 0.0.40
codegen_flags: <defaults>
</compile_context>

<pallas_src>
import jax
import jax.numpy as jnp
from jax.experimental import pallas as pl
from jax.experimental.pallas import tpu as pltpu

BS = 2
NUM_OBJS = 21            # module default
KNN = 10                 # module default
HIDDEN = 128
EMBED = 64
NP = 24                  # per-sample node count padded to a sublane multiple of 8
NPP = NP * NP
NODE_F = 2 + 2 + EMBED   # [pos, tanh(target_score), embedding-table rows]
D2 = HIDDEN + EMBED      # 192
LOG_STD_MIN, LOG_STD_MAX = -5.0, 2.0
MAX_ACTION = 1.0
T0 = 0.01                # kept for parity; unused by the synthetic target_score
BIG = 1e30


def _actor_kernel(node_ref, pen_ref, e_ref, f_ref, wbig_ref, wenc2_ref, wcb_ref,
                  w2m_ref, wsa1_ref, wsa2_ref, bias_ref, out_ref):
    f32 = jnp.float32

    nodes = node_ref[0]                          # [NP, 68]; rows >= NUM_OBJS are zero pad
    tanh_tar = nodes[:, 2:4]                     # [NP, 2]

    b_big = bias_ref[0:1, 0:D2]
    b_enc2 = bias_ref[1:2, 0:D2]
    b_cb = bias_ref[2:3, :]
    b_m2 = bias_ref[3:4, 0:HIDDEN]
    b_sa1 = bias_ref[4:5, 0:HIDDEN]
    b_sa2 = bias_ref[5:6, 0:4]

    # ---- encoders ----
    # stage 1 fused: [spatial Linear(4,128) | identity pass-through of the 64-d embedding]
    l1 = jnp.tanh(jnp.dot(nodes, wbig_ref[...], preferred_element_type=f32) + b_big)
    # stage 2 fused block-diagonal [192,192]: spatial Linear(128,128) | category Linear(64,64)
    feat = jnp.tanh(jnp.dot(l1, wenc2_ref[...], preferred_element_type=f32) + b_enc2)

    # ---- EdgeConv message layer-1 decomposition:
    #      mlp1_l1([x_i, x_j - x_i]) = C[i] + B[j] with
    #      C = feat @ (W_i - W_d) + b1,  B = feat @ W_d  (fused [192,256] matmul) ----
    cb = jnp.dot(feat, wcb_ref[...], preferred_element_type=f32) + b_cb      # [NP, 256]
    c_half = cb[:, :HIDDEN]                                                  # C  [NP, 128]
    b_half = cb[:, HIDDEN:]                                                  # B  [NP, 128]

    # ---- batched EdgeConv message (pairwise outer sum via one-hot pair selection) ----
    # outer[r=i*NP+j, :] = C[i] + B[j]; default single-pass MXU precision (review item 3).
    outer = (jnp.dot(e_ref[...], c_half, preferred_element_type=f32)
             + jnp.dot(f_ref[...], b_half, preferred_element_type=f32))      # [NPP, 128]
    msg = jnp.dot(jnp.tanh(outer), w2m_ref[...],
                  preferred_element_type=f32) + b_m2                         # [NPP, 128]
    # kNN penalty computed in the jitted wrapper (reference rank method), flat [NPP, 1]
    msg = msg + pen_ref[0]

    # ---- neighbor max over kNN(i): one grouped sublane reduction ----
    conv = jnp.max(msg.reshape(NP, NP, HIDDEN), axis=1)                      # [NP, 128]

    # ---- shared actor head + SquashedNormal parameters ----
    x = jnp.tanh(conv)
    h1 = jnp.tanh(jnp.dot(x, wsa1_ref[...], preferred_element_type=f32) + b_sa1)
    out4 = jnp.dot(h1, wsa2_ref[...], preferred_element_type=f32) + b_sa2    # [NP, 4]
    mu = MAX_ACTION * jnp.tanh(out4[:, 0:2]) + MAX_ACTION * tanh_tar         # is_residual=True
    log_std = jnp.tanh(out4[:, 2:4])
    log_std = LOG_STD_MIN + 0.5 * (LOG_STD_MAX - LOG_STD_MIN) * (log_std + 1.0)
    std = jnp.exp(log_std)

    # lane-dense output: [mu | std | zero-pad] as one unmasked [NP, 128] store
    out_ref[0] = jnp.concatenate([mu, std, jnp.zeros((NP, 128 - 4), f32)], axis=1)


@jax.jit
def actor_tanh_forward(state_inp, params):
    """state_inp: [bs, num_objs*3] -> (mu, std) of the SquashedNormal, each [bs, 2*num_objs]."""
    f32 = jnp.float32
    bs = state_inp.shape[0]
    obj = state_inp.reshape(bs, NUM_OBJS, 3).astype(f32)
    pos = obj[:, :, :2]
    cat = obj[:, :, 2].astype(jnp.int32)
    # TODO(synk): the external `target_score.get_score` network is synthesized as a
    # deterministic per-object linear map (it is not part of ActorTanh itself).
    tar = obj @ params["ts_w"] + params["ts_b"]
    tanh_tar = jnp.tanh(tar)
    e1 = params["emb_table"][cat]                                  # exact embedding gather

    node = jnp.concatenate([pos, tanh_tar, e1], axis=-1)           # [bs, 21, 68]
    node = jnp.pad(node, ((0, 0), (0, NP - NUM_OBJS), (0, 0)))     # [bs, 24, 68]
    pos_pad = jnp.pad(pos, ((0, 0), (0, NP - NUM_OBJS), (0, 0)))   # [bs, 24, 2]

    # ---- kNN graph (rank / "closer-count" method, identical to the reference; runs on
    #      TPU inside this jit).  Passed to the kernel as a flat additive penalty. ----
    px, py = pos_pad[:, :, 0], pos_pad[:, :, 1]
    dx = px[:, :, None] - px[:, None, :]
    dy = py[:, :, None] - py[:, None, :]
    dist = dx * dx + dy * dy                                       # [bs, 24, 24] exact f32
    idx = jnp.arange(NP)
    valid = ((idx[:, None] != idx[None, :])
             & (idx[:, None] < NUM_OBJS) & (idx[None, :] < NUM_OBJS))
    dm = jnp.where(valid[None], dist, BIG)
    l_idx = idx[None, None, None, :]
    j_idx = idx[None, None, :, None]
    closer = ((dm[:, :, None, :] < dm[:, :, :, None])
              | ((dm[:, :, None, :] == dm[:, :, :, None]) & (l_idx < j_idx)))
    rank = jnp.sum(closer, axis=-1)                                # [bs, 24, 24]
    knn_mask = valid[None] & (rank < KNN)
    pen = jnp.where(knn_mask, 0.0, -BIG).astype(f32).reshape(bs, NPP, 1)

    # ---- constant pair-selection one-hots: row r = i*NP + j ----
    r = jnp.arange(NPP)
    e_mat = jax.nn.one_hot(r // NP, NP, dtype=f32)                 # [576, 24]
    f_mat = jax.nn.one_hot(r % NP, NP, dtype=f32)                  # [576, 24]

    # ---- fused / packed weights ----
    w_big = jnp.zeros((NODE_F, D2), f32)                           # encoder stage-1 fuse
    w_big = w_big.at[:4, :HIDDEN].set(params["sp_w1"])
    w_big = w_big.at[4:, HIDDEN:].set(jnp.eye(EMBED, dtype=f32))
    w_enc2 = jnp.zeros((D2, D2), f32)                              # stage-2 block diag
    w_enc2 = w_enc2.at[:HIDDEN, :HIDDEN].set(params["sp_w2"])
    w_enc2 = w_enc2.at[HIDDEN:, HIDDEN:].set(params["em_w"])
    w_i = params["m1_w1"][:D2]
    w_d = params["m1_w1"][D2:]
    w_cb = jnp.concatenate([w_i - w_d, w_d], axis=1)               # [192, 256]

    def pad_row(v):
        return jnp.pad(v, (0, 2 * HIDDEN - v.shape[0]))

    bias_slab = jnp.stack([
        pad_row(params["sp_b1"]),
        pad_row(jnp.concatenate([params["sp_b2"], params["em_b"]])),
        pad_row(params["m1_b1"]),
        pad_row(params["m1_b2"]),
        pad_row(params["sa_b1"]),
        pad_row(params["sa_b2"]),
        jnp.zeros((2 * HIDDEN,), f32),
        jnp.zeros((2 * HIDDEN,), f32),
    ])                                                             # [8, 256]

    out = pl.pallas_call(
        _actor_kernel,
        out_shape=jax.ShapeDtypeStruct((bs, NP, 128), f32),
        grid=(bs,),
        in_specs=[
            pl.BlockSpec((1, NP, NODE_F), lambda b: (b, 0, 0)),            # node slab
            pl.BlockSpec((1, NPP, 1), lambda b: (b, 0, 0)),                # kNN penalty
            pl.BlockSpec((NPP, NP), lambda b: (0, 0)),                     # E (i one-hot)
            pl.BlockSpec((NPP, NP), lambda b: (0, 0)),                     # F (j one-hot)
            pl.BlockSpec((NODE_F, D2), lambda b: (0, 0)),                  # fused enc1
            pl.BlockSpec((D2, D2), lambda b: (0, 0)),                      # enc2 block-diag
            pl.BlockSpec((D2, 2 * HIDDEN), lambda b: (0, 0)),              # [Wc | Wd]
            pl.BlockSpec((HIDDEN, HIDDEN), lambda b: (0, 0)),              # m1_w2
            pl.BlockSpec((HIDDEN, HIDDEN), lambda b: (0, 0)),              # sa_w1
            pl.BlockSpec((HIDDEN, 4), lambda b: (0, 0)),                   # sa_w2
            pl.BlockSpec((8, 2 * HIDDEN), lambda b: (0, 0)),               # bias slab
        ],
        out_specs=pl.BlockSpec((1, NP, 128), lambda b: (b, 0, 0)),
        compiler_params=pltpu.CompilerParams(dimension_semantics=("parallel",)),
    )(node, pen, e_mat, f_mat, w_big, w_enc2, w_cb, params["m1_w2"],
      params["sa_w1"], params["sa_w2"], bias_slab)

    mu = out[:, :NUM_OBJS, 0:2].reshape(bs, 2 * NUM_OBJS)
    std = out[:, :NUM_OBJS, 2:4].reshape(bs, 2 * NUM_OBJS)
    return mu, std


def actor_tanh_ref(state_inp, params):
    """Pure-JAX reference mirroring the PyTorch forward."""
    bs = state_inp.shape[0]
    N = bs * NUM_OBJS
    obj = state_inp.reshape(bs, NUM_OBJS, 3)
    pos = obj[:, :, :2].reshape(-1, 2)
    cat = obj[:, :, 2].reshape(-1).astype(jnp.int32)
    tar = (obj @ params["ts_w"] + params["ts_b"]).reshape(-1, 2)

    spatial_inp = jnp.concatenate([pos, jnp.tanh(tar)], axis=-1)
    se = jnp.tanh(spatial_inp @ params["sp_w1"] + params["sp_b1"]) @ params["sp_w2"] + params["sp_b2"]
    ce = jnp.tanh(params["emb_table"][cat]) @ params["em_w"] + params["em_b"]
    feat = jnp.tanh(jnp.concatenate([se, ce], axis=-1))            # [N, H+E]

    bid = jnp.repeat(jnp.arange(bs), NUM_OBJS)
    dx = pos[:, 0:1] - pos[:, 0:1].T
    dy = pos[:, 1:2] - pos[:, 1:2].T
    dist = dx * dx + dy * dy
    valid = (bid[:, None] == bid[None, :]) & (~jnp.eye(N, dtype=bool))
    dm = jnp.where(valid, dist, BIG)
    l_idx = jnp.arange(N)[None, None, :]
    j_idx = jnp.arange(N)[None, :, None]
    closer = (dm[:, None, :] < dm[:, :, None]) | ((dm[:, None, :] == dm[:, :, None]) & (l_idx < j_idx))
    rank = jnp.sum(closer, axis=2)
    knn_mask = valid & (rank < KNN)

    msg_in = jnp.concatenate(
        [jnp.broadcast_to(feat[:, None, :], (N, N, feat.shape[-1])),
         feat[None, :, :] - feat[:, None, :]], axis=-1)
    msg = jnp.tanh(msg_in @ params["m1_w1"] + params["m1_b1"]) @ params["m1_w2"] + params["m1_b2"]
    msg = jnp.where(knn_mask[:, :, None], msg, -BIG)
    conv = jnp.max(msg, axis=1)                                    # [N, H]

    x = jnp.tanh(conv)
    out = jnp.tanh(x @ params["sa_w1"] + params["sa_b1"]) @ params["sa_w2"] + params["sa_b2"]
    mu_raw, log_std = out[:, :2], out[:, 2:]
    log_std = jnp.tanh(log_std)
    log_std = LOG_STD_MIN + 0.5 * (LOG_STD_MAX - LOG_STD_MIN) * (log_std + 1.0)
    std = jnp.exp(log_std).reshape(bs, -1)
    mu = MAX_ACTION * jnp.tanh(mu_raw.reshape(bs, -1))
    mu = mu + MAX_ACTION * jnp.tanh(tar.reshape(bs, -1))
    return mu, std


def init_params(key):
    f32 = jnp.float32
    ks = jax.random.split(key, 9)

    def lin_w(k, fan_in, shape):
        return jax.random.normal(k, shape, f32) / jnp.sqrt(jnp.asarray(fan_in, f32))

    d2 = (HIDDEN + EMBED) * 2
    return {
        "sp_w1": lin_w(ks[0], 4, (4, HIDDEN)),
        "sp_b1": jnp.full((HIDDEN,), 0.01, f32),
        "sp_w2": lin_w(ks[1], HIDDEN, (HIDDEN, HIDDEN)),
        "sp_b2": jnp.full((HIDDEN,), -0.02, f32),
        "emb_table": lin_w(ks[2], 1, (3, EMBED)),
        "em_w": lin_w(ks[3], EMBED, (EMBED, EMBED)),
        "em_b": jnp.full((EMBED,), 0.03, f32),
        "m1_w1": lin_w(ks[4], d2, (d2, HIDDEN)),
        "m1_b1": jnp.full((HIDDEN,), 0.015, f32),
        "m1_w2": lin_w(ks[5], HIDDEN, (HIDDEN, HIDDEN)),
        "m1_b2": jnp.full((HIDDEN,), -0.01, f32),
        "sa_w1": lin_w(ks[6], HIDDEN, (HIDDEN, HIDDEN)),
        "sa_b1": jnp.full((HIDDEN,), 0.02, f32),
        "sa_w2": lin_w(ks[7], HIDDEN, (HIDDEN, 4)),
        "sa_b2": jnp.full((4,), 0.0, f32),
        "ts_w": lin_w(ks[8], 3, (3, 2)),
        "ts_b": jnp.full((2,), 0.05, f32),
    }


if __name__ == "__main__":
    root = jax.random.PRNGKey(0)
    k_par, k_pos, k_cat = jax.random.split(root, 3)
    params = init_params(k_par)

    pos0 = jax.random.normal(k_pos, (BS, NUM_OBJS, 2), dtype=jnp.float32)
    cat0 = jax.random.randint(k_cat, (BS, NUM_OBJS, 1), 0, 3).astype(jnp.float32)
    state_inp = jnp.concatenate([pos0, cat0], axis=-1).reshape(BS, NUM_OBJS * 3)

    mu, std = jax.block_until_ready(actor_tanh_forward(state_inp, params))
    mu_r, std_r = actor_tanh_ref(state_inp, params)

    assert mu.shape == (BS, 2 * NUM_OBJS) and std.shape == (BS, 2 * NUM_OBJS)
    # Tolerance reflects the single-pass (bf16) MXU precision on the fused kernel matmuls
    # vs the f32 XLA reference; structural errors would be O(0.1-1), far outside this.
    assert bool(jnp.allclose(mu, mu_r, atol=2.5e-2, rtol=2.5e-2)), "mu mismatch vs reference"
    assert bool(jnp.allclose(std, std_r, atol=2.5e-2, rtol=2.5e-2)), "std mismatch vs reference"
    print("KERNEL_OK")
</pallas_src>

<mosaic_0001>
module attributes {stable_mosaic.version = 11 : i64} {
  func.func @_actor_kernel(%arg0: i32, %arg1: memref<1x24x68xf32, #tpu.memory_space<vmem>>, %arg2: memref<1x576x1xf32, #tpu.memory_space<vmem>>, %arg3: memref<576x24xf32, #tpu.memory_space<vmem>>, %arg4: memref<576x24xf32, #tpu.memory_space<vmem>>, %arg5: memref<68x192xf32, #tpu.memory_space<vmem>>, %arg6: memref<192x192xf32, #tpu.memory_space<vmem>>, %arg7: memref<192x256xf32, #tpu.memory_space<vmem>>, %arg8: memref<128x128xf32, #tpu.memory_space<vmem>>, %arg9: memref<128x128xf32, #tpu.memory_space<vmem>>, %arg10: memref<128x4xf32, #tpu.memory_space<vmem>>, %arg11: memref<8x256xf32, #tpu.memory_space<vmem>>, %arg12: memref<1x24x128xf32, #tpu.memory_space<vmem>>) attributes {dimension_semantics = [#tpu.dimension_semantics<parallel>], iteration_bounds = array<i64: 2>, scalar_prefetch = 0 : i64, scratch_operands = 0 : i64, tpu.core_type = #tpu.core_type<tc>, window_params = [{transform_indices = @transform_0, window_bounds = array<i64: 1, 24, 68>}, {transform_indices = @transform_1, window_bounds = array<i64: 1, 576, 1>}, {pipeline_mode = #tpu.pipeline_mode<synchronous>, transform_indices = @transform_2, window_bounds = array<i64: 576, 24>}, {pipeline_mode = #tpu.pipeline_mode<synchronous>, transform_indices = @transform_3, window_bounds = array<i64: 576, 24>}, {pipeline_mode = #tpu.pipeline_mode<synchronous>, transform_indices = @transform_4, window_bounds = array<i64: 68, 192>}, {pipeline_mode = #tpu.pipeline_mode<synchronous>, transform_indices = @transform_5, window_bounds = array<i64: 192, 192>}, {pipeline_mode = #tpu.pipeline_mode<synchronous>, transform_indices = @transform_6, window_bounds = array<i64: 192, 256>}, {pipeline_mode = #tpu.pipeline_mode<synchronous>, transform_indices = @transform_7, window_bounds = array<i64: 128, 128>}, {pipeline_mode = #tpu.pipeline_mode<synchronous>, transform_indices = @transform_8, window_bounds = array<i64: 128, 128>}, {pipeline_mode = #tpu.pipeline_mode<synchronous>, transform_indices = @transform_9, window_bounds = array<i64: 128, 4>}, {pipeline_mode = #tpu.pipeline_mode<synchronous>, transform_indices = @transform_10, window_bounds = array<i64: 8, 256>}, {transform_indices = @transform_11, window_bounds = array<i64: 1, 24, 128>}]} {
    %c0 = arith.constant 0 : index
    %c0_0 = arith.constant 0 : index
    %c0_1 = arith.constant 0 : index
    %0 = vector.load %arg1[%c0, %c0_0, %c0_1] : memref<1x24x68xf32, #tpu.memory_space<vmem>>, vector<1x24x68xf32>
    %1 = vector.shape_cast %0 : vector<1x24x68xf32> to vector<24x68xf32>
    %2 = vector.extract_strided_slice %1 {offsets = [0, 2], sizes = [24, 2], strides = [1, 1]} : vector<24x68xf32> to vector<24x2xf32>
    %c0_2 = arith.constant 0 : index
    %c0_3 = arith.constant 0 : index
    %3 = vector.load %arg11[%c0_2, %c0_3] : memref<8x256xf32, #tpu.memory_space<vmem>>, vector<1x192xf32>
    %c1 = arith.constant 1 : index
    %c0_4 = arith.constant 0 : index
    %4 = vector.load %arg11[%c1, %c0_4] : memref<8x256xf32, #tpu.memory_space<vmem>>, vector<1x192xf32>
    %c2 = arith.constant 2 : index
    %c0_5 = arith.constant 0 : index
    %5 = vector.load %arg11[%c2, %c0_5] : memref<8x256xf32, #tpu.memory_space<vmem>>, vector<1x256xf32>
    %c3 = arith.constant 3 : index
    %c0_6 = arith.constant 0 : index
    %6 = vector.load %arg11[%c3, %c0_6] : memref<8x256xf32, #tpu.memory_space<vmem>>, vector<1x128xf32>
    %c4 = arith.constant 4 : index
    %c0_7 = arith.constant 0 : index
    %7 = vector.load %arg11[%c4, %c0_7] : memref<8x256xf32, #tpu.memory_space<vmem>>, vector<1x128xf32>
    %c5 = arith.constant 5 : index
    %c0_8 = arith.constant 0 : index
    %8 = vector.load %arg11[%c5, %c0_8] : memref<8x256xf32, #tpu.memory_space<vmem>>, vector<1x4xf32>
    %c0_9 = arith.constant 0 : index
    %c0_10 = arith.constant 0 : index
    %9 = vector.load %arg5[%c0_9, %c0_10] : memref<68x192xf32, #tpu.memory_space<vmem>>, vector<68x192xf32>
    %cst = arith.constant dense<0.000000e+00> : vector<24x192xf32>
    %10 = tpu.matmul %1, %9, %cst {dimension_numbers = #tpu.dot_dimension_numbers<[1], [0], [0], [1], [0, 0, 1, 1], [], []>} : vector<24x68xf32>, vector<68x192xf32>, vector<24x192xf32> -> vector<24x192xf32>
    %11 = vector.broadcast %3 : vector<1x192xf32> to vector<24x192xf32>
    %12 = arith.addf %10, %11 : vector<24x192xf32>
    %13 = math.tanh %12 : vector<24x192xf32>
    %c0_11 = arith.constant 0 : index
    %c0_12 = arith.constant 0 : index
    %14 = vector.load %arg6[%c0_11, %c0_12] : memref<192x192xf32, #tpu.memory_space<vmem>>, vector<192x192xf32>
    %cst_13 = arith.constant dense<0.000000e+00> : vector<24x192xf32>
    %15 = tpu.matmul %13, %14, %cst_13 {dimension_numbers = #tpu.dot_dimension_numbers<[1], [0], [0], [1], [0, 0, 1, 1], [], []>} : vector<24x192xf32>, vector<192x192xf32>, vector<24x192xf32> -> vector<24x192xf32>
    %16 = vector.broadcast %4 : vector<1x192xf32> to vector<24x192xf32>
    %17 = arith.addf %15, %16 : vector<24x192xf32>
    %18 = math.tanh %17 : vector<24x192xf32>
    %c0_14 = arith.constant 0 : index
    %c0_15 = arith.constant 0 : index
    %19 = vector.load %arg7[%c0_14, %c0_15] : memref<192x256xf32, #tpu.memory_space<vmem>>, vector<192x256xf32>
    %cst_16 = arith.constant dense<0.000000e+00> : vector<24x256xf32>
    %20 = tpu.matmul %18, %19, %cst_16 {dimension_numbers = #tpu.dot_dimension_numbers<[1], [0], [0], [1], [0, 0, 1, 1], [], []>} : vector<24x192xf32>, vector<192x256xf32>, vector<24x256xf32> -> vector<24x256xf32>
    %21 = vector.broadcast %5 : vector<1x256xf32> to vector<24x256xf32>
    %22 = arith.addf %20, %21 : vector<24x256xf32>
    %23 = vector.extract_strided_slice %22 {offsets = [0, 0], sizes = [24, 128], strides = [1, 1]} : vector<24x256xf32> to vector<24x128xf32>
    %24 = vector.extract_strided_slice %22 {offsets = [0, 128], sizes = [24, 128], strides = [1, 1]} : vector<24x256xf32> to vector<24x128xf32>
    %c0_17 = arith.constant 0 : index
    %c0_18 = arith.constant 0 : index
    %25 = vector.load %arg3[%c0_17, %c0_18] : memref<576x24xf32, #tpu.memory_space<vmem>>, vector<576x24xf32>
    %cst_19 = arith.constant dense<0.000000e+00> : vector<576x128xf32>
    %26 = tpu.matmul %25, %23, %cst_19 {dimension_numbers = #tpu.dot_dimension_numbers<[1], [0], [0], [1], [0, 0, 1, 1], [], []>} : vector<576x24xf32>, vector<24x128xf32>, vector<576x128xf32> -> vector<576x128xf32>
    %c0_20 = arith.constant 0 : index
    %c0_21 = arith.constant 0 : index
    %27 = vector.load %arg4[%c0_20, %c0_21] : memref<576x24xf32, #tpu.memory_space<vmem>>, vector<576x24xf32>
    %cst_22 = arith.constant dense<0.000000e+00> : vector<576x128xf32>
    %28 = tpu.matmul %27, %24, %cst_22 {dimension_numbers = #tpu.dot_dimension_numbers<[1], [0], [0], [1], [0, 0, 1, 1], [], []>} : vector<576x24xf32>, vector<24x128xf32>, vector<576x128xf32> -> vector<576x128xf32>
    %29 = arith.addf %26, %28 : vector<576x128xf32>
    %30 = math.tanh %29 : vector<576x128xf32>
    %c0_23 = arith.constant 0 : index
    %c0_24 = arith.constant 0 : index
    %31 = vector.load %arg8[%c0_23, %c0_24] : memref<128x128xf32, #tpu.memory_space<vmem>>, vector<128x128xf32>
    %cst_25 = arith.constant dense<0.000000e+00> : vector<576x128xf32>
    %32 = tpu.matmul %30, %31, %cst_25 {dimension_numbers = #tpu.dot_dimension_numbers<[1], [0], [0], [1], [0, 0, 1, 1], [], []>} : vector<576x128xf32>, vector<128x128xf32>, vector<576x128xf32> -> vector<576x128xf32>
    %33 = vector.broadcast %6 : vector<1x128xf32> to vector<576x128xf32>
    %34 = arith.addf %32, %33 : vector<576x128xf32>
    %c0_26 = arith.constant 0 : index
    %c0_27 = arith.constant 0 : index
    %c0_28 = arith.constant 0 : index
    %35 = vector.load %arg2[%c0_26, %c0_27, %c0_28] : memref<1x576x1xf32, #tpu.memory_space<vmem>>, vector<1x576x1xf32>
    %36 = vector.shape_cast %35 : vector<1x576x1xf32> to vector<576x1xf32>
    %37 = vector.broadcast %36 : vector<576x1xf32> to vector<576x128xf32>
    %38 = arith.addf %34, %37 : vector<576x128xf32>
    %39 = vector.shape_cast %38 : vector<576x128xf32> to vector<24x24x128xf32>
    %cst_29 = arith.constant dense<0xFF800000> : vector<24x128xf32>
    %40 = vector.multi_reduction <maximumf>, %39, %cst_29 [1] : vector<24x24x128xf32> to vector<24x128xf32>
    %41 = math.tanh %40 : vector<24x128xf32>
    %c0_30 = arith.constant 0 : index
    %c0_31 = arith.constant 0 : index
    %42 = vector.load %arg9[%c0_30, %c0_31] : memref<128x128xf32, #tpu.memory_space<vmem>>, vector<128x128xf32>
    %cst_32 = arith.constant dense<0.000000e+00> : vector<24x128xf32>
    %43 = tpu.matmul %41, %42, %cst_32 {dimension_numbers = #tpu.dot_dimension_numbers<[1], [0], [0], [1], [0, 0, 1, 1], [], []>} : vector<24x128xf32>, vector<128x128xf32>, vector<24x128xf32> -> vector<24x128xf32>
    %44 = vector.broadcast %7 : vector<1x128xf32> to vector<24x128xf32>
    %45 = arith.addf %43, %44 : vector<24x128xf32>
    %46 = math.tanh %45 : vector<24x128xf32>
    %c0_33 = arith.constant 0 : index
    %c0_34 = arith.constant 0 : index
    %47 = vector.load %arg10[%c0_33, %c0_34] : memref<128x4xf32, #tpu.memory_space<vmem>>, vector<128x4xf32>
    %cst_35 = arith.constant dense<0.000000e+00> : vector<24x4xf32>
    %48 = tpu.matmul %46, %47, %cst_35 {dimension_numbers = #tpu.dot_dimension_numbers<[1], [0], [0], [1], [0, 0, 1, 1], [], []>} : vector<24x128xf32>, vector<128x4xf32>, vector<24x4xf32> -> vector<24x4xf32>
    %49 = vector.broadcast %8 : vector<1x4xf32> to vector<24x4xf32>
    %50 = arith.addf %48, %49 : vector<24x4xf32>
    %51 = vector.extract_strided_slice %50 {offsets = [0, 0], sizes = [24, 2], strides = [1, 1]} : vector<24x4xf32> to vector<24x2xf32>
    %52 = math.tanh %51 : vector<24x2xf32>
    %cst_36 = arith.constant 1.000000e+00 : f32
    %53 = vector.broadcast %cst_36 : f32 to vector<24x2xf32>
    %54 = arith.mulf %53, %52 : vector<24x2xf32>
    %cst_37 = arith.constant 1.000000e+00 : f32
    %55 = vector.broadcast %cst_37 : f32 to vector<24x2xf32>
    %56 = arith.mulf %55, %2 : vector<24x2xf32>
    %57 = arith.addf %54, %56 : vector<24x2xf32>
    %58 = vector.extract_strided_slice %50 {offsets = [0, 2], sizes = [24, 2], strides = [1, 1]} : vector<24x4xf32> to vector<24x2xf32>
    %59 = math.tanh %58 : vector<24x2xf32>
    %cst_38 = arith.constant 1.000000e+00 : f32
    %60 = vector.broadcast %cst_38 : f32 to vector<24x2xf32>
    %61 = arith.addf %59, %60 : vector<24x2xf32>
    %cst_39 = arith.constant 3.500000e+00 : f32
    %62 = vector.broadcast %cst_39 : f32 to vector<24x2xf32>
    %63 = arith.mulf %62, %61 : vector<24x2xf32>
    %cst_40 = arith.constant -5.000000e+00 : f32
    %64 = vector.broadcast %cst_40 : f32 to vector<24x2xf32>
    %65 = arith.addf %64, %63 : vector<24x2xf32>
    %66 = math.exp %65 : vector<24x2xf32>
    %cst_41 = arith.constant 0.000000e+00 : f32
    %67 = vector.broadcast %cst_41 : f32 to vector<24x124xf32>
    %68 = tpu.concatenate %57, %66, %67 in 1 : vector<24x2xf32>, vector<24x2xf32>, vector<24x124xf32> -> vector<24x128xf32>
    %c0_42 = arith.constant 0 : index
    %c0_43 = arith.constant 0 : index
    %c0_44 = arith.constant 0 : index
    %69 = vector.load %arg12[%c0_42, %c0_43, %c0_44] : memref<1x24x128xf32, #tpu.memory_space<vmem>>, vector<1x24x128xf32>
    %70 = vector.shape_cast %69 : vector<1x24x128xf32> to vector<24x128xf32>
    %71 = vector.shape_cast %68 : vector<24x128xf32> to vector<1x24x128xf32>
    tpu.vector_store %arg12[%c0_42, %c0_43, %c0_44], %71 {strides = array<i32>} : memref<1x24x128xf32, #tpu.memory_space<vmem>>, vector<1x24x128xf32>,
    return
  }
  func.func @transform_0(%arg0: i32) -> (i32, i32, i32) {
    %c0_i32 = arith.constant 0 : i32
    %c0_i32_0 = arith.constant 0 : i32
    %c0_i32_1 = arith.constant 0 : i32
    return %arg0, %c0_i32, %c0_i32_0 : i32, i32, i32
  }
  func.func @transform_1(%arg0: i32) -> (i32, i32, i32) {
    %c0_i32 = arith.constant 0 : i32
    %c0_i32_0 = arith.constant 0 : i32
    %c0_i32_1 = arith.constant 0 : i32
    return %arg0, %c0_i32, %c0_i32_0 : i32, i32, i32
  }
  func.func @transform_2(%arg0: i32) -> (i32, i32) {
    %c0_i32 = arith.constant 0 : i32
    %c0_i32_0 = arith.constant 0 : i32
    %c0_i32_1 = arith.constant 0 : i32
    return %c0_i32, %c0_i32_0 : i32, i32
  }
  func.func @transform_3(%arg0: i32) -> (i32, i32) {
    %c0_i32 = arith.constant 0 : i32
    %c0_i32_0 = arith.constant 0 : i32
    %c0_i32_1 = arith.constant 0 : i32
    return %c0_i32, %c0_i32_0 : i32, i32
  }
  func.func @transform_4(%arg0: i32) -> (i32, i32) {
    %c0_i32 = arith.constant 0 : i32
    %c0_i32_0 = arith.constant 0 : i32
    %c0_i32_1 = arith.constant 0 : i32
    return %c0_i32, %c0_i32_0 : i32, i32
  }
  func.func @transform_5(%arg0: i32) -> (i32, i32) {
    %c0_i32 = arith.constant 0 : i32
    %c0_i32_0 = arith.constant 0 : i32
    %c0_i32_1 = arith.constant 0 : i32
    return %c0_i32, %c0_i32_0 : i32, i32
  }
  func.func @transform_6(%arg0: i32) -> (i32, i32) {
    %c0_i32 = arith.constant 0 : i32
    %c0_i32_0 = arith.constant 0 : i32
    %c0_i32_1 = arith.constant 0 : i32
    return %c0_i32, %c0_i32_0 : i32, i32
  }
  func.func @transform_7(%arg0: i32) -> (i32, i32) {
    %c0_i32 = arith.constant 0 : i32
    %c0_i32_0 = arith.constant 0 : i32
    %c0_i32_1 = arith.constant 0 : i32
    return %c0_i32, %c0_i32_0 : i32, i32
  }
  func.func @transform_8(%arg0: i32) -> (i32, i32) {
    %c0_i32 = arith.constant 0 : i32
    %c0_i32_0 = arith.constant 0 : i32
    %c0_i32_1 = arith.constant 0 : i32
    return %c0_i32, %c0_i32_0 : i32, i32
  }
  func.func @transform_9(%arg0: i32) -> (i32, i32) {
    %c0_i32 = arith.constant 0 : i32
    %c0_i32_0 = arith.constant 0 : i32
    %c0_i32_1 = arith.constant 0 : i32
    return %c0_i32, %c0_i32_0 : i32, i32
  }
  func.func @transform_10(%arg0: i32) -> (i32, i32) {
    %c0_i32 = arith.constant 0 : i32
    %c0_i32_0 = arith.constant 0 : i32
    %c0_i32_1 = arith.constant 0 : i32
    return %c0_i32, %c0_i32_0 : i32, i32
  }
  func.func @transform_11(%arg0: i32) -> (i32, i32, i32) {
    %c0_i32 = arith.constant 0 : i32
    %c0_i32_0 = arith.constant 0 : i32
    %c0_i32_1 = arith.constant 0 : i32
    return %arg0, %c0_i32, %c0_i32_0 : i32, i32, i32
  }
}

</mosaic_0001>

<bundles_post_ra>
// kernel: actor_tanh_forward.1
= control target key start
LH: loop header
LB: loop body
LE: loop exit
PB: predicated region body
PF: predicated region fallthrough
CT: control target
= control target key end

     0   :  { %s3710_s17 = smov 0   ;;  %s5186_s0 = inlined_call_operand.vmem [shape: f32[2,24,68], index: 0, kind: input, shape index: {}]   ;;  %s5187_s1 = inlined_call_operand.vmem [shape: f32[2,576,1], index: 1, kind: input, shape index: {}]   ;;  %s5188_s2 = inlined_call_operand.vmem [shape: f32[576,24], index: 2, kind: input, shape index: {}]   ;;  %s5189_s3 = inlined_call_operand.vmem [shape: f32[576,24], index: 3, kind: input, shape index: {}]   ;;  %s5190_s4 = inlined_call_operand.vmem [shape: f32[68,192], index: 4, kind: input, shape index: {}]   ;;  %s5191_s5 = inlined_call_operand.vmem [shape: f32[192,192], index: 5, kind: input, shape index: {}]   ;;  %s5192_s6 = inlined_call_operand.vmem [shape: f32[192,256], index: 6, kind: input, shape index: {}]   ;;  %s5193_s7 = inlined_call_operand.vmem [shape: f32[128,128], index: 7, kind: input, shape index: {}]   ;;  %s5194_s8 = inlined_call_operand.vmem [shape: f32[128,128], index: 8, kind: input, shape index: {}]   ;;  %s5195_s9 = inlined_call_operand.vmem [shape: f32[128,4], index: 9, kind: input, shape index: {}]   ;;  %s5196_s10 = inlined_call_operand.vmem [shape: f32[8,256], index: 10, kind: input, shape index: {}]   ;;  %s5197_s11 = inlined_call_operand.vmem [shape: f32[2,24,128], index: 11, kind: output, shape index: {}]  }
   0x1 LB: > { %s3189_s18 = sadd.s32 4294967295, %s3646_s17   ;;  %p3193_p0 = scmp.ge.s32.totalorder %s3646_s17, 1  ;;  %s3646_s17 = sphi %s3710_s17, %s21_s17  }
   0x2   : > { %p347_p1 = scmp.lt.s32.totalorder %s3646_s17, 3 }
   0x4   : > { %p348_p2 = pnand %p3193_p0, %p347_p1 }
   0x5   : > { %p392_p3 = scmp.lt.s32.totalorder (!%p348_p2), %s3189_s18, 1  ;;  %s3649_s27 = smov (!%p348_p2), 126  }
   0x6   : > { %351 = sbr.rel (%p348_p2) target bundleno = 1526 (0x5f6), region = 64 }
   0xb   : > { %v434_v0 = vld [vmem:[%s5190_s4 + $0x80] sm:$0xf]  ;;  %vm451_vm0 = vcmask 1043456   ;;  %v435_v1 = vld [vmem:[%s5190_s4 + $0x88] sm:$0xf]  ;;  %v432_v2 = vld [vmem:[%s5190_s4 + $0x70] sm:$0xff] }
   0xc   : > { %3199 = vmatpush.msk.msra.mxu0 %vm451_vm0, %v434_v0  ;;  %3203 = vmatpush.msk.msra.mxu1 %vm451_vm0, %v435_v1  ;;  %v433_v3 = vld [vmem:[%s5190_s4 + $0x78] sm:$0xff]  ;;  %v430_v4 = vld [vmem:[%s5190_s4 + $0x60] sm:$0xff]  ;;  %v431_v5 = vld [vmem:[%s5190_s4 + $0x68] sm:$0xff]  ;;  %s5199_s18 = smov (!%p392_p3, %s3189_s18), 1  ;;  %vm441_vm1 = vcmask 556032   ;;  %vm569_vm2 = vcmask 523264  }
   0xd   : > { %v428_v6 = vld [vmem:[%s5190_s4 + $0x50] sm:$0xff]  ;;  %v429_v7 = vld [vmem:[%s5190_s4 + $0x58] sm:$0xff]  ;;  %v426_v8 = vld [vmem:[%s5190_s4 + $0x40] sm:$0xff]  ;;  %s3387_s13 = smul.u32 24, %s5199_s18  ;;  %vm999_vm3 = vcmask 195584   ;;  %vm2979_vm4 = vcmask 1041409  }
   0xe   : > { %466 = vmatpush.msra.mxu0 %v432_v2  ;;  %492 = vmatpush.msra.mxu1 %v433_v3  ;;  %v427_v9 = vld [vmem:[%s5190_s4 + $0x48] sm:$0xff]  ;;  %v546_v10 = vld [vmem:[%s5191_s5 + $0xf0] sm:$0xff]  ;;  %v544_v11 = vld [vmem:[%s5191_s5 + $0xe0] sm:$0xff]  ;;  %s3388_s24 = smul.u32 576, %s5199_s18  ;;  %vm2981_vm5 = vcmask 1042434   ;;  %vm2983_vm6 = vcmask 1043459  }
   0xf   : > { %v562_v12 = vld [vmem:[%s5191_s5 + $0x170] sm:$0xff]  ;;  %v425_v14 = vld [vmem:[%s5190_s4 + $0x38] sm:$0xff]  ;;  %579 = vmatpush.msra.mxu2 %v546_v10  ;;  %v560_v16 = vld [vmem:[%s5191_s5 + $0x160] sm:$0xff]  ;;  %s3798_s20 = scalar_lea.vmem %s5186_s0, %s3387_s13  ;;  %vm2985_vm7 = vcmask 1044484   ;;  %vm2987_vm8 = vcmask 1045509   ;;  %vm2989_vm9 = vcmask 1046534   ;;  %s406_s16 = scalar_lea.vmem %s5197_s11, %s3387_s13 }
  0x10   : > { %467 = vmatpush.msra.mxu0 %v430_v4  ;;  %493 = vmatpush.msra.mxu1 %v431_v5  ;;  %v424_v13 = vld [vmem:[%s5190_s4 + $0x30] sm:$0xff]  ;;  %v422_v17 = vld [vmem:[%s5190_s4 + $0x20] sm:$0xff]  ;;  %v423_v18 = vld [vmem:[%s5190_s4 + $0x28] sm:$0xff]  ;;  %s4254_s12 = scalar_lea.vmem %s5187_s1, %s3388_s24  ;;  %vm2991_vm10 = vcmask 1047559   ;;  %vm3111_vm11 = vcmask 15360   ;;  %vm3115_vm12 = vcmask 31744  }
  0x11   : > { %613 = vmatpush.msra.mxu3 %v562_v12  ;;  %v542_v15 = vld [vmem:[%s5191_s5 + $0xd0] sm:$0xff]  ;;  %580 = vmatpush.msra.mxu2 %v544_v11  ;;  %v540_v20 = vld [vmem:[%s5191_s5 + $0xc0] sm:$0xff]  ;;  %v421_v23 = vld [vmem:[%s5190_s4 + $0x18] sm:$0xff] }
  0x12   : > { %468 = vmatpush.msra.mxu0 %v428_v6  ;;  %494 = vmatpush.msra.mxu1 %v429_v7  ;;  %v558_v19 = vld [vmem:[%s5191_s5 + $0x150] sm:$0xff]  ;;  %v556_v21 = vld [vmem:[%s5191_s5 + $0x140] sm:$0xff]  ;;  %v419_v27 = vld [vmem:[%s5190_s4 + $0x8] sm:$0xff] }
  0x13   : > { %614 = vmatpush.msra.mxu3 %v560_v16  ;;  %v420_v22 = vld [vmem:[%s5190_s4 + $0x10] sm:$0xff]  ;;  %581 = vmatpush.msra.mxu2 %v542_v15  ;;  %v418_v26 = vld [vmem:[%s5190_s4] sm:$0xff]  ;;  %v563_v30 = vld [vmem:[%s5191_s5 + $0x178] sm:$0xff] }
  0x14   : > { %469 = vmatpush.msra.mxu0 %v426_v8  ;;  %495 = vmatpush.msra.mxu1 %v427_v9  ;;  %v538_v24 = vld [vmem:[%s5191_s5 + $0xb0] sm:$0xff]  ;;  %v407_v28 = vld [vmem:[%s3798_s20] sm:$0xff]  ;;  %v561_v33 = vld [vmem:[%s5191_s5 + $0x168] sm:$0xff] }
  0x15   : > { %615 = vmatpush.msra.mxu3 %v558_v19  ;;  %v554_v25 = vld [vmem:[%s5191_s5 + $0x130] sm:$0xff]  ;;  %582 = vmatpush.msra.mxu2 %v540_v20  ;;  %v536_v29 = vld [vmem:[%s5191_s5 + $0xa0] sm:$0xff]  ;;  %v559_v35 = vld [vmem:[%s5191_s5 + $0x158] sm:$0xff] }
  0x16   : > { %470 = vmatpush.msra.mxu0 %v424_v13  ;;  %496 = vmatpush.msra.mxu1 %v425_v14  ;;  %v552_v31 = vld [vmem:[%s5191_s5 + $0x120] sm:$0xff]  ;;  %v534_v32 = vld [vmem:[%s5191_s5 + $0x90] sm:$0xff]  ;;  %v408_v37 = vld [vmem:[%s3798_s20 + $0x8] sm:$0xff] }
  0x17   : > { %616 = vmatpush.msra.mxu3 %v556_v21  ;;  %583 = vmatpush.msra.mxu2 %v538_v24  ;;  %v532_v34 = vld [vmem:[%s5191_s5 + $0x80] sm:$0xff]  ;;  %v530_v36 = vld [vmem:[%s5191_s5 + $0x70] sm:$0xff]  ;;  %v557_v43 = vld [vmem:[%s5191_s5 + $0x148] sm:$0xff] }
  0x18   : > { %471 = vmatpush.msra.mxu0 %v422_v17  ;;  %497 = vmatpush.msra.mxu1 %v423_v18  ;;  %v528_v38 = vld [vmem:[%s5191_s5 + $0x60] sm:$0xff]  ;;  %v526_v39 = vld [vmem:[%s5191_s5 + $0x50] sm:$0xff]  ;;  %v547_v46 = vld [vmem:[%s5191_s5 + $0xf8] sm:$0xff] }
  0x19   : > { %617 = vmatpush.msra.mxu3 %v554_v25  ;;  %584 = vmatpush.msra.mxu2 %v536_v29  ;;  %v409_v40 = vld [vmem:[%s3798_s20 + $0x10] sm:$0xff]  ;;  %v524_v42 = vld [vmem:[%s5191_s5 + $0x40] sm:$0xff]  ;;  %v555_v47 = vld [vmem:[%s5191_s5 + $0x138] sm:$0xff] }
  0x1a   : > { %472 = vmatpush.msra.mxu0 %v420_v22  ;;  %498 = vmatpush.msra.mxu1 %v421_v23  ;;  %v550_v41 = vld [vmem:[%s5191_s5 + $0x110] sm:$0xff]  ;;  %v548_v44 = vld [vmem:[%s5191_s5 + $0x100] sm:$0xff]  ;;  %v545_v49 = vld [vmem:[%s5191_s5 + $0xe8] sm:$0xff] }
  0x1b   : > { %618 = vmatpush.msra.mxu3 %v552_v31  ;;  %585 = vmatpush.msra.mxu2 %v534_v32  ;;  %v522_v45 = vld [vmem:[%s5191_s5 + $0x30] sm:$0xff]  ;;  %v520_v48 = vld [vmem:[%s5191_s5 + $0x20] sm:$0xff]  ;;  %v553_v50 = vld [vmem:[%s5191_s5 + $0x128] sm:$0xff] }
  0x1c   : > { %473 = vmatpush.msra.mxu0 %v418_v26  ;;  %499 = vmatpush.msra.mxu1 %v419_v27  ;;  %v518_v51 = vld [vmem:[%s5191_s5 + $0x10] sm:$0xff]  ;;  %v543_v52 = vld [vmem:[%s5191_s5 + $0xd8] sm:$0xff]  ;;  %v516_v54 = vld [vmem:[%s5191_s5] sm:$0xff] }
  0x1d   : > { %3200 = vmatmul.msk.f32.vlgmr.msra.gmra.mxu0 %vm441_vm1, %v407_v28  ;;  %3204 = vmatmul.msk.f32.vlgmr.msra.gmra.mxu1 %vm441_vm1, %v407_v28  ;;  %v551_v53 = vld [vmem:[%s5191_s5 + $0x118] sm:$0xff]  ;;  %v541_v55 = vld [vmem:[%s5191_s5 + $0xc8] sm:$0xff]  ;;  %v719_v24 = vld [vmem:[%s5192_s6 + $0xf0] sm:$0xff] }
  0x1e   : > { %665 = vmatpush.msrb.mxu0 %v563_v30  ;;  %586 = vmatpush.msra.mxu2 %v532_v34  ;;  %v549_v56 = vld [vmem:[%s5191_s5 + $0x108] sm:$0xff]  ;;  %v539_v57 = vld [vmem:[%s5191_s5 + $0xb8] sm:$0xff]  ;;  %v717_v26 = vld [vmem:[%s5192_s6 + $0xe0] sm:$0xff] }
  0x1f   : > { %619 = vmatpush.msra.mxu3 %v550_v41  ;;  %v537_v58 = vld [vmem:[%s5191_s5 + $0xa8] sm:$0xff]  ;;  %v535_v59 = vld [vmem:[%s5191_s5 + $0x98] sm:$0xff]  ;;  %751 = vmatpush.msrb.mxu1 %v719_v24  ;;  %v715_v28 = vld [vmem:[%s5192_s6 + $0xd0] sm:$0xff] }
  0x20   : > { %666 = vmatpush.msrb.mxu0 %v561_v33  ;;  %587 = vmatpush.msra.mxu2 %v530_v36  ;;  %v533_v60 = vld [vmem:[%s5191_s5 + $0x88] sm:$0xff]  ;;  %v531_v61 = vld [vmem:[%s5191_s5 + $0x78] sm:$0xff]  ;;  %v713_v30 = vld [vmem:[%s5192_s6 + $0xc0] sm:$0xff] }
  0x21   : > { %620 = vmatpush.msra.mxu3 %v548_v44  ;;  %v529_v62 = vld [vmem:[%s5191_s5 + $0x68] sm:$0xff]  ;;  %v527_v63 = vld [vmem:[%s5191_s5 + $0x58] sm:$0xff]  ;;  %752 = vmatpush.msrb.mxu1 %v717_v26  ;;  %v711_v33 = vld [vmem:[%s5192_s6 + $0xb0] sm:$0xff] }
  0x22   : > { %667 = vmatpush.msrb.mxu0 %v559_v35  ;;  %588 = vmatpush.msra.mxu2 %v528_v38  ;;  %v525_v0 = vld [vmem:[%s5191_s5 + $0x48] sm:$0xff]  ;;  %v523_v2 = vld [vmem:[%s5191_s5 + $0x38] sm:$0xff]  ;;  %v709_v36 = vld [vmem:[%s5192_s6 + $0xa0] sm:$0xff] }
  0x23   : > { %631 = vmatpush.msrb.mxu3 %v547_v46  ;;  %v410_v1 = vld [vmem:[%s5196_s10] ss:$8 sm:$0x3]  ;;  %v519_v6 = vld [vmem:[%s5191_s5 + $0x18] sm:$0xff]  ;;  %753 = vmatpush.msrb.mxu1 %v715_v28  ;;  %v707_v38 = vld [vmem:[%s5192_s6 + $0x90] sm:$0xff] }
  0x24   : > { %589 = vmatpush.msra.mxu2 %v526_v39  ;;  %668 = vmatpush.msrb.mxu0 %v557_v43  ;;  %v521_v3 = vld [vmem:[%s5191_s5 + $0x28] sm:$0xff]  ;;  %v437_v4 = vperm.slane %v410_v1, 0  ;;  %v438_v5 = vperm.slane %v410_v1, 1  ;;  %v720_v25 = vld [vmem:[%s5192_s6 + $0xf8] sm:$0xff]  ;;  %v701_v44 = vld [vmem:[%s5192_s6 + $0x60] sm:$0xff] }
  0x25   : > { %3201 = vmatmul.msk.f32.gmra.mxu0 %vm441_vm1, %v408_v37  ;;  %3205 = vmatmul.msk.f32.gmra.mxu1 %vm441_vm1, %v408_v37  ;;  %v517_v7 = vld [vmem:[%s5191_s5 + $0x8] sm:$0xff]  ;;  %v716_v29 = vld [vmem:[%s5192_s6 + $0xd8] sm:$0xff]  ;;  %v699_v46 = vld [vmem:[%s5192_s6 + $0x50] sm:$0xff] }
  0x26   : > { %590 = vmatpush.msra.mxu2 %v524_v42  ;;  %669 = vmatpush.msrb.mxu0 %v555_v47  ;;  %v718_v27 = vld [vmem:[%s5192_s6 + $0xe8] sm:$0xff]  ;;  %v712_v35 = vld [vmem:[%s5192_s6 + $0xb8] sm:$0xff]  ;;  %v703_v42 = vld [vmem:[%s5192_s6 + $0x70] sm:$0xff] }
  0x27   : > { %632 = vmatpush.msrb.mxu3 %v545_v49  ;;  %v714_v32 = vld [vmem:[%s5192_s6 + $0xc8] sm:$0xff]  ;;  %754 = vmatpush.msrb.mxu1 %v713_v30  ;;  %v708_v39 = vld [vmem:[%s5192_s6 + $0x98] sm:$0xff]  ;;  %v729_v1 = vld [vmem:[%s5192_s6 + $0x140] sm:$0xff] }
  0x28   : > { %591 = vmatpush.msra.mxu2 %v522_v45  ;;  %670 = vmatpush.msrb.mxu0 %v553_v50  ;;  %v710_v37 = vld [vmem:[%s5192_s6 + $0xa8] sm:$0xff]  ;;  %v704_v43 = vld [vmem:[%s5192_s6 + $0x78] sm:$0xff]  ;;  %v695_v50 = vld [vmem:[%s5192_s6 + $0x30] sm:$0xff] }
  0x29   : > { %633 = vmatpush.msrb.mxu3 %v543_v52  ;;  %755 = vmatpush.msrb.mxu1 %v711_v33  ;;  %v706_v41 = vld [vmem:[%s5192_s6 + $0x88] sm:$0xff]  ;;  %v700_v47 = vld [vmem:[%s5192_s6 + $0x58] sm:$0xff]  ;;  %v693_v52 = vld [vmem:[%s5192_s6 + $0x20] sm:$0xff] }
  0x2a   : > { %592 = vmatpush.msra.mxu2 %v520_v48  ;;  %671 = vmatpush.msrb.mxu0 %v551_v53  ;;  %v702_v45 = vld [vmem:[%s5192_s6 + $0x68] sm:$0xff]  ;;  %v697_v48 = vld [vmem:[%s5192_s6 + $0x40] sm:$0xff] }
  0x2b   : > { %634 = vmatpush.msrb.mxu3 %v541_v55  ;;  %756 = vmatpush.msrb.mxu1 %v709_v36  ;;  %v698_v49 = vld [vmem:[%s5192_s6 + $0x48] sm:$0xff]  ;;  %v692_v55 = vld [vmem:[%s5192_s6 + $0x18] sm:$0xff] }
  0x2c   : > { %593 = vmatpush.msra.mxu2 %v518_v51  ;;  %672 = vmatpush.msrb.mxu0 %v549_v56  ;;  %v696_v51 = vld [vmem:[%s5192_s6 + $0x38] sm:$0xff]  ;;  %v694_v53 = vld [vmem:[%s5192_s6 + $0x28] sm:$0xff]  ;;  %v689_v56 = vld [vmem:[%s5192_s6] sm:$0xff] }
  0x2d   : > { %3202 = vmatmul.msk.f32.gmra.mxu0 %vm441_vm1, %v409_v40  ;;  %3206 = vmatmul.msk.f32.gmra.mxu1 %vm441_vm1, %v409_v40  ;;  %v705_v40 = vld [vmem:[%s5192_s6 + $0x80] sm:$0xff] }
  0x2e   : > { %594 = vmatpush.msra.mxu2 %v516_v54  ;;  %635 = vmatpush.msrb.mxu3 %v539_v57  ;;  %v691_v54 = vld [vmem:[%s5192_s6 + $0x10] sm:$0xff]  ;;  %v690_v57 = vld [vmem:[%s5192_s6 + $0x8] sm:$0xff] }
  0x2f   : > { %803 = vmatpush.msra.mxu0 %v720_v25  ;;  %757 = vmatpush.msrb.mxu1 %v707_v38 }
  0x30   : > { %636 = vmatpush.msrb.mxu3 %v537_v58  ;;  %v735_v58 = vld [vmem:[%s5192_s6 + $0x170] sm:$0xff] }
  0x31   : > { %804 = vmatpush.msra.mxu0 %v718_v27  ;;  %758 = vmatpush.msrb.mxu1 %v705_v40 }
  0x32   : > { %637 = vmatpush.msrb.mxu3 %v535_v59  ;;  %v736_v59 = vld [vmem:[%s5192_s6 + $0x178] sm:$0xff]  ;;  %785 = vmatpush.msrb.mxu2 %v735_v58 }
  0x33   : > { %805 = vmatpush.msra.mxu0 %v716_v29  ;;  %759 = vmatpush.msrb.mxu1 %v703_v42 }
  0x34   : > { %638 = vmatpush.msrb.mxu3 %v533_v60  ;;  %v733_v60 = vld [vmem:[%s5192_s6 + $0x160] sm:$0xff] }
  0x35   : > { %806 = vmatpush.msra.mxu0 %v714_v32  ;;  %760 = vmatpush.msrb.mxu1 %v701_v44 }
  0x36   : > { %639 = vmatpush.msrb.mxu3 %v531_v61  ;;  %v734_v61 = vld [vmem:[%s5192_s6 + $0x168] sm:$0xff]  ;;  %786 = vmatpush.msrb.mxu2 %v733_v60 }
  0x37   : > { %807 = vmatpush.msra.mxu0 %v712_v35  ;;  %761 = vmatpush.msrb.mxu1 %v699_v46 }
  0x38   : > { %640 = vmatpush.msrb.mxu3 %v529_v62  ;;  %v731_v62 = vld [vmem:[%s5192_s6 + $0x150] sm:$0xff] }
  0x39   : > { %808 = vmatpush.msra.mxu0 %v710_v37  ;;  %762 = vmatpush.msrb.mxu1 %v697_v48 }
  0x3a   : > { %641 = vmatpush.msrb.mxu3 %v527_v63  ;;  %v732_v63 = vld [vmem:[%s5192_s6 + $0x158] sm:$0xff]  ;;  %787 = vmatpush.msrb.mxu2 %v731_v62 }
  0x3b   : > { %809 = vmatpush.msra.mxu0 %v708_v39  ;;  %763 = vmatpush.msrb.mxu1 %v695_v50 }
  0x3c   : > { %642 = vmatpush.msrb.mxu3 %v525_v0  ;;  %v3197_v0 = vld [vmem:[%s5196_s10 + $0x1] ss:$8 sm:$0x3]  ;;  %788 = vmatpush.msrb.mxu2 %v729_v1 }
  0x3d   : > { %810 = vmatpush.msra.mxu0 %v706_v41  ;;  %764 = vmatpush.msrb.mxu1 %v693_v52  ;;  %v566_v26 = vperm.slane %v3197_v0, 1 }
  0x3e   : > { %643 = vmatpush.msrb.mxu3 %v523_v2  ;;  %v730_v2 = vld [vmem:[%s5192_s6 + $0x148] sm:$0xff] }
  0x3f   : > { %811 = vmatpush.msra.mxu0 %v704_v43  ;;  %765 = vmatpush.msrb.mxu1 %v691_v54 }
  0x40   : > { %644 = vmatpush.msrb.mxu3 %v521_v3  ;;  %v565_v3 = vperm.slane %v3197_v0, 0 }
  0x41   : > { %812 = vmatpush.msra.mxu0 %v702_v45  ;;  %766 = vmatpush.msrb.mxu1 %v689_v56 }
  0x42   : > { %645 = vmatpush.msrb.mxu3 %v519_v6  ;;  %v725_v6 = vld [vmem:[%s5192_s6 + $0x120] sm:$0xff] }
  0x43   : > { %813 = vmatpush.msra.mxu0 %v700_v47 }
  0x44   : > { %646 = vmatpush.msrb.mxu3 %v517_v7  ;;  %v726_v7 = vld [vmem:[%s5192_s6 + $0x128] sm:$0xff] }
  0x45   : > { %814 = vmatpush.msra.mxu0 %v698_v49 }
  0x47   : > { %815 = vmatpush.msra.mxu0 %v696_v51  ;;  %v3198_v51 = vld [vmem:[%s5196_s10 + $0x2] ss:$8 sm:$0x3] }
  0x48   : > { %v738_v54 = vperm.slane %v3198_v51, 0 }
  0x49   : > { %816 = vmatpush.msra.mxu0 %v694_v53 }
  0x4b   : > { %817 = vmatpush.msra.mxu0 %v692_v55  ;;  %v739_v55 = vperm.slane %v3198_v51, 1  ;;  %v954_v51 = vld [vmem:[%s5189_s3 + $0xd8] sm:$0xff] }
  0x4d   : > { %818 = vmatpush.msra.mxu0 %v690_v57 }
  0x9a   : > { %v475_v8 = vpop.f32.mrf.mxu0  ;;  %v501_v9 = vpop.f32.mrf.mxu1 }
  0x9b   : > { %v476_v10 = vadd.f32 %v475_v8, %v437_v4  ;;  %v502_v11 = vadd.f32 %v501_v9, %v438_v5 }
  0x9d   : > { %3402 = vtanh.f32 %v476_v10 }
  0x9e   : > { %3404 = vtanh.f32 %v502_v11  ;;  %v723_v11 = vld [vmem:[%s5192_s6 + $0x110] sm:$0xff] }
  0xa2   : > { %v478_v12 = vpop.f32.mrf.mxu0  ;;  %v504_v13 = vpop.f32.mrf.mxu1 }
  0xa3   : > { %v3403_v14 = vpop.eup %3402  ;;  %v479_v15 = vadd.f32 %v478_v12, %v437_v4  ;;  %v505_v16 = vadd.f32 %v504_v13, %v438_v5  ;;  %v724_v12 = vld [vmem:[%s5192_s6 + $0x118] sm:$0xff] }
  0xa4   : > { %v3405_v17 = vpop.eup %3404  ;;  %595 = vmatmul.f32.vlgmr.msra.gmra.mxu2 %v3403_v14 }
  0xa5   : > { %3406 = vtanh.f32 %v479_v15  ;;  %3207 = vmatmul.msk.f32.vlgmr.msra.gmra.mxu3 %vm569_vm2, %v3405_v17  ;;  %3210 = vmatmul.msk.f32.vlgmr.msrb.gmra.mxu0 %vm569_vm2, %v3405_v17  ;;  %v722_v15 = vld [vmem:[%s5192_s6 + $0x108] sm:$0xff] }
  0xa6   : > { %3408 = vtanh.f32 %v505_v16  ;;  %837 = vmatpush.msra.mxu3 %v736_v59 }
  0xa8   : > { %838 = vmatpush.msra.mxu3 %v734_v61 }
  0xaa   : > { %v481_v18 = vpop.f32.mrf.mxu0  ;;  %v507_v19 = vpop.f32.mrf.mxu1  ;;  %839 = vmatpush.msra.mxu3 %v732_v63 }
  0xab   : > { %v3407_v20 = vpop.eup %3406  ;;  %v482_v21 = vadd.f32 %v481_v18, %v437_v4  ;;  %v508_v22 = vadd.f32 %v507_v19, %v438_v5  ;;  %v727_v4 = vld [vmem:[%s5192_s6 + $0x130] sm:$0xff]  ;;  %v728_v5 = vld [vmem:[%s5192_s6 + $0x138] sm:$0xff] }
  0xac   : > { %v3409_v23 = vpop.eup %3408  ;;  %598 = vmatmul.f32.gmra.mxu2 %v3407_v20  ;;  %840 = vmatpush.msra.mxu3 %v730_v2 }
  0xad   : > { %3410 = vtanh.f32 %v482_v21  ;;  %3208 = vmatmul.msk.f32.gmra.mxu3 %vm569_vm2, %v3409_v23  ;;  %3211 = vmatmul.msk.f32.gmra.mxu0 %vm569_vm2, %v3409_v23 }
  0xae   : > { %3412 = vtanh.f32 %v508_v22  ;;  %789 = vmatpush.msrb.mxu2 %v727_v4  ;;  %841 = vmatpush.msra.mxu3 %v728_v5  ;;  %v927_v5 = vld [vmem:[%s5189_s3] sm:$0xff] }
  0xb0   : > { %790 = vmatpush.msrb.mxu2 %v725_v6  ;;  %842 = vmatpush.msra.mxu3 %v726_v7  ;;  %v941_v7 = vld [vmem:[%s5189_s3 + $0x70] sm:$0xff] }
  0xb2   : > { %791 = vmatpush.msrb.mxu2 %v723_v11  ;;  %843 = vmatpush.msra.mxu3 %v724_v12  ;;  %v871_v11 = vld [vmem:[%s5188_s2 + $0x80] sm:$0xff]  ;;  %v929_v12 = vld [vmem:[%s5189_s3 + $0x10] sm:$0xff] }
  0xb3   : > { %v3411_v31 = vpop.eup %3410 }
  0xb4   : > { %v3413_v34 = vpop.eup %3412  ;;  %601 = vmatmul.f32.gmra.mxu2 %v3411_v31  ;;  %844 = vmatpush.msra.mxu3 %v722_v15  ;;  %v930_v15 = vld [vmem:[%s5189_s3 + $0x18] sm:$0xff] }
  0xb5   : > { %3209 = vmatmul.msk.f32.gmra.mxu3 %vm569_vm2, %v3413_v34  ;;  %3212 = vmatmul.msk.f32.gmra.mxu0 %vm569_vm2, %v3413_v34 }
  0xbd   : > { %647 = vmatmul.f32.vlgmr.msrb.gmra.mxu3 %v3403_v14  ;;  %v721_v14 = vld [vmem:[%s5192_s6 + $0x100] sm:$0xff] }
  0xbe   : > { %792 = vmatpush.msrb.mxu2 %v721_v14  ;;  %v872_v14 = vld [vmem:[%s5188_s2 + $0x88] sm:$0xff] }
  0xc5   : > { %650 = vmatmul.f32.gmra.mxu3 %v3407_v20 }
  0xcd   : > { %653 = vmatmul.f32.gmra.mxu3 %v3411_v31 }
 0x122   : > { %v674_v27 = vpop.f32.mrf.mxu0 }
 0x127   : > { %v596_v8 = vpop.f32.mrf.mxu2 }
 0x128   : > { %v597_v9 = vadd.f32 %v596_v8, %v565_v3  ;;  %v622_v10 = vpop.f32.mrf.mxu3  ;;  %v870_v8 = vld [vmem:[%s5188_s2 + $0x78] sm:$0xff] }
 0x12a   : > { %v623_v13 = vadd.f32 %v622_v10, %v597_v9  ;;  %v677_v32 = vpop.f32.mrf.mxu0  ;;  %v928_v9 = vld [vmem:[%s5189_s3 + $0x8] sm:$0xff]  ;;  %v942_v10 = vld [vmem:[%s5189_s3 + $0x78] sm:$0xff] }
 0x12c   : > { %3414 = vtanh.f32 %v623_v13  ;;  %v943_v13 = vld [vmem:[%s5189_s3 + $0x80] sm:$0xff] }
 0x12f   : > { %v599_v16 = vpop.f32.mrf.mxu2 }
 0x130   : > { %v600_v17 = vadd.f32 %v599_v16, %v565_v3  ;;  %v625_v18 = vpop.f32.mrf.mxu3  ;;  %v944_v16 = vld [vmem:[%s5189_s3 + $0x88] sm:$0xff] }
 0x132   : > { %v3415_v19 = vpop.eup %3414  ;;  %v626_v20 = vadd.f32 %v625_v18, %v600_v17  ;;  %v680_v39 = vpop.f32.mrf.mxu0  ;;  %v873_v17 = vld [vmem:[%s5188_s2 + $0x90] sm:$0xff]  ;;  %v931_v18 = vld [vmem:[%s5189_s3 + $0x20] sm:$0xff] }
 0x133   : > { %767 = vmatmul.f32.vlgmr.msrb.gmra.mxu1 %v3415_v19  ;;  %819 = vmatmul.f32.vlgmr.msra.gmra.mxu0 %v3415_v19  ;;  %v945_v19 = vld [vmem:[%s5189_s3 + $0x90] sm:$0xff] }
 0x134   : > { %3416 = vtanh.f32 %v626_v20  ;;  %v874_v20 = vld [vmem:[%s5188_s2 + $0x98] sm:$0xff] }
 0x137   : > { %v602_v21 = vpop.f32.mrf.mxu2 }
 0x138   : > { %v603_v22 = vadd.f32 %v602_v21, %v565_v3  ;;  %v628_v23 = vpop.f32.mrf.mxu3  ;;  %v932_v21 = vld [vmem:[%s5189_s3 + $0x28] sm:$0xff] }
 0x13a   : > { %v3417_v24 = vpop.eup %3416  ;;  %v629_v25 = vadd.f32 %v628_v23, %v603_v22  ;;  %v946_v22 = vld [vmem:[%s5189_s3 + $0x98] sm:$0xff]  ;;  %v875_v23 = vld [vmem:[%s5188_s2 + $0xa0] sm:$0xff] }
 0x13b   : > { %770 = vmatmul.f32.gmra.mxu1 %v3417_v24  ;;  %822 = vmatmul.f32.gmra.mxu0 %v3417_v24  ;;  %v933_v24 = vld [vmem:[%s5189_s3 + $0x30] sm:$0xff] }
 0x13c   : > { %3418 = vtanh.f32 %v629_v25  ;;  %v947_v25 = vld [vmem:[%s5189_s3 + $0xa0] sm:$0xff] }
 0x140   : > { %v648_v28 = vpop.f32.mrf.mxu3 }
 0x141   : > { %v649_v29 = vadd.f32 %v648_v28, %v566_v26  ;;  %v948_v28 = vld [vmem:[%s5189_s3 + $0xa8] sm:$0xff] }
 0x142   : > { %v3419_v30 = vpop.eup %3418 }
 0x143   : > { %v675_v31 = vadd.f32 %v674_v27, %v649_v29  ;;  %773 = vmatmul.f32.gmra.mxu1 %v3419_v30  ;;  %825 = vmatmul.f32.gmra.mxu0 %v3419_v30  ;;  %v934_v27 = vld [vmem:[%s5189_s3 + $0x38] sm:$0xff]  ;;  %v877_v29 = vld [vmem:[%s5188_s2 + $0xb0] sm:$0xff]  ;;  %v935_v30 = vld [vmem:[%s5189_s3 + $0x40] sm:$0xff] }
 0x145   : > { %3420 = vtanh.f32 %v675_v31  ;;  %v949_v31 = vld [vmem:[%s5189_s3 + $0xb0] sm:$0xff] }
 0x148   : > { %v651_v33 = vpop.f32.mrf.mxu3 }
 0x149   : > { %v652_v34 = vadd.f32 %v651_v33, %v566_v26  ;;  %v936_v33 = vld [vmem:[%s5189_s3 + $0x48] sm:$0xff] }
 0x14b   : > { %v3421_v35 = vpop.eup %3420  ;;  %v678_v36 = vadd.f32 %v677_v32, %v652_v34  ;;  %v878_v32 = vld [vmem:[%s5188_s2 + $0xb8] sm:$0xff] }
 0x14c   : > { %3213 = vmatmul.msk.f32.vlgmr.msrb.gmra.mxu2 %vm569_vm2, %v3421_v35  ;;  %3216 = vmatmul.msk.f32.vlgmr.msra.gmra.mxu3 %vm569_vm2, %v3421_v35  ;;  %v950_v34 = vld [vmem:[%s5189_s3 + $0xb8] sm:$0xff]  ;;  %v879_v35 = vld [vmem:[%s5188_s2 + $0xc0] sm:$0xff] }
 0x14d   : > { %3422 = vtanh.f32 %v678_v36  ;;  %v937_v36 = vld [vmem:[%s5189_s3 + $0x50] sm:$0xff] }
 0x150   : > { %v654_v37 = vpop.f32.mrf.mxu3 }
 0x151   : > { %v655_v38 = vadd.f32 %v654_v37, %v566_v26  ;;  %v876_v26 = vld [vmem:[%s5188_s2 + $0xa8] sm:$0xff]  ;;  %v951_v37 = vld [vmem:[%s5189_s3 + $0xc0] sm:$0xff] }
 0x153   : > { %v3423_v40 = vpop.eup %3422  ;;  %v681_v41 = vadd.f32 %v680_v39, %v655_v38  ;;  %v880_v38 = vld [vmem:[%s5188_s2 + $0xc8] sm:$0xff]  ;;  %v938_v39 = vld [vmem:[%s5189_s3 + $0x58] sm:$0xff] }
 0x154   : > { %3214 = vmatmul.msk.f32.gmra.mxu2 %vm569_vm2, %v3423_v40  ;;  %3217 = vmatmul.msk.f32.gmra.mxu3 %vm569_vm2, %v3423_v40  ;;  %v952_v40 = vld [vmem:[%s5189_s3 + $0xc8] sm:$0xff] }
 0x155   : > { %3424 = vtanh.f32 %v681_v41  ;;  %v881_v41 = vld [vmem:[%s5188_s2 + $0xd0] sm:$0xff] }
 0x15b   : > { %v3425_v42 = vpop.eup %3424 }
 0x15c   : > { %3215 = vmatmul.msk.f32.gmra.mxu2 %vm569_vm2, %v3425_v42  ;;  %3218 = vmatmul.msk.f32.gmra.mxu3 %vm569_vm2, %v3425_v42  ;;  %v939_v42 = vld [vmem:[%s5189_s3 + $0x60] sm:$0xff] }
 0x1b0   : > { %v768_v43 = vpop.f32.mrf.mxu1  ;;  %v820_v44 = vpop.f32.mrf.mxu0 }
 0x1b1   : > { %v821_v0 = vadd.f32 %v820_v44, %v739_v55  ;;  %v769_v2 = vadd.f32 %v768_v43, %v738_v54  ;;  %v953_v43 = vld [vmem:[%s5189_s3 + $0xd0] sm:$0xff]  ;;  %v882_v44 = vld [vmem:[%s5188_s2 + $0xd8] sm:$0xff] }
 0x1b8   : > { %v771_v47 = vpop.f32.mrf.mxu1  ;;  %v823_v48 = vpop.f32.mrf.mxu0 }
 0x1b9   : > { %v824_v60 = vadd.f32 %v823_v48, %v739_v55  ;;  %v772_v63 = vadd.f32 %v771_v47, %v738_v54  ;;  %v1983_v47 = vld [vmem:[%s5193_s7 + $0x68] sm:$0xff]  ;;  %v3648_v48 = vmov 0  }
 0x1ba   : > { %3400 = vset.pattern.permute.xlu1 %v3648_v48  ;;  %3399 = vset.pattern.permute.xlu0 %v3648_v48 }
 0x1bb   : > { %3401 = vset.pattern.permute.xlu2 %v3648_v48 }
 0x1c0   : > { %v774_v52 = vpop.f32.mrf.mxu1  ;;  %v826_v53 = vpop.f32.mrf.mxu0 }
 0x1c1   : > { %v775_v56 = vadd.f32 %v774_v52, %v738_v54  ;;  %v827_v57 = vadd.f32 %v826_v53, %v739_v55  ;;  %v1982_v52 = vld [vmem:[%s5193_s7 + $0x60] sm:$0xff]  ;;  %v1981_v54 = vld [vmem:[%s5193_s7 + $0x58] sm:$0xff]  ;;  %v1980_v55 = vld [vmem:[%s5193_s7 + $0x50] sm:$0xff] }
 0x1c2   : > { %v883_v53 = vld [vmem:[%s5188_s2 + $0xe0] sm:$0xff] }
 0x1cf   : > { %v794_v45 = vpop.f32.mrf.mxu2  ;;  %v846_v46 = vpop.f32.mrf.mxu3 }
 0x1d0   : > { %v847_v4 = vadd.f32 %v846_v46, %v821_v0  ;;  %v795_v6 = vadd.f32 %v794_v45, %v769_v2  ;;  %v1985_v45 = vld [vmem:[%s5193_s7 + $0x78] sm:$0xff]  ;;  %v1984_v46 = vld [vmem:[%s5193_s7 + $0x70] sm:$0xff]  ;;  %v1975_v0 = vld [vmem:[%s5193_s7 + $0x28] sm:$0xff] }
 0x1d1   : > { %3371 = vmatpush.msrb.mxu3 %v1985_v45  ;;  %v2226_v2 = vld [vmem:[%s4254_s12 + $0x38] sm:$0xff] }
 0x1d3   : > { %3372 = vmatpush.msrb.mxu3 %v1984_v46 }
 0x1d5   : > { %3373 = vmatpush.msrb.mxu3 %v1983_v47 }
 0x1d7   : > { %v797_v49 = vpop.f32.mrf.mxu2  ;;  %v849_v50 = vpop.f32.mrf.mxu3  ;;  %3374 = vmatpush.msrb.mxu3 %v1982_v52 }
 0x1d8   : > { %v850_v1 = vadd.f32 %v849_v50, %v824_v60  ;;  %v798_v3 = vadd.f32 %v797_v49, %v772_v63  ;;  %v2221_v49 = vld [vmem:[%s4254_s12 + $0x10] sm:$0xff]  ;;  %v940_v50 = vld [vmem:[%s5189_s3 + $0x68] sm:$0xff]  ;;  %v1978_v60 = vld [vmem:[%s5193_s7 + $0x40] sm:$0xff] }
 0x1d9   : > { %2303 = vperm.xlu1 %3400, %v2221_v49   ;;  %3375 = vmatpush.msrb.mxu3 %v1981_v54  ;;  %v1976_v63 = vld [vmem:[%s5193_s7 + $0x30] sm:$0xff] }
 0x1da   : > { %v861_v49 = vld [vmem:[%s5188_s2 + $0x30] sm:$0xff] }
 0x1db   : > { %3376 = vmatpush.msrb.mxu3 %v1980_v55 }
 0x1df   : > { %v800_v58 = vpop.f32.mrf.mxu2  ;;  %v852_v59 = vpop.f32.mrf.mxu3 }
 0x1e0   : > { %v801_v61 = vadd.f32 %v800_v58, %v775_v56  ;;  %v853_v62 = vadd.f32 %v852_v59, %v827_v57  ;;  %v1979_v56 = vld [vmem:[%s5193_s7 + $0x48] sm:$0xff]  ;;  %v2222_v57 = vld [vmem:[%s4254_s12 + $0x18] sm:$0xff]  ;;  %v855_v58 = vld [vmem:[%s5188_s2] sm:$0xff] }
 0x1e1   : > { %2308 = vperm.xlu1 %3400, %v2222_v57   ;;  %3377 = vmatpush.msrb.mxu3 %v1979_v56  ;;  %v955_v59 = vld [vmem:[%s5189_s3 + $0xe0] sm:$0xff] }
 0x1e2   : > { %1229 = vmatpush.msrb.mxu0 %v853_v62  ;;  %3365 = vmatpush.msra.mxu1 %v853_v62  ;;  %v1977_v62 = vld [vmem:[%s5193_s7 + $0x38] sm:$0xff] }
 0x1e3   : > { %3368 = vmatpush.msra.mxu2 %v801_v61  ;;  %3378 = vmatpush.msrb.mxu3 %v1978_v60 }
 0x1e4   : > { %1230 = vmatpush.msrb.mxu0 %v850_v1  ;;  %3366 = vmatpush.msra.mxu1 %v850_v1  ;;  %v2219_v1 = vld [vmem:[%s4254_s12] sm:$0xff] }
 0x1e5   : > { %3369 = vmatpush.msra.mxu2 %v798_v3  ;;  %3379 = vmatpush.msrb.mxu3 %v1977_v62 }
 0x1e6   : > { %1231 = vmatpush.msrb.mxu0 %v847_v4  ;;  %3367 = vmatpush.msra.mxu1 %v847_v4  ;;  %v956_v4 = vld [vmem:[%s5189_s3 + $0xe8] sm:$0xff] }
 0x1e7   : > { %3370 = vmatpush.msra.mxu2 %v795_v6  ;;  %3219 = vmatmul.msk.f32.vlgmr.msrb.gmra.mxu0 %vm999_vm3, %v927_v5  ;;  %v1974_v5 = vld [vmem:[%s5193_s7 + $0x20] sm:$0xff] }
 0x1e8   : > { %3233 = vmatmul.msk.f32.vlgmr.msra.gmra.mxu1 %vm999_vm3, %v941_v7  ;;  %1678 = vmatpush.msra.mxu0 %v801_v61  ;;  %v884_v61 = vld [vmem:[%s5188_s2 + $0xe8] sm:$0xff]  ;;  %v1973_v7 = vld [vmem:[%s5193_s7 + $0x18] sm:$0xff] }
 0x1e9   : > { %3306 = vmatmul.msk.f32.vlgmr.msra.gmra.mxu2 %vm999_vm3, %v870_v8  ;;  %3380 = vmatpush.msrb.mxu3 %v1976_v63  ;;  %v1972_v8 = vld [vmem:[%s5193_s7 + $0x10] sm:$0xff] }
 0x1ea   : > { %1679 = vmatpush.msra.mxu0 %v798_v3  ;;  %2293 = vperm.xlu0 %3399, %v2219_v1   ;;  %v856_v3 = vld [vmem:[%s5188_s2 + $0x8] sm:$0xff]  ;;  %v2239_v1 = vld [vmem:[%s4254_s12 + $0xa0] sm:$0xff] }
 0x1eb   : > { %2328 = vperm.xlu1 %3400, %v2226_v2   ;;  %3381 = vmatpush.msrb.mxu3 %v1975_v0  ;;  %v2234_v2 = vld [vmem:[%s4254_s12 + $0x78] sm:$0xff] }
 0x1ec   : > { %1680 = vmatpush.msra.mxu0 %v795_v6  ;;  %v885_v6 = vld [vmem:[%s5188_s2 + $0xf0] sm:$0xff] }
 0x1ed   : > { %3382 = vmatpush.msrb.mxu3 %v1974_v5 }
 0x1ee   : > { %1986 = vmatpush.msrb.mxu0 %v1985_v45  ;;  %v2235_v45 = vld [vmem:[%s4254_s12 + $0x80] sm:$0xff] }
 0x1ef   : > { %3220 = vmatmul.msk.f32.gmra.mxu0 %vm999_vm3, %v928_v9  ;;  %3383 = vmatpush.msrb.mxu3 %v1973_v7  ;;  %v1971_v9 = vld [vmem:[%s5193_s7 + $0x8] sm:$0xff] }
 0x1f0   : > { %3234 = vmatmul.msk.f32.gmra.mxu1 %vm999_vm3, %v942_v10  ;;  %1987 = vmatpush.msrb.mxu0 %v1984_v46  ;;  %v2220_v10 = vld [vmem:[%s4254_s12 + $0x8] sm:$0xff]  ;;  %v2227_v46 = vld [vmem:[%s4254_s12 + $0x40] sm:$0xff] }
 0x1f1   : > { %3307 = vmatmul.msk.f32.gmra.mxu2 %vm999_vm3, %v871_v11  ;;  %3384 = vmatpush.msrb.mxu3 %v1972_v8  ;;  %v2229_v11 = vld [vmem:[%s4254_s12 + $0x50] sm:$0xff] }
 0x1f2   : > { %1988 = vmatpush.msrb.mxu0 %v1983_v47  ;;  %2298 = vperm.xlu0 %3399, %v2220_v10   ;;  %v892_v10 = vld [vmem:[%s5188_s2 + $0x128] sm:$0xff] }
 0x1f3   : > { %2343 = vperm.xlu1 %3400, %v2229_v11   ;;  %3385 = vmatpush.msrb.mxu3 %v1971_v9  ;;  %v2237_v11 = vld [vmem:[%s4254_s12 + $0x90] sm:$0xff] }
 0x1f4   : > { %1989 = vmatpush.msrb.mxu0 %v1982_v52 }
 0x1f6   : > { %1990 = vmatpush.msrb.mxu0 %v1981_v54  ;;  %v890_v54 = vld [vmem:[%s5188_s2 + $0x118] sm:$0xff] }
 0x1f7   : > { %3221 = vmatmul.msk.f32.gmra.mxu0 %vm999_vm3, %v929_v12 }
 0x1f8   : > { %3235 = vmatmul.msk.f32.gmra.mxu1 %vm999_vm3, %v943_v13  ;;  %1991 = vmatpush.msrb.mxu0 %v1980_v55  ;;  %v857_v13 = vld [vmem:[%s5188_s2 + $0x10] sm:$0xff]  ;;  %v2238_v55 = vld [vmem:[%s4254_s12 + $0x98] sm:$0xff] }
 0x1f9   : > { %3308 = vmatmul.msk.f32.gmra.mxu2 %vm999_vm3, %v872_v14 }
 0x1fa   : > { %1992 = vmatpush.msrb.mxu0 %v1979_v56  ;;  %v2230_v56 = vld [vmem:[%s4254_s12 + $0x58] sm:$0xff] }
 0x1fc   : > { %1993 = vmatpush.msrb.mxu0 %v1978_v60 }
 0x1fe   : > { %1994 = vmatpush.msrb.mxu0 %v1977_v62 }
 0x1ff   : > { %3222 = vmatmul.msk.f32.gmra.mxu0 %vm999_vm3, %v930_v15  ;;  %v957_v15 = vld [vmem:[%s5189_s3 + $0xf0] sm:$0xff] }
 0x200   : > { %3236 = vmatmul.msk.f32.gmra.mxu1 %vm999_vm3, %v944_v16  ;;  %1995 = vmatpush.msrb.mxu0 %v1976_v63  ;;  %v1970_v16 = vld [vmem:[%s5193_s7] sm:$0xff] }
 0x201   : > { %3309 = vmatmul.msk.f32.gmra.mxu2 %vm999_vm3, %v873_v17  ;;  %v886_v17 = vld [vmem:[%s5188_s2 + $0xf8] sm:$0xff]  ;;  %3386 = vmatpush.msrb.mxu3 %v1970_v16 }
 0x202   : > { %1996 = vmatpush.msrb.mxu0 %v1975_v0  ;;  %v891_v0 = vld [vmem:[%s5188_s2 + $0x120] sm:$0xff] }
 0x204   : > { %1997 = vmatpush.msrb.mxu0 %v1974_v5  ;;  %v863_v5 = vld [vmem:[%s5188_s2 + $0x40] sm:$0xff] }
 0x206   : > { %1998 = vmatpush.msrb.mxu0 %v1973_v7  ;;  %v963_v7 = vld [vmem:[%s5189_s3 + $0x120] sm:$0xff] }
 0x207   : > { %3223 = vmatmul.msk.f32.gmra.mxu0 %vm999_vm3, %v931_v18  ;;  %v2225_v18 = vld [vmem:[%s4254_s12 + $0x30] sm:$0xff] }
 0x208   : > { %3237 = vmatmul.msk.f32.gmra.mxu1 %vm999_vm3, %v945_v19  ;;  %v2232_v19 = vld [vmem:[%s4254_s12 + $0x68] sm:$0xff]  ;;  %2323 = vperm.xlu0 %3399, %v2225_v18  }
 0x209   : > { %3310 = vmatmul.msk.f32.gmra.mxu2 %vm999_vm3, %v874_v20  ;;  %2358 = vperm.xlu1 %3400, %v2232_v19   ;;  %v964_v18 = vld [vmem:[%s5189_s3 + $0x128] sm:$0xff] }
 0x20a   : > { %1999 = vmatpush.msrb.mxu0 %v1972_v8 }
 0x20c   : > { %2000 = vmatpush.msrb.mxu0 %v1971_v9 }
 0x20e   : > { %2001 = vmatpush.msrb.mxu0 %v1970_v16  ;;  %v864_v16 = vld [vmem:[%s5188_s2 + $0x48] sm:$0xff] }
 0x20f   : > { %3224 = vmatmul.msk.f32.gmra.mxu0 %vm999_vm3, %v932_v21 }
 0x210   : > { %3238 = vmatmul.msk.f32.gmra.mxu1 %vm999_vm3, %v946_v22  ;;  %v858_v22 = vld [vmem:[%s5188_s2 + $0x18] sm:$0xff] }
 0x211   : > { %3311 = vmatmul.msk.f32.gmra.mxu2 %vm999_vm3, %v875_v23 }
 0x217   : > { %3225 = vmatmul.msk.f32.gmra.mxu0 %vm999_vm3, %v933_v24  ;;  %v958_v24 = vld [vmem:[%s5189_s3 + $0xf8] sm:$0xff] }
 0x218   : > { %3239 = vmatmul.msk.f32.gmra.mxu1 %vm999_vm3, %v947_v25  ;;  %v887_v25 = vld [vmem:[%s5188_s2 + $0x100] sm:$0xff] }
 0x219   : > { %3312 = vmatmul.msk.f32.gmra.mxu2 %vm999_vm3, %v876_v26  ;;  %v2228_v26 = vld [vmem:[%s4254_s12 + $0x48] sm:$0xff] }
 0x21a   : > { %2338 = vperm.xlu0 %3399, %v2228_v26  }
 0x21f   : > { %3226 = vmatmul.msk.f32.gmra.mxu0 %vm999_vm3, %v934_v27  ;;  %v2223_v27 = vld [vmem:[%s4254_s12 + $0x20] sm:$0xff] }
 0x220   : > { %3240 = vmatmul.msk.f32.gmra.mxu1 %vm999_vm3, %v948_v28  ;;  %v2233_v28 = vld [vmem:[%s4254_s12 + $0x70] sm:$0xff]  ;;  %2313 = vperm.xlu2 %3401, %v2223_v27  }
 0x221   : > { %3313 = vmatmul.msk.f32.gmra.mxu2 %vm999_vm3, %v877_v29  ;;  %2363 = vperm.xlu1 %3400, %v2233_v28   ;;  %v865_v28 = vld [vmem:[%s5188_s2 + $0x50] sm:$0xff] }
 0x227   : > { %3227 = vmatmul.msk.f32.gmra.mxu0 %vm999_vm3, %v935_v30 }
 0x228   : > { %3241 = vmatmul.msk.f32.gmra.mxu1 %vm999_vm3, %v949_v31  ;;  %v859_v31 = vld [vmem:[%s5188_s2 + $0x20] sm:$0xff] }
 0x229   : > { %3314 = vmatmul.msk.f32.gmra.mxu2 %vm999_vm3, %v878_v32 }
 0x22f   : > { %3228 = vmatmul.msk.f32.gmra.mxu0 %vm999_vm3, %v936_v33  ;;  %v959_v33 = vld [vmem:[%s5189_s3 + $0x100] sm:$0xff] }
 0x230   : > { %3242 = vmatmul.msk.f32.gmra.mxu1 %vm999_vm3, %v950_v34  ;;  %v888_v34 = vld [vmem:[%s5188_s2 + $0x108] sm:$0xff] }
 0x231   : > { %3315 = vmatmul.msk.f32.gmra.mxu2 %vm999_vm3, %v879_v35  ;;  %v2231_v35 = vld [vmem:[%s4254_s12 + $0x60] sm:$0xff] }
 0x232   : > { %2353 = vperm.xlu0 %3399, %v2231_v35  }
 0x237   : > { %3229 = vmatmul.msk.f32.gmra.mxu0 %vm999_vm3, %v937_v36  ;;  %v2224_v36 = vld [vmem:[%s4254_s12 + $0x28] sm:$0xff] }
 0x238   : > { %3243 = vmatmul.msk.f32.gmra.mxu1 %vm999_vm3, %v951_v37  ;;  %v2236_v37 = vld [vmem:[%s4254_s12 + $0x88] sm:$0xff]  ;;  %2318 = vperm.xlu2 %3401, %v2224_v36   ;;  %v894_v36 = vld [vmem:[%s5188_s2 + $0x138] sm:$0xff] }
 0x239   : > { %3316 = vmatmul.msk.f32.gmra.mxu2 %vm999_vm3, %v880_v38  ;;  %2378 = vperm.xlu1 %3400, %v2236_v37  }
 0x23a   : > { %2373 = vperm.xlu0 %3399, %v2235_v45   ;;  %v895_v45 = vld [vmem:[%s5188_s2 + $0x140] sm:$0xff] }
 0x23f   : > { %3230 = vmatmul.msk.f32.gmra.mxu0 %vm999_vm3, %v938_v39 }
 0x240   : > { %3244 = vmatmul.msk.f32.gmra.mxu1 %vm999_vm3, %v952_v40  ;;  %v860_v40 = vld [vmem:[%s5188_s2 + $0x28] sm:$0xff]  ;;  %2333 = vperm.xlu2 %3401, %v2227_v46   ;;  %v2243_v46 = vld [vmem:[%s4254_s12 + $0xc0] sm:$0xff] }
 0x241   : > { %3317 = vmatmul.msk.f32.gmra.mxu2 %vm999_vm3, %v881_v41  ;;  %2393 = vperm.xlu1 %3400, %v2239_v1  }
 0x242   : > { %2388 = vperm.xlu0 %3399, %v2238_v55  }
 0x247   : > { %3231 = vmatmul.msk.f32.gmra.mxu0 %vm999_vm3, %v939_v42  ;;  %v960_v42 = vld [vmem:[%s5189_s3 + $0x108] sm:$0xff] }
 0x248   : > { %3245 = vmatmul.msk.f32.gmra.mxu1 %vm999_vm3, %v953_v43  ;;  %2348 = vperm.xlu2 %3401, %v2230_v56   ;;  %v896_v56 = vld [vmem:[%s5188_s2 + $0x148] sm:$0xff] }
 0x249   : > { %3318 = vmatmul.msk.f32.gmra.mxu2 %vm999_vm3, %v882_v44  ;;  %v889_v44 = vld [vmem:[%s5188_s2 + $0x110] sm:$0xff] }
 0x24f   : > { %3232 = vmatmul.msk.f32.gmra.mxu0 %vm999_vm3, %v940_v50 }
 0x250   : > { %3246 = vmatmul.msk.f32.gmra.mxu1 %vm999_vm3, %v954_v51  ;;  %v961_v51 = vld [vmem:[%s5189_s3 + $0x110] sm:$0xff]  ;;  %2368 = vperm.xlu2 %3401, %v2234_v2  }
 0x251   : > { %3319 = vmatmul.msk.f32.gmra.mxu2 %vm999_vm3, %v883_v53 }
 0x257   : > { %3291 = vmatmul.msk.f32.vlgmr.msra.gmra.mxu0 %vm999_vm3, %v855_v58 }
 0x258   : > { %3247 = vmatmul.msk.f32.gmra.mxu1 %vm999_vm3, %v955_v59  ;;  %v862_v59 = vld [vmem:[%s5188_s2 + $0x38] sm:$0xff]  ;;  %2383 = vperm.xlu2 %3401, %v2237_v11   ;;  %v969_v11 = vld [vmem:[%s5189_s3 + $0x150] sm:$0xff] }
 0x259   : > { %3320 = vmatmul.msk.f32.gmra.mxu2 %vm999_vm3, %v884_v61  ;;  %v962_v61 = vld [vmem:[%s5189_s3 + $0x118] sm:$0xff] }
 0x25f   : > { %3292 = vmatmul.msk.f32.gmra.mxu0 %vm999_vm3, %v856_v3 }
 0x260   : > { %3248 = vmatmul.msk.f32.gmra.mxu1 %vm999_vm3, %v956_v4 }
 0x261   : > { %3321 = vmatmul.msk.f32.gmra.mxu2 %vm999_vm3, %v885_v6 }
 0x264   : > { %v4349_v12 = vpop.f32.mrf.mxu0 }
 0x265   : > { %v4354_v14 = vpop.f32.mrf.mxu1 }
 0x267   : > { %3293 = vmatmul.msk.f32.gmra.mxu0 %vm999_vm3, %v857_v13 }
 0x268   : > { %3249 = vmatmul.msk.f32.gmra.mxu1 %vm999_vm3, %v957_v15 }
 0x269   : > { %3322 = vmatmul.msk.f32.gmra.mxu2 %vm999_vm3, %v886_v17 }
 0x26c   : > { %v4370_v20 = vpop.f32.mrf.mxu0  ;;  %v4372_v21 = vpop.f32.mrf.mxu2 }
 0x26d   : > { %v4377_v23 = vpop.f32.mrf.mxu1 }
 0x26f   : > { %3294 = vmatmul.msk.f32.gmra.mxu0 %vm999_vm3, %v858_v22 }
 0x270   : > { %3250 = vmatmul.msk.f32.gmra.mxu1 %vm999_vm3, %v958_v24  ;;  %v893_v24 = vld [vmem:[%s5188_s2 + $0x130] sm:$0xff] }
 0x271   : > { %3323 = vmatmul.msk.f32.gmra.mxu2 %vm999_vm3, %v887_v25  ;;  %v2241_v25 = vld [vmem:[%s4254_s12 + $0xb0] sm:$0xff] }
 0x272   : > { %2403 = vperm.xlu0 %3399, %v2241_v25  }
 0x274   : > { %v4391_v29 = vpop.f32.mrf.mxu0  ;;  %v4393_v30 = vpop.f32.mrf.mxu2 }
 0x275   : > { %v4398_v32 = vpop.f32.mrf.mxu1 }
 0x277   : > { %3295 = vmatmul.msk.f32.gmra.mxu0 %vm999_vm3, %v859_v31 }
 0x278   : > { %3251 = vmatmul.msk.f32.gmra.mxu1 %vm999_vm3, %v959_v33  ;;  %v965_v33 = vld [vmem:[%s5189_s3 + $0x130] sm:$0xff] }
 0x279   : > { %3324 = vmatmul.msk.f32.gmra.mxu2 %vm999_vm3, %v888_v34 }
 0x27a   : > { %2413 = vperm.xlu0 %3399, %v2243_v46  }
 0x27c   : > { %v4412_v38 = vpop.f32.mrf.mxu0  ;;  %v1733_v39 = vpop.f32.mrf.mxu2 }
 0x27d   : > { %v1284_v41 = vpop.f32.mrf.mxu1 }
 0x27e   : > { %v1734_v43 = vadd.f32 %v1733_v39, %v1284_v41 }
 0x27f   : > { %3296 = vmatmul.msk.f32.gmra.mxu0 %vm999_vm3, %v860_v40  ;;  %v866_v40 = vld [vmem:[%s5188_s2 + $0x58] sm:$0xff] }
 0x280   : > { %3426 = vtanh.f32 %v1734_v43  ;;  %3252 = vmatmul.msk.f32.gmra.mxu1 %vm999_vm3, %v960_v42  ;;  %v966_v42 = vld [vmem:[%s5189_s3 + $0x138] sm:$0xff] }
 0x281   : > { %3325 = vmatmul.msk.f32.gmra.mxu2 %vm999_vm3, %v889_v44 }
 0x284   : > { %v4428_v47 = vpop.f32.mrf.mxu0  ;;  %v1736_v48 = vpop.f32.mrf.mxu2 }
 0x285   : > { %v1287_v50 = vpop.f32.mrf.mxu1 }
 0x286   : > { %v3427_v52 = vpop.eup %3426  ;;  %v1737_v53 = vadd.f32 %v1736_v48, %v1287_v50  ;;  %v2240_v48 = vld [vmem:[%s4254_s12 + $0xa8] sm:$0xff] }
 0x287   : > { %2053 = vmatmul.f32.vlgmr.msrb.gmra.mxu3 %v3427_v52  ;;  %3297 = vmatmul.msk.f32.gmra.mxu0 %vm999_vm3, %v861_v49 }
 0x288   : > { %3428 = vtanh.f32 %v1737_v53  ;;  %3253 = vmatmul.msk.f32.gmra.mxu1 %vm999_vm3, %v961_v51  ;;  %2398 = vperm.xlu2 %3401, %v2240_v48   ;;  %v867_v51 = vld [vmem:[%s5188_s2 + $0x60] sm:$0xff] }
 0x289   : > { %3326 = vmatmul.msk.f32.gmra.mxu2 %vm999_vm3, %v890_v54  ;;  %v967_v53 = vld [vmem:[%s5189_s3 + $0x140] sm:$0xff] }
 0x28c   : > { %v4444_v57 = vpop.f32.mrf.mxu0  ;;  %v1739_v58 = vpop.f32.mrf.mxu2 }
 0x28d   : > { %v1290_v60 = vpop.f32.mrf.mxu1 }
 0x28e   : > { %v3429_v62 = vpop.eup %3428  ;;  %v1740_v63 = vadd.f32 %v1739_v58, %v1290_v60  ;;  %v2247_v58 = vld [vmem:[%s4254_s12 + $0xe0] sm:$0xff] }
 0x28f   : > { %2056 = vmatmul.f32.gmra.mxu3 %v3429_v62  ;;  %3298 = vmatmul.msk.f32.gmra.mxu0 %vm999_vm3, %v862_v59  ;;  %v2244_v59 = vld [vmem:[%s4254_s12 + $0xc8] sm:$0xff] }
 0x290   : > { %3430 = vtanh.f32 %v1740_v63  ;;  %3254 = vmatmul.msk.f32.gmra.mxu1 %vm999_vm3, %v962_v61  ;;  %2433 = vperm.xlu0 %3399, %v2247_v58   ;;  %v868_v62 = vld [vmem:[%s5188_s2 + $0x68] sm:$0xff] }
 0x291   : > { %3327 = vmatmul.msk.f32.gmra.mxu2 %vm999_vm3, %v891_v0  ;;  %2418 = vperm.xlu1 %3400, %v2244_v59   ;;  %v968_v0 = vld [vmem:[%s5189_s3 + $0x148] sm:$0xff] }
 0x294   : > { %v4460_v3 = vpop.f32.mrf.mxu0  ;;  %v1742_v4 = vpop.f32.mrf.mxu2 }
 0x295   : > { %v1293_v6 = vpop.f32.mrf.mxu1 }
 0x296   : > { %v3431_v8 = vpop.eup %3430  ;;  %v1743_v9 = vadd.f32 %v1742_v4, %v1293_v6  ;;  %v897_v4 = vld [vmem:[%s5188_s2 + $0x150] sm:$0xff] }
 0x297   : > { %2059 = vmatmul.f32.gmra.mxu3 %v3431_v8  ;;  %3299 = vmatmul.msk.f32.gmra.mxu0 %vm999_vm3, %v863_v5  ;;  %v2242_v5 = vld [vmem:[%s4254_s12 + $0xb8] sm:$0xff]  ;;  %v2245_v6 = vld [vmem:[%s4254_s12 + $0xd0] sm:$0xff] }
 0x298   : > { %3432 = vtanh.f32 %v1743_v9  ;;  %3255 = vmatmul.msk.f32.gmra.mxu1 %vm999_vm3, %v963_v7  ;;  %2408 = vperm.xlu2 %3401, %v2242_v5   ;;  %v869_v9 = vld [vmem:[%s5188_s2 + $0x70] sm:$0xff]  ;;  %v4610_v5 = vpop.permute.xlu2 %2313 }
 0x299   : > { %3328 = vmatmul.msk.f32.gmra.mxu2 %vm999_vm3, %v892_v10  ;;  %2423 = vperm.xlu0 %3399, %v2245_v6  }
 0x29c   : > { %v4475_v13 = vpop.f32.mrf.mxu0  ;;  %v1745_v15 = vpop.f32.mrf.mxu2 }
 0x29d   : > { %v1296_v17 = vpop.f32.mrf.mxu1 }
 0x29e   : > { %v3433_v19 = vpop.eup %3432  ;;  %v1746_v22 = vadd.f32 %v1745_v15, %v1296_v17  ;;  %v898_v17 = vld [vmem:[%s5188_s2 + $0x158] sm:$0xff] }
 0x29f   : > { %2062 = vmatmul.f32.gmra.mxu3 %v3433_v19  ;;  %3300 = vmatmul.msk.f32.gmra.mxu0 %vm999_vm3, %v864_v16 }
 0x2a0   : > { %3434 = vtanh.f32 %v1746_v22  ;;  %3256 = vmatmul.msk.f32.gmra.mxu1 %vm999_vm3, %v964_v18 }
 0x2a1   : > { %3329 = vmatmul.msk.f32.gmra.mxu2 %vm999_vm3, %v893_v24  ;;  %v970_v24 = vld [vmem:[%s5189_s3 + $0x158] sm:$0xff] }
 0x2a4   : > { %v4490_v26 = vpop.f32.mrf.mxu0  ;;  %v1748_v27 = vpop.f32.mrf.mxu2 }
 0x2a5   : > { %v1299_v31 = vpop.f32.mrf.mxu1 }
 0x2a6   : > { %v3435_v34 = vpop.eup %3434  ;;  %v1749_v35 = vadd.f32 %v1748_v27, %v1299_v31  ;;  %v2249_v31 = vld [vmem:[%s4254_s12 + $0xf0] sm:$0xff] }
 0x2a7   : > { %2065 = vmatmul.f32.gmra.mxu3 %v3435_v34  ;;  %3301 = vmatmul.msk.f32.gmra.mxu0 %vm999_vm3, %v865_v28  ;;  %v899_v28 = vld [vmem:[%s5188_s2 + $0x160] sm:$0xff] }
 0x2a8   : > { %3436 = vtanh.f32 %v1749_v35  ;;  %3257 = vmatmul.msk.f32.gmra.mxu1 %vm999_vm3, %v965_v33  ;;  %2443 = vperm.xlu1 %3400, %v2249_v31  }
 0x2a9   : > { %3330 = vmatmul.msk.f32.gmra.mxu2 %vm999_vm3, %v894_v36 }
 0x2ac   : > { %v4504_v37 = vpop.f32.mrf.mxu0  ;;  %v1751_v39 = vpop.f32.mrf.mxu2 }
 0x2ad   : > { %v1302_v41 = vpop.f32.mrf.mxu1 }
 0x2ae   : > { %v3437_v43 = vpop.eup %3436  ;;  %v1752_v44 = vadd.f32 %v1751_v39, %v1302_v41  ;;  %v971_v39 = vld [vmem:[%s5189_s3 + $0x160] sm:$0xff] }
 0x2af   : > { %2068 = vmatmul.f32.gmra.mxu3 %v3437_v43  ;;  %3302 = vmatmul.msk.f32.gmra.mxu0 %vm999_vm3, %v866_v40  ;;  %v2248_v43 = vld [vmem:[%s4254_s12 + $0xe8] sm:$0xff] }
 0x2b0   : > { %3438 = vtanh.f32 %v1752_v44  ;;  %3258 = vmatmul.msk.f32.gmra.mxu1 %vm999_vm3, %v966_v42  ;;  %v900_v42 = vld [vmem:[%s5188_s2 + $0x168] sm:$0xff]  ;;  %2438 = vperm.xlu1 %3400, %v2248_v43  }
 0x2b1   : > { %3331 = vmatmul.msk.f32.gmra.mxu2 %vm999_vm3, %v895_v45 }
 0x2b4   : > { %v4520_v49 = vpop.f32.mrf.mxu0  ;;  %v1754_v50 = vpop.f32.mrf.mxu2 }
 0x2b5   : > { %v1305_v52 = vpop.f32.mrf.mxu1 }
 0x2b6   : > { %v3439_v54 = vpop.eup %3438  ;;  %v1755_v55 = vadd.f32 %v1754_v50, %v1305_v52  ;;  %v4593_v52 = vpop.permute.xlu0 %2293 }
 0x2b7   : > { %2071 = vmatmul.f32.gmra.mxu3 %v3439_v54  ;;  %3303 = vmatmul.msk.f32.gmra.mxu0 %vm999_vm3, %v867_v51  ;;  %v972_v51 = vld [vmem:[%s5189_s3 + $0x168] sm:$0xff] }
 0x2b8   : > { %3440 = vtanh.f32 %v1755_v55  ;;  %3259 = vmatmul.msk.f32.gmra.mxu1 %vm999_vm3, %v967_v53  ;;  %v901_v55 = vld [vmem:[%s5188_s2 + $0x170] sm:$0xff] }
 0x2b9   : > { %3332 = vmatmul.msk.f32.gmra.mxu2 %vm999_vm3, %v896_v56 }
 0x2bc   : > { %v4536_v60 = vpop.f32.mrf.mxu0  ;;  %v1757_v61 = vpop.f32.mrf.mxu2 }
 0x2bd   : > { %v1308_v63 = vpop.f32.mrf.mxu1 }
 0x2be   : > { %v3441_v1 = vpop.eup %3440  ;;  %v1758_v2 = vadd.f32 %v1757_v61, %v1308_v63  ;;  %v973_v63 = vld [vmem:[%s5189_s3 + $0x170] sm:$0xff]  ;;  %v4612_v6 = vpop.permute.xlu0 %2298 }
 0x2bf   : > { %2074 = vmatmul.f32.gmra.mxu3 %v3441_v1  ;;  %3304 = vmatmul.msk.f32.gmra.mxu0 %vm999_vm3, %v868_v62 }
 0x2c0   : > { %3442 = vtanh.f32 %v1758_v2  ;;  %3260 = vmatmul.msk.f32.gmra.mxu1 %vm999_vm3, %v968_v0 }
 0x2c1   : > { %3333 = vmatmul.msk.f32.gmra.mxu2 %vm999_vm3, %v897_v4  ;;  %v902_v4 = vld [vmem:[%s5188_s2 + $0x178] sm:$0xff] }
 0x2c4   : > { %v4552_v7 = vpop.f32.mrf.mxu0  ;;  %v1760_v8 = vpop.f32.mrf.mxu2 }
 0x2c5   : > { %v1311_v10 = vpop.f32.mrf.mxu1 }
 0x2c6   : > { %v3443_v15 = vpop.eup %3442  ;;  %v1761_v16 = vadd.f32 %v1760_v8, %v1311_v10 }
 0x2c7   : > { %2077 = vmatmul.f32.gmra.mxu3 %v3443_v15  ;;  %3305 = vmatmul.msk.f32.gmra.mxu0 %vm999_vm3, %v869_v9  ;;  %v974_v15 = vld [vmem:[%s5189_s3 + $0x178] sm:$0xff] }
 0x2c8   : > { %3444 = vtanh.f32 %v1761_v16  ;;  %3261 = vmatmul.msk.f32.gmra.mxu1 %vm999_vm3, %v969_v11 }
 0x2c9   : > { %3334 = vmatmul.msk.f32.gmra.mxu2 %vm999_vm3, %v898_v17 }
 0x2cc   : > { %v4566_v18 = vpop.f32.mrf.mxu0  ;;  %v1763_v19 = vpop.f32.mrf.mxu2 }
 0x2cd   : > { %v1314_v22 = vpop.f32.mrf.mxu1 }
 0x2ce   : > { %v3445_v25 = vpop.eup %3444  ;;  %v1764_v27 = vadd.f32 %v1763_v19, %v1314_v22  ;;  %v903_v19 = vld [vmem:[%s5188_s2 + $0x180] sm:$0xff] }
 0x2cf   : > { %2080 = vmatmul.f32.gmra.mxu3 %v3445_v25  ;;  %v4630_v25 = vpop.permute.xlu0 %2323 }
 0x2d0   : > { %3446 = vtanh.f32 %v1764_v27  ;;  %3262 = vmatmul.msk.f32.gmra.mxu1 %vm999_vm3, %v970_v24  ;;  %v2251_v24 = vld [vmem:[%s4254_s12 + $0x100] sm:$0xff] }
 0x2d1   : > { %3335 = vmatmul.msk.f32.gmra.mxu2 %vm999_vm3, %v899_v28  ;;  %2453 = vperm.xlu1 %3400, %v2251_v24  }
 0x2d4   : > { %v1682_v33 = vpop.f32.mrf.mxu0  ;;  %v1766_v34 = vpop.f32.mrf.mxu2 }
 0x2d5   : > { %v1317_v35 = vpop.f32.mrf.mxu1  ;;  %v1683_v36 = vadd.f32 %v1682_v33, %v4349_v12  ;;  %v4587_v12 = vpop.permute.xlu1 %2303 }
 0x2d6   : > { %v3447_v40 = vpop.eup %3446  ;;  %v1767_v41 = vadd.f32 %v1766_v34, %v1317_v35  ;;  %v975_v35 = vld [vmem:[%s5189_s3 + $0x180] sm:$0xff] }
 0x2d7   : > { %3448 = vtanh.f32 %v1683_v36  ;;  %2083 = vmatmul.f32.gmra.mxu3 %v3447_v40  ;;  %v904_v40 = vld [vmem:[%s5188_s2 + $0x188] sm:$0xff] }
 0x2d8   : > { %3450 = vtanh.f32 %v1767_v41  ;;  %3263 = vmatmul.msk.f32.gmra.mxu1 %vm999_vm3, %v971_v39 }
 0x2d9   : > { %3336 = vmatmul.msk.f32.gmra.mxu2 %vm999_vm3, %v900_v42  ;;  %v4645_v42 = vpop.permute.xlu0 %2338 }
 0x2dc   : > { %v1685_v44 = vpop.f32.mrf.mxu0  ;;  %v1769_v45 = vpop.f32.mrf.mxu2 }
 0x2dd   : > { %v3449_v46 = vpop.eup %3448  ;;  %v1320_v48 = vpop.f32.mrf.mxu1  ;;  %v1686_v50 = vadd.f32 %v1685_v44, %v4370_v20  ;;  %v2246_v20 = vld [vmem:[%s4254_s12 + $0xd8] sm:$0xff] }
 0x2de   : > { %v3451_v53 = vpop.eup %3450  ;;  %v1770_v54 = vadd.f32 %v1769_v45, %v1320_v48  ;;  %2002 = vmatmul.f32.vlgmr.msrb.gmra.mxu0 %v3449_v46  ;;  %2428 = vperm.xlu2 %3401, %v2246_v20   ;;  %v4605_v0 = vpop.permute.xlu1 %2308 }
 0x2df   : > { %3452 = vtanh.f32 %v1686_v50  ;;  %2086 = vmatmul.f32.gmra.mxu3 %v3451_v53  ;;  %v976_v50 = vld [vmem:[%s5189_s3 + $0x188] sm:$0xff] }
 0x2e0   : > { %3454 = vtanh.f32 %v1770_v54  ;;  %3264 = vmatmul.msk.f32.gmra.mxu1 %vm999_vm3, %v972_v51  ;;  %v905_v54 = vld [vmem:[%s5188_s2 + $0x190] sm:$0xff] }
 0x2e1   : > { %3337 = vmatmul.msk.f32.gmra.mxu2 %vm999_vm3, %v901_v55  ;;  %v2250_v55 = vld [vmem:[%s4254_s12 + $0xf8] sm:$0xff] }
 0x2e4   : > { %v1688_v56 = vpop.f32.mrf.mxu0  ;;  %v1772_v58 = vpop.f32.mrf.mxu2 }
 0x2e5   : > { %v3453_v59 = vpop.eup %3452  ;;  %v1323_v61 = vpop.f32.mrf.mxu1  ;;  %v1689_v62 = vadd.f32 %v1688_v56, %v4391_v29 }
 0x2e6   : > { %v3455_v1 = vpop.eup %3454  ;;  %v1773_v2 = vadd.f32 %v1772_v58, %v1323_v61  ;;  %2005 = vmatmul.f32.gmra.mxu0 %v3453_v59  ;;  %v4623_v22 = vpop.permute.xlu1 %2328  ;;  %2448 = vperm.xlu2 %3401, %v2250_v55  }
 0x2e7   : > { %3456 = vtanh.f32 %v1689_v62  ;;  %2089 = vmatmul.f32.gmra.mxu3 %v3455_v1 }
 0x2e8   : > { %3458 = vtanh.f32 %v1773_v2  ;;  %3265 = vmatmul.msk.f32.gmra.mxu1 %vm999_vm3, %v973_v63  ;;  %v977_v63 = vld [vmem:[%s5189_s3 + $0x190] sm:$0xff] }
 0x2e9   : > { %3338 = vmatmul.msk.f32.gmra.mxu2 %vm999_vm3, %v902_v4 }
 0x2ec   : > { %v1691_v29 = vpop.f32.mrf.mxu0  ;;  %v1775_v8 = vpop.f32.mrf.mxu2 }
 0x2ed   : > { %v3457_v9 = vpop.eup %3456  ;;  %v1326_v10 = vpop.f32.mrf.mxu1  ;;  %v1692_v11 = vadd.f32 %v1691_v29, %v4412_v38  ;;  %v906_v29 = vld [vmem:[%s5188_s2 + $0x198] sm:$0xff] }
 0x2ee   : > { %v3459_v16 = vpop.eup %3458  ;;  %v1776_v17 = vadd.f32 %v1775_v8, %v1326_v10  ;;  %2008 = vmatmul.f32.gmra.mxu0 %v3457_v9  ;;  %v4628_v38 = vpop.permute.xlu2 %2318 }
 0x2ef   : > { %3460 = vtanh.f32 %v1692_v11  ;;  %2092 = vmatmul.f32.gmra.mxu3 %v3459_v16  ;;  %v4641_v41 = vpop.permute.xlu1 %2343  ;;  %v4669_v8 = vpop.permute.xlu0 %2353 }
 0x2f0   : > { %3462 = vtanh.f32 %v1776_v17  ;;  %3266 = vmatmul.msk.f32.gmra.mxu1 %vm999_vm3, %v974_v15 }
 0x2f1   : > { %3339 = vmatmul.msk.f32.gmra.mxu2 %vm999_vm3, %v903_v19  ;;  %v978_v19 = vld [vmem:[%s5189_s3 + $0x198] sm:$0xff] }
 0x2f4   : > { %v1694_v27 = vpop.f32.mrf.mxu0  ;;  %v1778_v28 = vpop.f32.mrf.mxu2 }
 0x2f5   : > { %v3461_v31 = vpop.eup %3460  ;;  %v1329_v33 = vpop.f32.mrf.mxu1  ;;  %v1695_v34 = vadd.f32 %v1694_v27, %v4428_v47 }
 0x2f6   : > { %v3463_v36 = vpop.eup %3462  ;;  %v1779_v39 = vadd.f32 %v1778_v28, %v1329_v33  ;;  %2011 = vmatmul.f32.gmra.mxu0 %v3461_v31  ;;  %v4643_v47 = vpop.permute.xlu2 %2333  ;;  %v907_v28 = vld [vmem:[%s5188_s2 + $0x1a0] sm:$0xff] }
 0x2f7   : > { %3464 = vtanh.f32 %v1695_v34  ;;  %2095 = vmatmul.f32.gmra.mxu3 %v3463_v36  ;;  %v4658_v20 = vpop.permute.xlu1 %2358  ;;  %v2252_v34 = vld [vmem:[%s4254_s12 + $0x108] sm:$0xff] }
 0x2f8   : > { %3466 = vtanh.f32 %v1779_v39  ;;  %3267 = vmatmul.msk.f32.gmra.mxu1 %vm999_vm3, %v975_v35  ;;  %2458 = vperm.xlu2 %3401, %v2252_v34  }
 0x2f9   : > { %3340 = vmatmul.msk.f32.gmra.mxu2 %vm999_vm3, %v904_v40 }
 0x2fc   : > { %v1697_v43 = vpop.f32.mrf.mxu0  ;;  %v1781_v44 = vpop.f32.mrf.mxu2 }
 0x2fd   : > { %v3465_v45 = vpop.eup %3464  ;;  %v1332_v46 = vpop.f32.mrf.mxu1  ;;  %v1698_v48 = vadd.f32 %v1697_v43, %v4444_v57  ;;  %v2253_v57 = vld [vmem:[%s4254_s12 + $0x110] sm:$0xff] }
 0x2fe   : > { %v3467_v51 = vpop.eup %3466  ;;  %v1782_v53 = vadd.f32 %v1781_v44, %v1332_v46  ;;  %2014 = vmatmul.f32.gmra.mxu0 %v3465_v45  ;;  %2463 = vperm.xlu0 %3399, %v2253_v57   ;;  %v4664_v1 = vpop.permute.xlu2 %2348  ;;  %v979_v45 = vld [vmem:[%s5189_s3 + $0x1a0] sm:$0xff] }
 0x2ff   : > { %3468 = vtanh.f32 %v1698_v48  ;;  %2098 = vmatmul.f32.gmra.mxu3 %v3467_v51  ;;  %v4683_v31 = vpop.permute.xlu1 %2363  ;;  %v2256_v51 = vld [vmem:[%s4254_s12 + $0x128] sm:$0xff] }
 0x300   : > { %3470 = vtanh.f32 %v1782_v53  ;;  %3268 = vmatmul.msk.f32.gmra.mxu1 %vm999_vm3, %v976_v50  ;;  %v908_v50 = vld [vmem:[%s5188_s2 + $0x1a8] sm:$0xff]  ;;  %v4703_v53 = vld [vmem:[%s5196_s10 + $0x3] ss:$0 sm:$0xff] }
 0x301   : > { %3341 = vmatmul.msk.f32.gmra.mxu2 %vm999_vm3, %v905_v54 }
 0x304   : > { %v1700_v56 = vpop.f32.mrf.mxu0  ;;  %v1784_v58 = vpop.f32.mrf.mxu2 }
 0x305   : > { %v3469_v59 = vpop.eup %3468  ;;  %v1335_v61 = vpop.f32.mrf.mxu1  ;;  %v1701_v62 = vadd.f32 %v1700_v56, %v4460_v3  ;;  %v2254_v3 = vld [vmem:[%s4254_s12 + $0x118] sm:$0xff] }
 0x306   : > { %v3471_v2 = vpop.eup %3470  ;;  %v1785_v4 = vadd.f32 %v1784_v58, %v1335_v61  ;;  %2017 = vmatmul.f32.gmra.mxu0 %v3469_v59  ;;  %2468 = vperm.xlu1 %3400, %v2254_v3   ;;  %v4685_v33 = vpop.permute.xlu2 %2368 }
 0x307   : > { %3472 = vtanh.f32 %v1701_v62  ;;  %2101 = vmatmul.f32.gmra.mxu3 %v3471_v2  ;;  %2478 = vperm.xlu0 %3399, %v2256_v51   ;;  %v4708_v54 = vpop.permute.xlu1 %2378  ;;  %v2255_v51 = vld [vmem:[%s4254_s12 + $0x120] sm:$0xff] }
 0x308   : > { %3474 = vtanh.f32 %v1785_v4  ;;  %3269 = vmatmul.msk.f32.gmra.mxu1 %vm999_vm3, %v977_v63  ;;  %v980_v4 = vld [vmem:[%s5189_s3 + $0x1a8] sm:$0xff]  ;;  %2473 = vperm.xlu2 %3401, %v2255_v51  }
 0x309   : > { %3342 = vmatmul.msk.f32.gmra.mxu2 %vm999_vm3, %v906_v29 }
 0x30a   : > { %v4674_v9 = vpop.f32.mrf.mxu3 }
 0x30c   : > { %v1703_v10 = vpop.f32.mrf.mxu0  ;;  %v1787_v11 = vpop.f32.mrf.mxu2 }
 0x30d   : > { %v3473_v15 = vpop.eup %3472  ;;  %v1338_v16 = vpop.f32.mrf.mxu1  ;;  %v1704_v17 = vadd.f32 %v1703_v10, %v4475_v13 }
 0x30e   : > { %v3475_v24 = vpop.eup %3474  ;;  %v1788_v27 = vadd.f32 %v1787_v11, %v1338_v16  ;;  %2020 = vmatmul.f32.gmra.mxu0 %v3473_v15  ;;  %v4688_v13 = vpop.permute.xlu0 %2373  ;;  %v909_v15 = vld [vmem:[%s5188_s2 + $0x1b0] sm:$0xff] }
 0x30f   : > { %3476 = vtanh.f32 %v1704_v17  ;;  %2104 = vmatmul.f32.gmra.mxu3 %v3475_v24  ;;  %v2384_v55 = vpop.permute.xlu2 %2383  ;;  %v2259_v17 = vld [vmem:[%s4254_s12 + $0x140] sm:$0xff]  ;;  %v2394_v24 = vpop.permute.xlu1 %2393 }
 0x310   : > { %3478 = vtanh.f32 %v1788_v27  ;;  %3270 = vmatmul.msk.f32.gmra.mxu1 %vm999_vm3, %v978_v19  ;;  %2493 = vperm.xlu0 %3399, %v2259_v17  }
 0x311   : > { %3343 = vmatmul.msk.f32.gmra.mxu2 %vm999_vm3, %v907_v28 }
 0x312   : > { %v2057_v35 = vpop.f32.mrf.mxu3 }
 0x314   : > { %v1706_v36 = vpop.f32.mrf.mxu0  ;;  %v1790_v39 = vpop.f32.mrf.mxu2 }
 0x315   : > { %v3477_v40 = vpop.eup %3476  ;;  %v1341_v43 = vpop.f32.mrf.mxu1  ;;  %v1707_v44 = vadd.f32 %v1706_v36, %v4490_v26  ;;  %v2058_v26 = vadd.f32 %v2057_v35, %v4703_v53 }
 0x316   : > { %v3479_v46 = vpop.eup %3478  ;;  %v1791_v48 = vadd.f32 %v1790_v39, %v1341_v43  ;;  %2023 = vmatmul.f32.gmra.mxu0 %v3477_v40  ;;  %v2389_v56 = vpop.permute.xlu0 %2388  ;;  %v981_v43 = vld [vmem:[%s5189_s3 + $0x1b0] sm:$0xff] }
 0x317   : > { %3480 = vtanh.f32 %v1707_v44  ;;  %2107 = vmatmul.f32.gmra.mxu3 %v3479_v46  ;;  %v2669_v29 = vadd.f32 %v2384_v55, %v2058_v26  ;;  %v910_v46 = vld [vmem:[%s5188_s2 + $0x1b8] sm:$0xff] }
 0x318   : > { %3482 = vtanh.f32 %v1791_v48  ;;  %3271 = vmatmul.msk.f32.gmra.mxu1 %vm999_vm3, %v979_v45 }
 0x319   : > { %3344 = vmatmul.msk.f32.gmra.mxu2 %vm999_vm3, %v908_v50  ;;  %v2262_v50 = vld [vmem:[%s4254_s12 + $0x158] sm:$0xff] }
 0x31a   : > { %v2060_v57 = vpop.f32.mrf.mxu3  ;;  %2508 = vperm.xlu0 %3399, %v2262_v50  }
 0x31b   : > { %v2061_v58 = vadd.f32 %v2060_v57, %v4703_v53 }
 0x31c   : > { %v1709_v59 = vpop.f32.mrf.mxu0  ;;  %v1793_v61 = vpop.f32.mrf.mxu2 }
 0x31d   : > { %v3481_v62 = vpop.eup %3480  ;;  %v1344_v63 = vpop.f32.mrf.mxu1  ;;  %v1710_v2 = vadd.f32 %v1709_v59, %v4504_v37  ;;  %v2670_v3 = vadd.f32 %v2389_v56, %v2061_v58  ;;  %v2257_v37 = vld [vmem:[%s4254_s12 + $0x130] sm:$0xff] }
 0x31e   : > { %v3483_v10 = vpop.eup %3482  ;;  %v1794_v11 = vadd.f32 %v1793_v61, %v1344_v63  ;;  %2026 = vmatmul.f32.gmra.mxu0 %v3481_v62  ;;  %2483 = vperm.xlu1 %3400, %v2257_v37   ;;  %v982_v61 = vld [vmem:[%s5189_s3 + $0x1b8] sm:$0xff] }
 0x31f   : > { %3484 = vtanh.f32 %v1710_v2  ;;  %2110 = vmatmul.f32.gmra.mxu3 %v3483_v10  ;;  %v2771_v16 = vmax.f32 %v2669_v29, %v2670_v3  ;;  %v911_v2 = vld [vmem:[%s5188_s2 + $0x1c0] sm:$0xff]  ;;  %v2399_v3 = vpop.permute.xlu2 %2398  ;;  %v2258_v10 = vld [vmem:[%s4254_s12 + $0x138] sm:$0xff] }
 0x320   : > { %3486 = vtanh.f32 %v1794_v11  ;;  %3272 = vmatmul.msk.f32.gmra.mxu1 %vm999_vm3, %v980_v4  ;;  %v2265_v4 = vld [vmem:[%s4254_s12 + $0x170] sm:$0xff]  ;;  %2488 = vperm.xlu2 %3401, %v2258_v10  }
 0x321   : > { %3345 = vmatmul.msk.f32.gmra.mxu2 %vm999_vm3, %v909_v15  ;;  %v2404_v15 = vpop.permute.xlu0 %2403 }
 0x322   : > { %v2063_v19 = vpop.f32.mrf.mxu3  ;;  %2523 = vperm.xlu0 %3399, %v2265_v4  }
 0x323   : > { %v2064_v27 = vadd.f32 %v2063_v19, %v4703_v53 }
 0x324   : > { %v1712_v28 = vpop.f32.mrf.mxu0  ;;  %v1796_v34 = vpop.f32.mrf.mxu2 }
 0x325   : > { %v3485_v35 = vpop.eup %3484  ;;  %v2671_v36 = vadd.f32 %v2394_v24, %v2064_v27  ;;  %v1347_v39 = vpop.f32.mrf.mxu1  ;;  %v1713_v40 = vadd.f32 %v1712_v28, %v4520_v49  ;;  %v2260_v49 = vld [vmem:[%s4254_s12 + $0x148] sm:$0xff] }
 0x326   : > { %v3487_v44 = vpop.eup %3486  ;;  %v1797_v45 = vadd.f32 %v1796_v34, %v1347_v39  ;;  %2029 = vmatmul.f32.gmra.mxu0 %v3485_v35  ;;  %2498 = vperm.xlu1 %3400, %v2260_v49   ;;  %v983_v34 = vld [vmem:[%s5189_s3 + $0x1c0] sm:$0xff] }
 0x327   : > { %v4730_v48 = vmax.f32 %v2771_v16, %v2671_v36  ;;  %3488 = vtanh.f32 %v1713_v40  ;;  %2113 = vmatmul.f32.gmra.mxu3 %v3487_v44  ;;  %v912_v40 = vld [vmem:[%s5188_s2 + $0x1c8] sm:$0xff]  ;;  %v2267_v44 = vld [vmem:[%s4254_s12 + $0x180] sm:$0xff]  ;;  %v2409_v50 = vpop.permute.xlu2 %2408 }
 0x328   : > { %3490 = vtanh.f32 %v1797_v45  ;;  %3273 = vmatmul.msk.f32.gmra.mxu1 %vm999_vm3, %v981_v43  ;;  %v2261_v45 = vld [vmem:[%s4254_s12 + $0x150] sm:$0xff] }
 0x329   : > { %3346 = vmatmul.msk.f32.gmra.mxu2 %vm999_vm3, %v910_v46  ;;  %2503 = vperm.xlu2 %3401, %v2261_v45  }
 0x32a   : > { %v2066_v26 = vpop.f32.mrf.mxu3  ;;  %2533 = vperm.xlu0 %3399, %v2267_v44  }
 0x32b   : > { %v2067_v29 = vadd.f32 %v2066_v26, %v4703_v53 }
 0x32c   : > { %v1715_v55 = vpop.f32.mrf.mxu0  ;;  %v1799_v57 = vpop.f32.mrf.mxu2 }
 0x32d   : > { %v3489_v56 = vpop.eup %3488  ;;  %v1350_v58 = vpop.f32.mrf.mxu1  ;;  %v1716_v59 = vadd.f32 %v1715_v55, %v4536_v60  ;;  %v2263_v60 = vld [vmem:[%s4254_s12 + $0x160] sm:$0xff]  ;;  %v2672_v24 = vadd.f32 %v2399_v3, %v2067_v29  ;;  %v2264_v29 = vld [vmem:[%s4254_s12 + $0x168] sm:$0xff] }
 0x32e   : > { %v3491_v62 = vpop.eup %3490  ;;  %v1800_v63 = vadd.f32 %v1799_v57, %v1350_v58  ;;  %2032 = vmatmul.f32.gmra.mxu0 %v3489_v56  ;;  %2513 = vperm.xlu1 %3400, %v2263_v60   ;;  %v2271_v60 = vld [vmem:[%s4254_s12 + $0x1a0] sm:$0xff] }
 0x32f   : > { %3492 = vtanh.f32 %v1716_v59  ;;  %2116 = vmatmul.f32.gmra.mxu3 %v3491_v62  ;;  %v984_v59 = vld [vmem:[%s5189_s3 + $0x1c8] sm:$0xff] }
 0x330   : > { %3494 = vtanh.f32 %v1800_v63  ;;  %3274 = vmatmul.msk.f32.gmra.mxu1 %vm999_vm3, %v982_v61  ;;  %v913_v63 = vld [vmem:[%s5188_s2 + $0x1d0] sm:$0xff] }
 0x331   : > { %3347 = vmatmul.msk.f32.gmra.mxu2 %vm999_vm3, %v911_v2  ;;  %v2414_v2 = vpop.permute.xlu0 %2413  ;;  %2518 = vperm.xlu2 %3401, %v2264_v29  }
 0x332   : > { %v2069_v11 = vpop.f32.mrf.mxu3  ;;  %2553 = vperm.xlu0 %3399, %v2271_v60  }
 0x333   : > { %v2070_v16 = vadd.f32 %v2069_v11, %v4703_v53 }
 0x334   : > { %v1718_v17 = vpop.f32.mrf.mxu0  ;;  %v1802_v37 = vpop.f32.mrf.mxu2 }
 0x335   : > { %v3493_v19 = vpop.eup %3492  ;;  %v1353_v27 = vpop.f32.mrf.mxu1  ;;  %v1719_v28 = vadd.f32 %v1718_v17, %v4552_v7  ;;  %v2673_v35 = vadd.f32 %v2404_v15, %v2070_v16  ;;  %v2268_v7 = vld [vmem:[%s4254_s12 + $0x188] sm:$0xff] }
 0x336   : > { %v3495_v36 = vpop.eup %3494  ;;  %v1803_v39 = vadd.f32 %v1802_v37, %v1353_v27  ;;  %2035 = vmatmul.f32.gmra.mxu0 %v3493_v19  ;;  %2538 = vperm.xlu1 %3400, %v2268_v7   ;;  %v985_v37 = vld [vmem:[%s5189_s3 + $0x1d0] sm:$0xff]  ;;  %v914_v27 = vld [vmem:[%s5188_s2 + $0x1d8] sm:$0xff] }
 0x337   : > { %3496 = vtanh.f32 %v1719_v28  ;;  %2119 = vmatmul.f32.gmra.mxu3 %v3495_v36  ;;  %v2779_v43 = vmax.f32 %v2672_v24, %v2673_v35  ;;  %v2269_v28 = vld [vmem:[%s4254_s12 + $0x190] sm:$0xff]  ;;  %v2266_v36 = vld [vmem:[%s4254_s12 + $0x178] sm:$0xff] }
 0x338   : > { %3498 = vtanh.f32 %v1803_v39  ;;  %3275 = vmatmul.msk.f32.gmra.mxu1 %vm999_vm3, %v983_v34 }
 0x339   : > { %3348 = vmatmul.msk.f32.gmra.mxu2 %vm999_vm3, %v912_v40  ;;  %v4787_v34 = vpop.permute.xlu0 %2433  ;;  %v2419_v40 = vpop.permute.xlu1 %2418  ;;  %2528 = vperm.xlu2 %3401, %v2266_v36  }
 0x33a   : > { %v2072_v46 = vpop.f32.mrf.mxu3  ;;  %2543 = vperm.xlu0 %3399, %v2269_v28  }
 0x33b   : > { %v2073_v49 = vadd.f32 %v2072_v46, %v4703_v53 }
 0x33c   : > { %v1721_v51 = vpop.f32.mrf.mxu0  ;;  %v1805_v26 = vpop.f32.mrf.mxu2 }
 0x33d   : > { %v3497_v55 = vpop.eup %3496  ;;  %v2674_v57 = vadd.f32 %v2409_v50, %v2073_v49  ;;  %v1356_v56 = vpop.f32.mrf.mxu1  ;;  %v1722_v58 = vadd.f32 %v1721_v51, %v4566_v18  ;;  %v2273_v18 = vld [vmem:[%s4254_s12 + $0x1b0] sm:$0xff]  ;;  %v986_v49 = vld [vmem:[%s5189_s3 + $0x1d8] sm:$0xff] }
 0x33e   : > { %v3499_v61 = vpop.eup %3498  ;;  %v1806_v62 = vadd.f32 %v1805_v26, %v1356_v56  ;;  %2038 = vmatmul.f32.gmra.mxu0 %v3497_v55  ;;  %2563 = vperm.xlu1 %3400, %v2273_v18   ;;  %v2275_v56 = vld [vmem:[%s4254_s12 + $0x1c0] sm:$0xff] }
 0x33f   : > { %v4771_v4 = vmax.f32 %v2779_v43, %v2674_v57  ;;  %3500 = vtanh.f32 %v1722_v58  ;;  %2122 = vmatmul.f32.gmra.mxu3 %v3499_v61  ;;  %v1728_v43 = vadd.f32 %v4372_v21, %v4377_v23  ;;  %v915_v21 = vld [vmem:[%s5188_s2 + $0x1e0] sm:$0xff]  ;;  %v2277_v57 = vld [vmem:[%s4254_s12 + $0x1d0] sm:$0xff]  ;;  %v2270_v58 = vld [vmem:[%s4254_s12 + $0x198] sm:$0xff] }
 0x340   : > { %3502 = vtanh.f32 %v1806_v62  ;;  %3276 = vmatmul.msk.f32.gmra.mxu1 %vm999_vm3, %v984_v59  ;;  %v1731_v62 = vadd.f32 %v4393_v30, %v4398_v32  ;;  %v2280_v32 = vld [vmem:[%s4254_s12 + $0x1e8] sm:$0xff] }
 0x341   : > { %3349 = vmatmul.msk.f32.gmra.mxu2 %vm999_vm3, %v913_v63  ;;  %v2424_v61 = vpop.permute.xlu0 %2423  ;;  %2548 = vperm.xlu2 %3401, %v2270_v58  }
 0x342   : > { %v2075_v3 = vpop.f32.mrf.mxu3  ;;  %2583 = vperm.xlu0 %3399, %v2277_v57  }
 0x343   : > { %v2076_v35 = vadd.f32 %v2075_v3, %v4703_v53  ;;  %v987_v3 = vld [vmem:[%s5189_s3 + $0x1e0] sm:$0xff] }
 0x344   : > { %v1724_v10 = vpop.f32.mrf.mxu0  ;;  %v1808_v11 = vpop.f32.mrf.mxu2 }
 0x345   : > { %v3501_v15 = vpop.eup %3500  ;;  %v1359_v16 = vpop.f32.mrf.mxu1  ;;  %v1725_v17 = vadd.f32 %v1724_v10, %v4354_v14  ;;  %v2272_v14 = vld [vmem:[%s4254_s12 + $0x1a8] sm:$0xff]  ;;  %v2675_v46 = vadd.f32 %v2414_v2, %v2076_v35 }
 0x346   : > { %v3503_v19 = vpop.eup %3502  ;;  %v1809_v24 = vadd.f32 %v1808_v11, %v1359_v16  ;;  %2041 = vmatmul.f32.gmra.mxu0 %v3501_v15  ;;  %2558 = vperm.xlu1 %3400, %v2272_v14   ;;  %v916_v15 = vld [vmem:[%s5188_s2 + $0x1e8] sm:$0xff]  ;;  %v2278_v16 = vld [vmem:[%s4254_s12 + $0x1d8] sm:$0xff] }
 0x347   : > { %3504 = vtanh.f32 %v1725_v17  ;;  %2125 = vmatmul.f32.gmra.mxu3 %v3503_v19  ;;  %v2274_v17 = vld [vmem:[%s4254_s12 + $0x1b8] sm:$0xff]  ;;  %v988_v14 = vld [vmem:[%s5189_s3 + $0x1e8] sm:$0xff] }
 0x348   : > { %3506 = vtanh.f32 %v1809_v24  ;;  %3277 = vmatmul.msk.f32.gmra.mxu1 %vm999_vm3, %v985_v37 }
 0x349   : > { %3350 = vmatmul.msk.f32.gmra.mxu2 %vm999_vm3, %v914_v27  ;;  %3508 = vtanh.f32 %v1728_v43  ;;  %2568 = vperm.xlu2 %3401, %v2274_v17  }
 0x34a   : > { %v2078_v39 = vpop.f32.mrf.mxu3  ;;  %2598 = vperm.xlu0 %3399, %v2280_v32  }
 0x34b   : > { %v2079_v44 = vadd.f32 %v2078_v39, %v4703_v53  ;;  %v917_v39 = vld [vmem:[%s5188_s2 + $0x1f0] sm:$0xff] }
 0x34c   : > { %v1811_v7 = vpop.f32.mrf.mxu2 }
 0x34d   : > { %v3505_v45 = vpop.eup %3504  ;;  %v1362_v50 = vpop.f32.mrf.mxu1  ;;  %v2676_v51 = vadd.f32 %v2419_v40, %v2079_v44  ;;  %v2283_v40 = vld [vmem:[%s4254_s12 + $0x200] sm:$0xff] }
 0x34e   : > { %v3507_v26 = vpop.eup %3506  ;;  %v1812_v55 = vadd.f32 %v1811_v7, %v1362_v50  ;;  %2044 = vmatmul.f32.gmra.mxu0 %v3505_v45  ;;  %2573 = vperm.xlu1 %3400, %v2275_v56   ;;  %v4830_v44 = vpop.permute.xlu1 %2443  ;;  %v2281_v7 = vld [vmem:[%s4254_s12 + $0x1f0] sm:$0xff] }
 0x34f   : > { %2128 = vmatmul.f32.gmra.mxu3 %v3507_v26  ;;  %v2787_v23 = vmax.f32 %v2675_v46, %v2676_v51  ;;  %v3509_v60 = vpop.eup %3508  ;;  %v2276_v46 = vld [vmem:[%s4254_s12 + $0x1c8] sm:$0xff] }
 0x350   : > { %3510 = vtanh.f32 %v1812_v55  ;;  %3278 = vmatmul.msk.f32.gmra.mxu1 %vm999_vm3, %v986_v49  ;;  %v2429_v49 = vpop.permute.xlu2 %2428 }
 0x351   : > { %3351 = vmatmul.msk.f32.gmra.mxu2 %vm999_vm3, %v915_v21  ;;  %3512 = vtanh.f32 %v1731_v62  ;;  %2578 = vperm.xlu2 %3401, %v2276_v46  }
 0x352   : > { %v2081_v59 = vpop.f32.mrf.mxu3  ;;  %2613 = vperm.xlu0 %3399, %v2283_v40  }
 0x353   : > { %v2082_v63 = vadd.f32 %v2081_v59, %v4703_v53  ;;  %v989_v59 = vld [vmem:[%s5189_s3 + $0x1f0] sm:$0xff] }
 0x354   : > { %v1814_v2 = vpop.f32.mrf.mxu2 }
 0x355   : > { %v2677_v18 = vadd.f32 %v2424_v61, %v2082_v63  ;;  %v1365_v29 = vpop.f32.mrf.mxu1 }
 0x356   : > { %v3511_v10 = vpop.eup %3510  ;;  %v1815_v11 = vadd.f32 %v1814_v2, %v1365_v29  ;;  %2047 = vmatmul.f32.gmra.mxu0 %v3509_v60  ;;  %2588 = vperm.xlu1 %3400, %v2278_v16  }
 0x357   : > { %v2788_v30 = vmax.f32 %v2787_v23, %v2677_v18  ;;  %2131 = vmatmul.f32.gmra.mxu3 %v3511_v10  ;;  %v3513_v27 = vpop.eup %3512  ;;  %v2286_v18 = vld [vmem:[%s4254_s12 + $0x218] sm:$0xff]  ;;  %v2279_v10 = vld [vmem:[%s4254_s12 + $0x1e0] sm:$0xff] }
 0x358   : > { %3514 = vtanh.f32 %v1815_v11  ;;  %3279 = vmatmul.msk.f32.gmra.mxu1 %vm999_vm3, %v987_v3  ;;  %v2284_v3 = vld [vmem:[%s4254_s12 + $0x208] sm:$0xff]  ;;  %v2439_v11 = vpop.permute.xlu1 %2438 }
 0x359   : > { %3352 = vmatmul.msk.f32.gmra.mxu2 %vm999_vm3, %v916_v15  ;;  %v2789_v55 = vrot.slane %v2788_v30, 4  ;;  %2593 = vperm.xlu2 %3401, %v2279_v10  }
 0x35a   : > { %v2084_v37 = vpop.f32.mrf.mxu3  ;;  %2628 = vperm.xlu0 %3399, %v2286_v18   ;;  %v2449_v18 = vpop.permute.xlu2 %2448 }
 0x35b   : > { %v2003_v19 = vpop.f32.mrf.mxu0  ;;  %v2085_v45 = vadd.f32 %v2084_v37, %v4703_v53 }
 0x35c   : > { %v1817_v24 = vpop.f32.mrf.mxu2  ;;  %v2004_v43 = vadd.f32 %v2003_v19, %v4703_v53 }
 0x35d   : > { %v1368_v28 = vpop.f32.mrf.mxu1  ;;  %v2678_v61 = vadd.f32 %v2429_v49, %v2085_v45 }
 0x35e   : > { %v3515_v35 = vpop.eup %3514  ;;  %v1818_v36 = vadd.f32 %v1817_v24, %v1368_v28  ;;  %2050 = vmatmul.f32.gmra.mxu0 %v3513_v27  ;;  %2603 = vperm.xlu1 %3400, %v2281_v7   ;;  %v2651_v21 = vadd.f32 %v4593_v52, %v2004_v43  ;;  %v918_v52 = vld [vmem:[%s5188_s2 + $0x1f8] sm:$0xff]  ;;  %v2287_v7 = vld [vmem:[%s4254_s12 + $0x220] sm:$0xff] }
 0x35f   : > { %2134 = vmatmul.f32.gmra.mxu3 %v3515_v35  ;;  %v990_v24 = vld [vmem:[%s5189_s3 + $0x1f8] sm:$0xff]  ;;  %v919_v35 = vld [vmem:[%s5188_s2 + $0x200] sm:$0xff] }
 0x360   : > { %3516 = vtanh.f32 %v1818_v36  ;;  %3280 = vmatmul.msk.f32.gmra.mxu1 %vm999_vm3, %v988_v14 }
 0x361   : > { %3353 = vmatmul.msk.f32.gmra.mxu2 %vm999_vm3, %v917_v39  ;;  %v2289_v39 = vld [vmem:[%s4254_s12 + $0x230] sm:$0xff] }
 0x362   : > { %v2087_v50 = vpop.f32.mrf.mxu3  ;;  %2643 = vperm.xlu0 %3399, %v2289_v39  }
 0x363   : > { %v2088_v51 = vadd.f32 %v2087_v50, %v4703_v53  ;;  %v2006_v26 = vpop.f32.mrf.mxu0 }
 0x364   : > { %v2007_v23 = vadd.f32 %v2006_v26, %v4703_v53  ;;  %v1820_v57 = vpop.f32.mrf.mxu2 }
 0x365   : > { %v2679_v56 = vadd.f32 %v4787_v34, %v2088_v51  ;;  %v1371_v58 = vpop.f32.mrf.mxu1  ;;  %v2790_v34 = vmax.f32 %v2788_v30, %v2789_v55 }
 0x366   : > { %v3517_v62 = vpop.eup %3516  ;;  %v2652_v63 = vadd.f32 %v4612_v6, %v2007_v23  ;;  %v1821_v2 = vadd.f32 %v1820_v57, %v1371_v58  ;;  %2618 = vperm.xlu1 %3400, %v2284_v3   ;;  %v991_v23 = vld [vmem:[%s5189_s3 + $0x200] sm:$0xff]  ;;  %v920_v58 = vld [vmem:[%s5188_s2 + $0x208] sm:$0xff] }
 0x367   : > { %2137 = vmatmul.f32.gmra.mxu3 %v3517_v62  ;;  %v2795_v60 = vmax.f32 %v2678_v61, %v2679_v56  ;;  %v2791_v16 = vrot.slane %v2790_v34, 2 }
 0x368   : > { %v2723_v29 = vmax.f32 %v2651_v21, %v2652_v63  ;;  %3518 = vtanh.f32 %v1821_v2  ;;  %3281 = vmatmul.msk.f32.gmra.mxu1 %vm999_vm3, %v989_v59 }
 0x369   : > { %3354 = vmatmul.msk.f32.gmra.mxu2 %vm999_vm3, %v918_v52  ;;  %v2792_v40 = vmax.f32 %v2790_v34, %v2791_v16  ;;  %v2285_v52 = vld [vmem:[%s4254_s12 + $0x210] sm:$0xff]  ;;  %v992_v16 = vld [vmem:[%s5189_s3 + $0x208] sm:$0xff] }
 0x36a   : > { %v2090_v6 = vpop.f32.mrf.mxu3 }
 0x36b   : > { %v2091_v15 = vadd.f32 %v2090_v6, %v4703_v53  ;;  %v2009_v32 = vpop.f32.mrf.mxu0  ;;  %v2793_v51 = vrot.slane %v2792_v40, 1 }
 0x36c   : > { %v2010_v30 = vadd.f32 %v2009_v32, %v4703_v53  ;;  %v1823_v17 = vpop.f32.mrf.mxu2 }
 0x36d   : > { %v2680_v37 = vadd.f32 %v2439_v11, %v2091_v15  ;;  %v1374_v19 = vpop.f32.mrf.mxu1  ;;  %v2794_v61 = vmax.f32 %v2792_v40, %v2793_v51 }
 0x36e   : > { %v3519_v27 = vpop.eup %3518  ;;  %v2653_v28 = vadd.f32 %v4587_v12, %v2010_v30  ;;  %v1824_v14 = vadd.f32 %v1823_v17, %v1374_v19  ;;  %2633 = vperm.xlu1 %3400, %v2287_v7   ;;  %v2282_v12 = vld [vmem:[%s4254_s12 + $0x1f8] sm:$0xff] }
 0x36f   : > { %v2796_v36 = vmax.f32 %v2795_v60, %v2680_v37  ;;  %2140 = vmatmul.f32.gmra.mxu3 %v3519_v27  ;;  %2608 = vperm.xlu2 %3401, %v2282_v12  }
 0x370   : > { %v4862_v43 = vmax.f32 %v2723_v29, %v2653_v28  ;;  %3520 = vtanh.f32 %v1824_v14  ;;  %3282 = vmatmul.msk.f32.gmra.mxu1 %vm999_vm3, %v990_v24 }
 0x371   : > { %v2797_v45 = vrot.slane %v2796_v36, 4  ;;  %3355 = vmatmul.msk.f32.gmra.mxu2 %vm999_vm3, %v919_v35  ;;  %v2454_v35 = vpop.permute.xlu1 %2453 }
 0x372   : > { %v2093_v46 = vpop.f32.mrf.mxu3 }
 0x373   : > { %v2798_v50 = vmax.f32 %v2796_v36, %v2797_v45  ;;  %v2012_v49 = vpop.f32.mrf.mxu0  ;;  %v2094_v2 = vadd.f32 %v2093_v46, %v4703_v53 }
 0x374   : > { %v1826_v26 = vpop.f32.mrf.mxu2  ;;  %v2013_v62 = vadd.f32 %v2012_v49, %v4703_v53 }
 0x375   : > { %v2799_v55 = vrot.slane %v2798_v50, 2  ;;  %v1377_v21 = vpop.f32.mrf.mxu1  ;;  %v2681_v15 = vadd.f32 %v4830_v44, %v2094_v2  ;;  %v2288_v44 = vld [vmem:[%s4254_s12 + $0x228] sm:$0xff] }
 0x376   : > { %v3521_v57 = vpop.eup %3520  ;;  %v1827_v56 = vadd.f32 %v1826_v26, %v1377_v21  ;;  %v2654_v10 = vadd.f32 %v4605_v0, %v2013_v62  ;;  %v921_v0 = vld [vmem:[%s5188_s2 + $0x210] sm:$0xff] }
 0x377   : > { %v2800_v59 = vmax.f32 %v2798_v50, %v2799_v55  ;;  %2143 = vmatmul.f32.gmra.mxu3 %v3521_v57  ;;  %2623 = vperm.xlu2 %3401, %v2285_v52   ;;  %v993_v50 = vld [vmem:[%s5189_s3 + $0x210] sm:$0xff]  ;;  %v922_v55 = vld [vmem:[%s5188_s2 + $0x218] sm:$0xff] }
 0x378   : > { %3522 = vtanh.f32 %v1827_v56  ;;  %3283 = vmatmul.msk.f32.gmra.mxu1 %vm999_vm3, %v991_v23  ;;  %v2290_v56 = vld [vmem:[%s4254_s12 + $0x238] sm:$0xff] }
 0x379   : > { %v2801_v63 = vrot.slane %v2800_v59, 1  ;;  %3356 = vmatmul.msk.f32.gmra.mxu2 %vm999_vm3, %v920_v58  ;;  %3524 = vtanh.f32 %v2794_v61 }
 0x37a   : > { %v2096_v60 = vpop.f32.mrf.mxu3 }
 0x37b   : > { %v2802_v34 = vmax.f32 %v2800_v59, %v2801_v63  ;;  %v2097_v29 = vadd.f32 %v2096_v60, %v4703_v53  ;;  %v2015_v3 = vpop.f32.mrf.mxu0  ;;  %v2725_v59 = vrot.slane %v4862_v43, 4  ;;  %v994_v60 = vld [vmem:[%s5189_s3 + $0x218] sm:$0xff] }
 0x37c   : > { %v2016_v6 = vadd.f32 %v2015_v3, %v4703_v53  ;;  %v1829_v11 = vpop.f32.mrf.mxu2 }
 0x37d   : > { %3526 = vtanh.f32 %v2802_v34  ;;  %v1380_v32 = vpop.f32.mrf.mxu1  ;;  %v2682_v30 = vadd.f32 %v2449_v18, %v2097_v29  ;;  %v923_v29 = vld [vmem:[%s5188_s2 + $0x220] sm:$0xff]  ;;  %v2726_v3 = vmax.f32 %v4862_v43, %v2725_v59 }
 0x37e   : > { %v3523_v17 = vpop.eup %3522  ;;  %v2655_v37 = vadd.f32 %v4610_v5, %v2016_v6  ;;  %v1830_v19 = vadd.f32 %v1829_v11, %v1380_v32 }
 0x37f   : > { %2146 = vmatmul.f32.gmra.mxu3 %v3523_v17  ;;  %v2803_v24 = vmax.f32 %v2681_v15, %v2682_v30  ;;  %v3525_v28 = vpop.eup %3524  ;;  %2638 = vperm.xlu2 %3401, %v2288_v44   ;;  %v2464_v17 = vpop.permute.xlu0 %2463 }
 0x380   : > { %v2731_v27 = vmax.f32 %v2654_v10, %v2655_v37  ;;  %3528 = vtanh.f32 %v1830_v19  ;;  %3284 = vmatmul.msk.f32.gmra.mxu1 %vm999_vm3, %v992_v16  ;;  %v2459_v16 = vpop.permute.xlu2 %2458  ;;  %v2727_v37 = vrot.slane %v2726_v3, 2 }
 0x381   : > { %3357 = vmatmul.msk.f32.gmra.mxu2 %vm999_vm3, %v921_v0 }
 0x382   : > { %v2099_v14 = vpop.f32.mrf.mxu3 }
 0x383   : > { %v3527_v5 = vpop.eup %3526  ;;  %v2100_v36 = vadd.f32 %v2099_v14, %v4703_v53  ;;  %v2018_v39 = vpop.f32.mrf.mxu0 }
 0x384   : > { %v2019_v40 = vadd.f32 %v2018_v39, %v4703_v53  ;;  %v1832_v7 = vpop.f32.mrf.mxu2  ;;  %v4896_v45 = vsel %vm2979_vm4, %v3527_v5, %v3525_v28 }
 0x385   : > { %v2683_v12 = vadd.f32 %v2454_v35, %v2100_v36  ;;  %v1383_v46 = vpop.f32.mrf.mxu1  ;;  %v995_v35 = vld [vmem:[%s5189_s3 + $0x220] sm:$0xff] }
 0x386   : > { %v3529_v49 = vpop.eup %3528  ;;  %v2656_v51 = vadd.f32 %v4628_v38, %v2019_v40  ;;  %v1833_v26 = vadd.f32 %v1832_v7, %v1383_v46 }
 0x387   : > { %v2804_v21 = vmax.f32 %v2803_v24, %v2683_v12  ;;  %2149 = vmatmul.f32.gmra.mxu3 %v3529_v49  ;;  %2648 = vperm.xlu2 %3401, %v2290_v56   ;;  %v924_v12 = vld [vmem:[%s5188_s2 + $0x228] sm:$0xff] }
 0x388   : > { %v2732_v23 = vmax.f32 %v2731_v27, %v2656_v51  ;;  %3530 = vtanh.f32 %v1833_v26  ;;  %3285 = vmatmul.msk.f32.gmra.mxu1 %vm999_vm3, %v993_v50  ;;  %v2469_v26 = vpop.permute.xlu1 %2468 }
 0x389   : > { %v2805_v57 = vrot.slane %v2804_v21, 4  ;;  %3358 = vmatmul.msk.f32.gmra.mxu2 %vm999_vm3, %v922_v55 }
 0x38a   : > { %v2102_v58 = vpop.f32.mrf.mxu3  ;;  %v2733_v62 = vrot.slane %v2732_v23, 4 }
 0x38b   : > { %v2806_v38 = vmax.f32 %v2804_v21, %v2805_v57  ;;  %v2021_v61 = vpop.f32.mrf.mxu0  ;;  %v2103_v32 = vadd.f32 %v2102_v58, %v4703_v53 }
 0x38c   : > { %v1835_v63 = vpop.f32.mrf.mxu2  ;;  %v2734_v6 = vmax.f32 %v2732_v23, %v2733_v62  ;;  %v2022_v11 = vadd.f32 %v2021_v61, %v4703_v53  ;;  %v996_v62 = vld [vmem:[%s5189_s3 + $0x228] sm:$0xff] }
 0x38d   : > { %v2807_v2 = vrot.slane %v2806_v38, 2  ;;  %v1386_v52 = vpop.f32.mrf.mxu1  ;;  %v2684_v5 = vadd.f32 %v2459_v16, %v2103_v32 }
 0x38e   : > { %v3531_v18 = vpop.eup %3530  ;;  %v1836_v34 = vadd.f32 %v1835_v63, %v1386_v52  ;;  %v2735_v24 = vrot.slane %v2734_v6, 2  ;;  %v2657_v27 = vadd.f32 %v4630_v25, %v2022_v11  ;;  %v2728_v25 = vmax.f32 %v2726_v3, %v2727_v37 }
 0x38f   : > { %v2808_v10 = vmax.f32 %v2806_v38, %v2807_v2  ;;  %2152 = vmatmul.f32.gmra.mxu3 %v3531_v18 }
 0x390   : > { %3532 = vtanh.f32 %v1836_v34  ;;  %3286 = vmatmul.msk.f32.gmra.mxu1 %vm999_vm3, %v994_v60  ;;  %v2736_v50 = vmax.f32 %v2734_v6, %v2735_v24  ;;  %v925_v60 = vld [vmem:[%s5188_s2 + $0x230] sm:$0xff] }
 0x391   : > { %v2809_v15 = vrot.slane %v2808_v10, 1  ;;  %3359 = vmatmul.msk.f32.gmra.mxu2 %vm999_vm3, %v923_v29 }
 0x392   : > { %v2105_v30 = vpop.f32.mrf.mxu3  ;;  %v2737_v57 = vrot.slane %v2736_v50, 1 }
 0x393   : > { %v2810_v19 = vmax.f32 %v2808_v10, %v2809_v15  ;;  %v2106_v43 = vadd.f32 %v2105_v30, %v4703_v53  ;;  %v2024_v0 = vpop.f32.mrf.mxu0 }
 0x394   : > { %v2025_v44 = vadd.f32 %v2024_v0, %v4703_v53  ;;  %v1838_v28 = vpop.f32.mrf.mxu2  ;;  %v2738_v29 = vmax.f32 %v2736_v50, %v2737_v57  ;;  %v926_v0 = vld [vmem:[%s5188_s2 + $0x238] sm:$0xff] }
 0x395   : > { %3534 = vtanh.f32 %v2810_v19  ;;  %v1389_v14 = vpop.f32.mrf.mxu1  ;;  %v2685_v36 = vadd.f32 %v2464_v17, %v2106_v43  ;;  %v997_v17 = vld [vmem:[%s5189_s3 + $0x230] sm:$0xff] }
 0x396   : > { %v3533_v39 = vpop.eup %3532  ;;  %v2658_v40 = vadd.f32 %v4623_v22, %v2025_v44  ;;  %v1839_v7 = vadd.f32 %v1838_v28, %v1389_v14  ;;  %v2729_v22 = vrot.slane %v2728_v25, 1 }
 0x397   : > { %2155 = vmatmul.f32.gmra.mxu3 %v3533_v39  ;;  %v2811_v46 = vmax.f32 %v2684_v5, %v2685_v36 }
 0x398   : > { %v2739_v49 = vmax.f32 %v2657_v27, %v2658_v40  ;;  %3536 = vtanh.f32 %v1839_v7  ;;  %3287 = vmatmul.msk.f32.gmra.mxu1 %vm999_vm3, %v995_v35  ;;  %v2730_v18 = vmax.f32 %v2728_v25, %v2729_v22  ;;  %v2474_v40 = vpop.permute.xlu2 %2473  ;;  %v998_v22 = vld [vmem:[%s5189_s3 + $0x238] sm:$0xff] }
 0x399   : > { %3360 = vmatmul.msk.f32.gmra.mxu2 %vm999_vm3, %v924_v12 }
 0x39a   : > { %v2108_v51 = vpop.f32.mrf.mxu3 }
 0x39b   : > { %v3535_v55 = vpop.eup %3534  ;;  %v2109_v21 = vadd.f32 %v2108_v51, %v4703_v53  ;;  %v2027_v23 = vpop.f32.mrf.mxu0 }
 0x39c   : > { %v2028_v56 = vadd.f32 %v2027_v23, %v4703_v53  ;;  %v1841_v58 = vpop.f32.mrf.mxu2  ;;  %v4936_v59 = vsel %vm2981_vm5, %v3535_v55, %v4896_v45 }
 0x39d   : > { %v2686_v38 = vadd.f32 %v2469_v26, %v2109_v21  ;;  %v1392_v61 = vpop.f32.mrf.mxu1  ;;  %v2479_v26 = vpop.permute.xlu0 %2478 }
 0x39e   : > { %v3537_v63 = vpop.eup %3536  ;;  %v2659_v2 = vadd.f32 %v4643_v47, %v2028_v56  ;;  %v1842_v52 = vadd.f32 %v1841_v58, %v1392_v61 }
 0x39f   : > { %v2812_v34 = vmax.f32 %v2811_v46, %v2686_v38  ;;  %2158 = vmatmul.f32.gmra.mxu3 %v3537_v63  ;;  %v2484_v63 = vpop.permute.xlu1 %2483 }
 0x3a0   : > { %v2740_v45 = vmax.f32 %v2739_v49, %v2659_v2  ;;  %3538 = vtanh.f32 %v1842_v52  ;;  %3288 = vmatmul.msk.f32.gmra.mxu1 %vm999_vm3, %v996_v62 }
 0x3a1   : > { %v2813_v3 = vrot.slane %v2812_v34, 4  ;;  %3361 = vmatmul.msk.f32.gmra.mxu2 %vm999_vm3, %v925_v60  ;;  %3540 = vtanh.f32 %v2730_v18 }
 0x3a2   : > { %v2741_v10 = vrot.slane %v2740_v45, 4  ;;  %v2111_v6 = vpop.f32.mrf.mxu3  ;;  %3542 = vtanh.f32 %v2738_v29 }
 0x3a3   : > { %v2814_v47 = vmax.f32 %v2812_v34, %v2813_v3  ;;  %v2030_v11 = vpop.f32.mrf.mxu0  ;;  %v2112_v35 = vadd.f32 %v2111_v6, %v4703_v53 }
 0x3a4   : > { %v2742_v15 = vmax.f32 %v2740_v45, %v2741_v10  ;;  %v1844_v32 = vpop.f32.mrf.mxu2  ;;  %v2031_v44 = vadd.f32 %v2030_v11, %v4703_v53 }
 0x3a5   : > { %v2815_v16 = vrot.slane %v2814_v47, 2  ;;  %v1395_v30 = vpop.f32.mrf.mxu1  ;;  %v2687_v21 = vadd.f32 %v2474_v40, %v2112_v35  ;;  %v2952_v35 = vld [vmem:[%s5194_s8 + $0x68] sm:$0xff] }
 0x3a6   : > { %v3539_v37 = vpop.eup %3538  ;;  %v2743_v19 = vrot.slane %v2742_v15, 2  ;;  %v1845_v43 = vadd.f32 %v1844_v32, %v1395_v30  ;;  %v2660_v50 = vadd.f32 %v4645_v42, %v2031_v44 }
 0x3a7   : > { %v2816_v24 = vmax.f32 %v2814_v47, %v2815_v16  ;;  %2161 = vmatmul.f32.gmra.mxu3 %v3539_v37  ;;  %v3541_v28 = vpop.eup %3540  ;;  %v2954_v37 = vld [vmem:[%s5194_s8 + $0x78] sm:$0xff] }
 0x3a8   : > { %v2744_v27 = vmax.f32 %v2742_v15, %v2743_v19  ;;  %3544 = vtanh.f32 %v1845_v43  ;;  %3289 = vmatmul.msk.f32.gmra.mxu1 %vm999_vm3, %v997_v17  ;;  %v3543_v5 = vpop.eup %3542  ;;  %3010 = vmatpush.msra.mxu0 %v2954_v37 }
 0x3a9   : > { %v2817_v14 = vrot.slane %v2816_v24, 1  ;;  %3362 = vmatmul.msk.f32.gmra.mxu2 %vm999_vm3, %v926_v0  ;;  %v2980_v57 = vsel %vm2979_vm4, %v3543_v5, %v3541_v28 }
 0x3aa   : > { %v2745_v36 = vrot.slane %v2744_v27, 1  ;;  %v2114_v39 = vpop.f32.mrf.mxu3 }
 0x3ab   : > { %v2818_v7 = vmax.f32 %v2816_v24, %v2817_v14  ;;  %v2115_v12 = vadd.f32 %v2114_v39, %v4703_v53  ;;  %v2033_v25 = vpop.f32.mrf.mxu0  ;;  %v2953_v24 = vld [vmem:[%s5194_s8 + $0x70] sm:$0xff]  ;;  %v2951_v39 = vld [vmem:[%s5194_s8 + $0x60] sm:$0xff] }
 0x3ac   : > { %v2746_v46 = vmax.f32 %v2744_v27, %v2745_v36  ;;  %v2034_v49 = vadd.f32 %v2033_v25, %v4703_v53  ;;  %v1847_v51 = vpop.f32.mrf.mxu2  ;;  %3011 = vmatpush.msra.mxu0 %v2953_v24 }
 0x3ad   : > { %3546 = vtanh.f32 %v2818_v7  ;;  %v1398_v55 = vpop.f32.mrf.mxu1  ;;  %v2688_v23 = vadd.f32 %v2479_v26, %v2115_v12 }
 0x3ae   : > { %v3545_v56 = vpop.eup %3544  ;;  %3548 = vtanh.f32 %v2746_v46  ;;  %v2661_v58 = vadd.f32 %v4641_v41, %v2034_v49  ;;  %v1848_v38 = vadd.f32 %v1847_v51, %v1398_v55  ;;  %3012 = vmatpush.msra.mxu0 %v2952_v35  ;;  %v2950_v46 = vld [vmem:[%s5194_s8 + $0x58] sm:$0xff]  ;;  %v4998_v51 = vld [vmem:[%s5196_s10 + $0x3] ss:$0 sm:$0xff] }
 0x3af   : > { %2164 = vmatmul.f32.gmra.mxu3 %v3545_v56  ;;  %v2819_v42 = vmax.f32 %v2687_v21, %v2688_v23  ;;  %v2949_v21 = vld [vmem:[%s5194_s8 + $0x50] sm:$0xff]  ;;  %v2948_v56 = vld [vmem:[%s5194_s8 + $0x48] sm:$0xff] }
 0x3b0   : > { %v2747_v61 = vmax.f32 %v2660_v50, %v2661_v58  ;;  %3550 = vtanh.f32 %v1848_v38  ;;  %3290 = vmatmul.msk.f32.gmra.mxu1 %vm999_vm3, %v998_v22  ;;  %3013 = vmatpush.msra.mxu0 %v2951_v39 }
 0x3b2   : > { %v2117_v62 = vpop.f32.mrf.mxu3  ;;  %3014 = vmatpush.msra.mxu0 %v2950_v46 }
 0x3b3   : > { %v3547_v2 = vpop.eup %3546  ;;  %v2118_v52 = vadd.f32 %v2117_v62, %v4703_v53  ;;  %v2036_v60 = vpop.f32.mrf.mxu0 }
 0x3b4   : > { %v3549_v18 = vpop.eup %3548  ;;  %v2037_v34 = vadd.f32 %v2036_v60, %v4703_v53  ;;  %v1850_v29 = vpop.f32.mrf.mxu2  ;;  %v4970_v41 = vsel %vm2983_vm6, %v3547_v2, %v4936_v59  ;;  %3015 = vmatpush.msra.mxu0 %v2949_v21  ;;  %v2946_v2 = vld [vmem:[%s5194_s8 + $0x38] sm:$0xff] }
 0x3b5   : > { %v2689_v45 = vadd.f32 %v2484_v63, %v2118_v52  ;;  %v1401_v3 = vpop.f32.mrf.mxu1  ;;  %v4973_v10 = vsel %vm2981_vm5, %v3549_v18, %v2980_v57  ;;  %v2499_v21 = vpop.permute.xlu1 %2498 }
 0x3b6   : > { %v3551_v6 = vpop.eup %3550  ;;  %v2662_v47 = vadd.f32 %v4664_v1, %v2037_v34  ;;  %v1851_v11 = vadd.f32 %v1850_v29, %v1401_v3  ;;  %3016 = vmatpush.msra.mxu0 %v2948_v56 }
 0x3b7   : > { %v2820_v15 = vmax.f32 %v2819_v42, %v2689_v45  ;;  %2167 = vmatmul.f32.gmra.mxu3 %v3551_v6  ;;  %v2947_v42 = vld [vmem:[%s5194_s8 + $0x40] sm:$0xff] }
 0x3b8   : > { %v2748_v32 = vmax.f32 %v2747_v61, %v2662_v47  ;;  %3552 = vtanh.f32 %v1851_v11  ;;  %3017 = vmatpush.msra.mxu0 %v2947_v42  ;;  %v2945_v47 = vld [vmem:[%s5194_s8 + $0x30] sm:$0xff] }
 0x3b9   : > { %v2821_v16 = vrot.slane %v2820_v15, 4 }
 0x3ba   : > { %v2749_v53 = vrot.slane %v2748_v32, 4  ;;  %v4976_v30 = vpop.f32.mrf.mxu3  ;;  %3018 = vmatpush.msra.mxu0 %v2946_v2 }
 0x3bb   : > { %v2822_v17 = vmax.f32 %v2820_v15, %v2821_v16  ;;  %v2039_v59 = vpop.f32.mrf.mxu0  ;;  %v2942_v16 = vld [vmem:[%s5194_s8 + $0x18] sm:$0xff]  ;;  %v2121_v2 = vadd.f32 %v4998_v51, %v4976_v30 }
 0x3bc   : > { %v2750_v19 = vmax.f32 %v2748_v32, %v2749_v53  ;;  %v1853_v43 = vpop.f32.mrf.mxu2  ;;  %v2040_v26 = vadd.f32 %v4998_v51, %v2039_v59  ;;  %3019 = vmatpush.msra.mxu0 %v2945_v47 }
 0x3bd   : > { %v2823_v0 = vrot.slane %v2822_v17, 2  ;;  %v1404_v1 = vpop.f32.mrf.mxu1 }
 0x3be   : > { %v3553_v27 = vpop.eup %3552  ;;  %v2751_v44 = vrot.slane %v2750_v19, 2  ;;  %v1854_v28 = vadd.f32 %v1853_v43, %v1404_v1  ;;  %v2663_v58 = vadd.f32 %v4669_v8, %v2040_v26  ;;  %v2773_v43 = vrot.slane %v4730_v48, 4 }
 0x3bf   : > { %v2824_v14 = vmax.f32 %v2822_v17, %v2823_v0  ;;  %2170 = vmatmul.f32.gmra.mxu3 %v3553_v27  ;;  %v2940_v0 = vld [vmem:[%s5194_s8 + $0x8] sm:$0xff]  ;;  %v2781_v1 = vrot.slane %v4771_v4, 4 }
 0x3c0   : > { %v2752_v5 = vmax.f32 %v2750_v19, %v2751_v44  ;;  %3554 = vtanh.f32 %v1854_v28  ;;  %v2941_v19 = vld [vmem:[%s5194_s8 + $0x10] sm:$0xff]  ;;  %v2939_v28 = vld [vmem:[%s5194_s8] sm:$0xff] }
 0x3c1   : > { %v2825_v36 = vrot.slane %v2824_v14, 1 }
 0x3c2   : > { %v2753_v40 = vrot.slane %v2752_v5, 1  ;;  %v4990_v7 = vpop.f32.mrf.mxu3 }
 0x3c3   : > { %v2826_v12 = vmax.f32 %v2824_v14, %v2825_v36  ;;  %v2042_v25 = vpop.f32.mrf.mxu0  ;;  %v2774_v14 = vmax.f32 %v4730_v48, %v2773_v43  ;;  %v2124_v42 = vadd.f32 %v4998_v51, %v4990_v7 }
 0x3c4   : > { %v2754_v50 = vmax.f32 %v2752_v5, %v2753_v40  ;;  %v1856_v49 = vpop.f32.mrf.mxu2  ;;  %v2043_v55 = vadd.f32 %v4998_v51, %v2042_v25  ;;  %v2055_v5 = vadd.f32 %v4998_v51, %v4674_v9  ;;  %v2782_v40 = vmax.f32 %v4771_v4, %v2781_v1 }
 0x3c5   : > { %3556 = vtanh.f32 %v2826_v12  ;;  %v1407_v22 = vpop.f32.mrf.mxu1  ;;  %v2494_v12 = vpop.permute.xlu0 %2493 }
 0x3c6   : > { %v3555_v23 = vpop.eup %3554  ;;  %3558 = vtanh.f32 %v2754_v50  ;;  %v1857_v57 = vadd.f32 %v1856_v49, %v1407_v22  ;;  %v2664_v38 = vadd.f32 %v4658_v20, %v2043_v55  ;;  %v2489_v49 = vpop.permute.xlu2 %2488  ;;  %v2775_v22 = vrot.slane %v2774_v14, 2 }
 0x3c7   : > { %2173 = vmatmul.f32.gmra.mxu3 %v3555_v23  ;;  %v2668_v9 = vadd.f32 %v4708_v54, %v2055_v5  ;;  %v2690_v30 = vadd.f32 %v2489_v49, %v2121_v2 }
 0x3c8   : > { %3560 = vtanh.f32 %v1857_v57  ;;  %v2755_v18 = vmax.f32 %v2663_v58, %v2664_v38  ;;  %v2783_v57 = vrot.slane %v2782_v40, 2  ;;  %v2776_v38 = vmax.f32 %v2774_v14, %v2775_v22 }
 0x3ca   : > { %v5013_v61 = vpop.f32.mrf.mxu3 }
 0x3cb   : > { %v3557_v62 = vpop.eup %3556  ;;  %v2045_v63 = vpop.f32.mrf.mxu0  ;;  %v2127_v54 = vadd.f32 %v4998_v51, %v5013_v61 }
 0x3cc   : > { %v3559_v52 = vpop.eup %3558  ;;  %v2046_v60 = vadd.f32 %v4998_v51, %v2045_v63  ;;  %v1859_v8 = vpop.f32.mrf.mxu2  ;;  %v5021_v20 = vsel %vm2985_vm7, %v3557_v62, %v4970_v41  ;;  %v2944_v41 = vld [vmem:[%s5194_s8 + $0x28] sm:$0xff]  ;;  %v2784_v63 = vmax.f32 %v2782_v40, %v2783_v57 }
 0x3cd   : > { %v1410_v34 = vpop.f32.mrf.mxu1  ;;  %v5025_v29 = vsel %vm2983_vm6, %v3559_v52, %v4973_v10  ;;  %3020 = vmatpush.msra.mxu0 %v2944_v41  ;;  %v2943_v10 = vld [vmem:[%s5194_s8 + $0x20] sm:$0xff]  ;;  %v2509_v47 = vpop.permute.xlu0 %2508 }
 0x3ce   : > { %v3561_v45 = vpop.eup %3560  ;;  %v2665_v3 = vadd.f32 %v4683_v31, %v2046_v60  ;;  %v1860_v6 = vadd.f32 %v1859_v8, %v1410_v34  ;;  %v2504_v41 = vpop.permute.xlu2 %2503 }
 0x3cf   : > { %2176 = vmatmul.f32.gmra.mxu3 %v3561_v45  ;;  %3021 = vmatpush.msra.mxu0 %v2943_v10 }
 0x3d0   : > { %3562 = vtanh.f32 %v1860_v6  ;;  %v2756_v11 = vmax.f32 %v2755_v18, %v2665_v3  ;;  %v2777_v3 = vrot.slane %v2776_v38, 1  ;;  %v2691_v6 = vadd.f32 %v2494_v12, %v2124_v42 }
 0x3d1   : > { %3022 = vmatpush.msra.mxu0 %v2942_v16  ;;  %v2785_v16 = vrot.slane %v2784_v63, 1 }
 0x3d2   : > { %v2129_v15 = vpop.f32.mrf.mxu3  ;;  %v2757_v53 = vrot.slane %v2756_v11, 4 }
 0x3d3   : > { %v2048_v31 = vpop.f32.mrf.mxu0  ;;  %3023 = vmatpush.msra.mxu0 %v2941_v19  ;;  %v2130_v18 = vadd.f32 %v4998_v51, %v2129_v15  ;;  %v2827_v19 = vmax.f32 %v2690_v30, %v2691_v6 }
 0x3d4   : > { %v1862_v32 = vpop.f32.mrf.mxu2  ;;  %v2758_v24 = vmax.f32 %v2756_v11, %v2757_v53  ;;  %v2049_v27 = vadd.f32 %v4998_v51, %v2048_v31  ;;  %v2692_v31 = vadd.f32 %v2499_v21, %v2127_v54 }
 0x3d5   : > { %v1413_v17 = vpop.f32.mrf.mxu1  ;;  %3024 = vmatpush.msra.mxu0 %v2940_v0  ;;  %v2693_v53 = vadd.f32 %v2504_v41, %v2130_v18  ;;  %v2524_v22 = vpop.permute.xlu0 %2523 }
 0x3d6   : > { %v3563_v59 = vpop.eup %3562  ;;  %v1863_v37 = vadd.f32 %v1862_v32, %v1413_v17  ;;  %v2759_v25 = vrot.slane %v2758_v24, 2  ;;  %v2666_v26 = vadd.f32 %v4685_v33, %v2049_v27  ;;  %v2514_v32 = vpop.permute.xlu1 %2513 }
 0x3d7   : > { %2179 = vmatmul.f32.gmra.mxu3 %v3563_v59  ;;  %3025 = vmatpush.msra.mxu0 %v2939_v28  ;;  %v2786_v28 = vmax.f32 %v2784_v63, %v2785_v16 }
 0x3d8   : > { %3564 = vtanh.f32 %v1863_v37  ;;  %v2760_v56 = vmax.f32 %v2758_v24, %v2759_v25  ;;  %v2778_v37 = vmax.f32 %v2776_v38, %v2777_v3  ;;  %v2828_v24 = vmax.f32 %v2827_v19, %v2692_v31 }
 0x3da   : > { %v2132_v44 = vpop.f32.mrf.mxu3  ;;  %v2761_v52 = vrot.slane %v2760_v56, 1 }
 0x3db   : > { %v2051_v35 = vpop.f32.mrf.mxu0  ;;  %v2133_v33 = vadd.f32 %v4998_v51, %v2132_v44 }
 0x3dc   : > { %v2052_v36 = vadd.f32 %v4998_v51, %v2051_v35  ;;  %v1865_v39 = vpop.f32.mrf.mxu2  ;;  %v2762_v61 = vmax.f32 %v2760_v56, %v2761_v52 }
 0x3dd   : > { %v1416_v46 = vpop.f32.mrf.mxu1  ;;  %v2694_v11 = vadd.f32 %v2509_v47, %v2133_v33  ;;  %v2534_v47 = vpop.permute.xlu0 %2533 }
 0x3de   : > { %v3565_v50 = vpop.eup %3564  ;;  %v2667_v55 = vadd.f32 %v4688_v13, %v2052_v36  ;;  %v1866_v48 = vadd.f32 %v1865_v39, %v1416_v46  ;;  %v2829_v36 = vrot.slane %v2828_v24, 4  ;;  %v2519_v39 = vpop.permute.xlu2 %2518 }
 0x3df   : > { %2182 = vmatmul.f32.gmra.mxu3 %v3565_v50  ;;  %v2835_v43 = vmax.f32 %v2693_v53, %v2694_v11 }
 0x3e0   : > { %v2763_v23 = vmax.f32 %v2666_v26, %v2667_v55  ;;  %3566 = vtanh.f32 %v1866_v48  ;;  %v2830_v49 = vmax.f32 %v2828_v24, %v2829_v36 }
 0x3e2   : > { %v2764_v4 = vmax.f32 %v2763_v23, %v2668_v9  ;;  %v2135_v58 = vpop.f32.mrf.mxu3  ;;  %v2831_v42 = vrot.slane %v2830_v49, 2 }
 0x3e3   : > { %v2136_v45 = vadd.f32 %v4998_v51, %v2135_v58 }
 0x3e4   : > { %v2765_v62 = vrot.slane %v2764_v4, 4  ;;  %v1868_v13 = vpop.f32.mrf.mxu2 }
 0x3e5   : > { %v1419_v60 = vpop.f32.mrf.mxu1  ;;  %v2695_v15 = vadd.f32 %v2514_v32, %v2136_v45 }
 0x3e6   : > { %v3567_v8 = vpop.eup %3566  ;;  %v2766_v34 = vmax.f32 %v2764_v4, %v2765_v62  ;;  %v1869_v7 = vadd.f32 %v1868_v13, %v1419_v60  ;;  %v2529_v54 = vpop.permute.xlu2 %2528  ;;  %v2832_v60 = vmax.f32 %v2830_v49, %v2831_v42 }
 0x3e7   : > { %2185 = vmatmul.f32.gmra.mxu3 %v3567_v8  ;;  %v2836_v35 = vmax.f32 %v2835_v43, %v2695_v15 }
 0x3e8   : > { %v2767_v10 = vrot.slane %v2766_v34, 2  ;;  %3568 = vtanh.f32 %v1869_v7  ;;  %v2833_v41 = vrot.slane %v2832_v60, 1 }
 0x3e9   : > { %3570 = vtanh.f32 %v2762_v61  ;;  %v2837_v40 = vrot.slane %v2836_v35, 4 }
 0x3ea   : > { %v2768_v17 = vmax.f32 %v2766_v34, %v2767_v10  ;;  %v2138_v59 = vpop.f32.mrf.mxu3  ;;  %3572 = vtanh.f32 %v2778_v37  ;;  %v2834_v32 = vmax.f32 %v2832_v60, %v2833_v41 }
 0x3eb   : > { %v2838_v21 = vmax.f32 %v2836_v35, %v2837_v40  ;;  %v2139_v56 = vadd.f32 %v4998_v51, %v2138_v59 }
 0x3ec   : > { %v2769_v0 = vrot.slane %v2768_v17, 1  ;;  %v1871_v1 = vpop.f32.mrf.mxu2 }
 0x3ed   : > { %v1422_v27 = vpop.f32.mrf.mxu1  ;;  %v2839_v13 = vrot.slane %v2838_v21, 2  ;;  %v2696_v2 = vadd.f32 %v2519_v39, %v2139_v56 }
 0x3ee   : > { %v3569_v44 = vpop.eup %3568  ;;  %v2770_v14 = vmax.f32 %v2768_v17, %v2769_v0  ;;  %v1872_v5 = vadd.f32 %v1871_v1, %v1422_v27  ;;  %v2554_v0 = vpop.permute.xlu0 %2553 }
 0x3ef   : > { %2188 = vmatmul.f32.gmra.mxu3 %v3569_v44  ;;  %v3571_v25 = vpop.eup %3570  ;;  %v2840_v7 = vmax.f32 %v2838_v21, %v2839_v13  ;;  %v2539_v44 = vpop.permute.xlu1 %2538 }
 0x3f0   : > { %3574 = vtanh.f32 %v2770_v14  ;;  %v3573_v50 = vpop.eup %3572  ;;  %v2986_v23 = vsel %vm2985_vm7, %v3571_v25, %v5025_v29 }
 0x3f1   : > { %3576 = vtanh.f32 %v1872_v5  ;;  %v2841_v10 = vrot.slane %v2840_v7, 1 }
 0x3f2   : > { %3578 = vtanh.f32 %v2786_v28  ;;  %v2141_v12 = vpop.f32.mrf.mxu3 }
 0x3f3   : > { %v2142_v26 = vadd.f32 %v4998_v51, %v2141_v12  ;;  %v2842_v15 = vmax.f32 %v2840_v7, %v2841_v10 }
 0x3f4   : > { %v1874_v46 = vpop.f32.mrf.mxu2 }
 0x3f5   : > { %v1425_v55 = vpop.f32.mrf.mxu1  ;;  %v2697_v33 = vadd.f32 %v2524_v22, %v2142_v26 }
 0x3f6   : > { %v3575_v48 = vpop.eup %3574  ;;  %v1875_v9 = vadd.f32 %v1874_v46, %v1425_v55 }
 0x3f7   : > { %v3577_v57 = vpop.eup %3576  ;;  %v2988_v4 = vsel %vm2987_vm8, %v3575_v48, %v2986_v23  ;;  %v2843_v8 = vmax.f32 %v2696_v2, %v2697_v33  ;;  %v2544_v48 = vpop.permute.xlu0 %2543 }
 0x3f8   : > { %v3579_v58 = vpop.eup %3578  ;;  %3580 = vtanh.f32 %v1875_v9  ;;  %2191 = vmatmul.f32.gmra.mxu3 %v3577_v57  ;;  %v2990_v38 = vsel %vm2989_vm9, %v3573_v50, %v2988_v4  ;;  %v2564_v13 = vpop.permute.xlu1 %2563 }
 0x3f9   : > { %v2992_v62 = vsel %vm2991_vm10, %v3579_v58, %v2990_v38 }
 0x3fa   : > { %v2144_v63 = vpop.f32.mrf.mxu3  ;;  %3026 = vmatmul.f32.vlgmr.msra.gmra.mxu0 %v2992_v62 }
 0x3fb   : > { %v2145_v29 = vadd.f32 %v4998_v51, %v2144_v63 }
 0x3fc   : > { %v1877_v52 = vpop.f32.mrf.mxu2 }
 0x3fd   : > { %v2698_v18 = vadd.f32 %v2529_v54, %v2145_v29  ;;  %v1428_v34 = vpop.f32.mrf.mxu1  ;;  %v2549_v29 = vpop.permute.xlu2 %2548 }
 0x3fe   : > { %v3581_v45 = vpop.eup %3580  ;;  %v1878_v3 = vadd.f32 %v1877_v52, %v1428_v34 }
 0x3ff   : > { %v2844_v6 = vmax.f32 %v2843_v8, %v2698_v18 }
 0x400   : > { %3582 = vtanh.f32 %v1878_v3  ;;  %2194 = vmatmul.f32.gmra.mxu3 %v3581_v45  ;;  %v2559_v41 = vpop.permute.xlu1 %2558 }
 0x401   : > { %v2845_v11 = vrot.slane %v2844_v6, 4 }
 0x402   : > { %v2147_v30 = vpop.f32.mrf.mxu3 }
 0x403   : > { %v2846_v31 = vmax.f32 %v2844_v6, %v2845_v11  ;;  %v2148_v43 = vadd.f32 %v4998_v51, %v2147_v30 }
 0x404   : > { %v1880_v61 = vpop.f32.mrf.mxu2 }
 0x405   : > { %v2847_v16 = vrot.slane %v2846_v31, 2  ;;  %v1431_v53 = vpop.f32.mrf.mxu1  ;;  %v2699_v14 = vadd.f32 %v2534_v47, %v2148_v43 }
 0x406   : > { %v3583_v17 = vpop.eup %3582  ;;  %v1881_v59 = vadd.f32 %v1880_v61, %v1431_v53 }
 0x407   : > { %v2848_v37 = vmax.f32 %v2846_v31, %v2847_v16 }
 0x408   : > { %3584 = vtanh.f32 %v1881_v59  ;;  %2197 = vmatmul.f32.gmra.mxu3 %v3583_v17 }
 0x409   : > { %3586 = vtanh.f32 %v2834_v32  ;;  %v2849_v19 = vrot.slane %v2848_v37, 1 }
 0x40a   : > { %3588 = vtanh.f32 %v2842_v15  ;;  %v2150_v1 = vpop.f32.mrf.mxu3 }
 0x40b   : > { %v2850_v24 = vmax.f32 %v2848_v37, %v2849_v19  ;;  %v2151_v27 = vadd.f32 %v4998_v51, %v2150_v1 }
 0x40c   : > { %v1883_v28 = vpop.f32.mrf.mxu2 }
 0x40d   : > { %3590 = vtanh.f32 %v2850_v24  ;;  %v2700_v35 = vadd.f32 %v2539_v44, %v2151_v27  ;;  %v1434_v5 = vpop.f32.mrf.mxu1 }
 0x40e   : > { %v3585_v36 = vpop.eup %3584  ;;  %v1884_v39 = vadd.f32 %v1883_v28, %v1434_v5 }
 0x40f   : > { %v3587_v40 = vpop.eup %3586  ;;  %v2851_v12 = vmax.f32 %v2699_v14, %v2700_v35  ;;  %v2569_v35 = vpop.permute.xlu2 %2568 }
 0x410   : > { %v3589_v25 = vpop.eup %3588  ;;  %3592 = vtanh.f32 %v1884_v39  ;;  %2200 = vmatmul.f32.gmra.mxu3 %v3585_v36  ;;  %v2997_v50 = vsel %vm2987_vm8, %v3587_v40, %v5021_v20 }
 0x411   : > { %v2998_v55 = vsel %vm2989_vm9, %v3589_v25, %v2997_v50  ;;  %v2574_v50 = vpop.permute.xlu1 %2573 }
 0x412   : > { %v2153_v46 = vpop.f32.mrf.mxu3 }
 0x413   : > { %v3591_v49 = vpop.eup %3590  ;;  %v2154_v26 = vadd.f32 %v4998_v51, %v2153_v46 }
 0x414   : > { %v1886_v22 = vpop.f32.mrf.mxu2  ;;  %v2999_v21 = vsel %vm2991_vm10, %v3591_v49, %v2998_v55 }
 0x415   : > { %v2701_v9 = vadd.f32 %v2544_v48, %v2154_v26  ;;  %v1437_v23 = vpop.f32.mrf.mxu1  ;;  %3029 = vmatmul.f32.gmra.mxu0 %v2999_v21 }
 0x416   : > { %v3593_v57 = vpop.eup %3592  ;;  %v1887_v56 = vadd.f32 %v1886_v22, %v1437_v23 }
 0x417   : > { %v2852_v4 = vmax.f32 %v2851_v12, %v2701_v9 }
 0x418   : > { %3594 = vtanh.f32 %v1887_v56  ;;  %2203 = vmatmul.f32.gmra.mxu3 %v3593_v57 }
 0x419   : > { %v2853_v54 = vrot.slane %v2852_v4, 4 }
 0x41a   : > { %v2156_v58 = vpop.f32.mrf.mxu3 }
 0x41b   : > { %v2157_v62 = vadd.f32 %v4998_v51, %v2156_v58  ;;  %v2854_v3 = vmax.f32 %v2852_v4, %v2853_v54  ;;  %v2589_v54 = vpop.permute.xlu1 %2588 }
 0x41c   : > { %v1889_v38 = vpop.f32.mrf.mxu2 }
 0x41d   : > { %v1440_v20 = vpop.f32.mrf.mxu1  ;;  %v2702_v60 = vadd.f32 %v2549_v29, %v2157_v62  ;;  %v2855_v11 = vrot.slane %v2854_v3, 2 }
 0x41e   : > { %v3595_v42 = vpop.eup %3594  ;;  %v1890_v33 = vadd.f32 %v1889_v38, %v1440_v20  ;;  %v2579_v20 = vpop.permute.xlu2 %2578 }
 0x41f   : > { %v2856_v53 = vmax.f32 %v2854_v3, %v2855_v11 }
 0x420   : > { %3596 = vtanh.f32 %v1890_v33  ;;  %2206 = vmatmul.f32.gmra.mxu3 %v3595_v42  ;;  %v2584_v42 = vpop.permute.xlu0 %2583 }
 0x421   : > { %v2857_v37 = vrot.slane %v2856_v53, 1 }
 0x422   : > { %v2159_v63 = vpop.f32.mrf.mxu3 }
 0x423   : > { %v2160_v2 = vadd.f32 %v4998_v51, %v2159_v63  ;;  %v2858_v1 = vmax.f32 %v2856_v53, %v2857_v37 }
 0x424   : > { %v1892_v52 = vpop.f32.mrf.mxu2 }
 0x425   : > { %v2703_v8 = vadd.f32 %v2554_v0, %v2160_v2  ;;  %v1443_v18 = vpop.f32.mrf.mxu1 }
 0x426   : > { %v3597_v34 = vpop.eup %3596  ;;  %v1893_v45 = vadd.f32 %v1892_v52, %v1443_v18 }
 0x427   : > { %v2859_v7 = vmax.f32 %v2702_v60, %v2703_v8 }
 0x428   : > { %3598 = vtanh.f32 %v1893_v45  ;;  %2209 = vmatmul.f32.gmra.mxu3 %v3597_v34 }
 0x42a   : > { %v2162_v6 = vpop.f32.mrf.mxu3 }
 0x42b   : > { %v2163_v47 = vadd.f32 %v4998_v51, %v2162_v6  ;;  %v3637_v6 = vld [vmem:[%s3798_s20] sm:$0xff] }
 0x42c   : > { %v1895_v10 = vpop.f32.mrf.mxu2  ;;  %3084 = vrot.lane.b32.xlu0 %v3637_v6, %s3649_s27 }
 0x42d   : > { %v2704_v30 = vadd.f32 %v2559_v41, %v2163_v47  ;;  %v1446_v31 = vpop.f32.mrf.mxu1  ;;  %v3638_v47 = vld [vmem:[%s3798_s20 + $0x8] sm:$0xff]  ;;  %v3639_v41 = vld [vmem:[%s3798_s20 + $0x10] sm:$0xff] }
 0x42e   : > { %v3599_v61 = vpop.eup %3598  ;;  %v1896_v32 = vadd.f32 %v1895_v10, %v1446_v31  ;;  %3086 = vrot.lane.b32.xlu1 %v3638_v47, %s3649_s27  ;;  %3088 = vrot.lane.b32.xlu2 %v3639_v41, %s3649_s27  ;;  %v3046_v47 = vld [vmem:[%s5195_s9 + $0x38] sm:$0xff]  ;;  %v3045_v41 = vld [vmem:[%s5195_s9 + $0x30] sm:$0xff] }
 0x42f   : > { %v2860_v16 = vmax.f32 %v2859_v7, %v2704_v30 }
 0x430   : > { %3600 = vtanh.f32 %v1896_v32  ;;  %2212 = vmatmul.f32.gmra.mxu3 %v3599_v61  ;;  %v2594_v32 = vpop.permute.xlu2 %2593 }
 0x431   : > { %v2861_v17 = vrot.slane %v2860_v16, 4  ;;  %3602 = vtanh.f32 %v2858_v1 }
 0x432   : > { %v2165_v15 = vpop.f32.mrf.mxu3 }
 0x433   : > { %v2862_v59 = vmax.f32 %v2860_v16, %v2861_v17  ;;  %v2166_v27 = vadd.f32 %v4998_v51, %v2165_v15  ;;  %v2599_v16 = vpop.permute.xlu0 %2598 }
 0x435   : > { %v2863_v19 = vrot.slane %v2862_v59, 2  ;;  %v2705_v5 = vadd.f32 %v2564_v13, %v2166_v27 }
 0x436   : > { %v3601_v43 = vpop.eup %3600 }
 0x437   : > { %v2864_v0 = vmax.f32 %v2862_v59, %v2863_v19  ;;  %v3603_v40 = vpop.eup %3602 }
 0x438   : > { %2215 = vmatmul.f32.gmra.mxu3 %v3601_v43  ;;  %v2604_v43 = vpop.permute.xlu1 %2603 }
 0x439   : > { %v2865_v24 = vrot.slane %v2864_v0, 1 }
 0x43a   : > { %v2168_v44 = vpop.f32.mrf.mxu3 }
 0x43b   : > { %v2866_v28 = vmax.f32 %v2864_v0, %v2865_v24  ;;  %v2169_v14 = vadd.f32 %v4998_v51, %v2168_v44 }
 0x43d   : > { %3604 = vtanh.f32 %v2866_v28  ;;  %v2706_v36 = vadd.f32 %v2569_v35, %v2169_v14 }
 0x43f   : > { %v2867_v39 = vmax.f32 %v2705_v5, %v2706_v36 }
 0x442   : > { %v2171_v12 = vpop.f32.mrf.mxu3 }
 0x443   : > { %v3605_v25 = vpop.eup %3604  ;;  %v2172_v46 = vadd.f32 %v4998_v51, %v2171_v12 }
 0x444   : > { %v3000_v49 = vsel %vm2979_vm4, %v3605_v25, %v3603_v40 }
 0x445   : > { %v2707_v26 = vadd.f32 %v2574_v50, %v2172_v46 }
 0x447   : > { %v2868_v55 = vmax.f32 %v2867_v39, %v2707_v26  ;;  %v3054_v26 = vld [vmem:[%s5195_s9 + $0x78] sm:$0xff] }
 0x448   : > { %3055 = vmatpush.msrb.mxu0 %v3054_v26 }
 0x449   : > { %v2869_v48 = vrot.slane %v2868_v55, 4 }
 0x44a   : > { %v2174_v22 = vpop.f32.mrf.mxu3 }
 0x44b   : > { %v2870_v21 = vmax.f32 %v2868_v55, %v2869_v48  ;;  %v2175_v56 = vadd.f32 %v4998_v51, %v2174_v22  ;;  %v2609_v55 = vpop.permute.xlu2 %2608  ;;  %v2619_v48 = vpop.permute.xlu1 %2618  ;;  %v3053_v22 = vld [vmem:[%s5195_s9 + $0x70] sm:$0xff] }
 0x44c   : > { %3056 = vmatpush.msrb.mxu0 %v3053_v22 }
 0x44d   : > { %v2871_v9 = vrot.slane %v2870_v21, 2  ;;  %v2708_v33 = vadd.f32 %v2579_v20, %v2175_v56 }
 0x44f   : > { %v2872_v23 = vmax.f32 %v2870_v21, %v2871_v9  ;;  %v3052_v21 = vld [vmem:[%s5195_s9 + $0x68] sm:$0xff] }
 0x450   : > { %3057 = vmatpush.msrb.mxu0 %v3052_v21 }
 0x451   : > { %v2873_v57 = vrot.slane %v2872_v23, 1 }
 0x452   : > { %v2177_v4 = vpop.f32.mrf.mxu3 }
 0x453   : > { %v2874_v58 = vmax.f32 %v2872_v23, %v2873_v57  ;;  %v2178_v38 = vadd.f32 %v4998_v51, %v2177_v4  ;;  %v3051_v57 = vld [vmem:[%s5195_s9 + $0x60] sm:$0xff] }
 0x454   : > { %3058 = vmatpush.msrb.mxu0 %v3051_v57 }
 0x455   : > { %3606 = vtanh.f32 %v2874_v58  ;;  %v2709_v62 = vadd.f32 %v2584_v42, %v2178_v38  ;;  %v3050_v38 = vld [vmem:[%s5195_s9 + $0x58] sm:$0xff] }
 0x456   : > { %3059 = vmatpush.msrb.mxu0 %v3050_v38 }
 0x457   : > { %v2875_v13 = vmax.f32 %v2708_v33, %v2709_v62 }
 0x45a   : > { %v2180_v63 = vpop.f32.mrf.mxu3 }
 0x45b   : > { %v3607_v2 = vpop.eup %3606  ;;  %v2181_v29 = vadd.f32 %v4998_v51, %v2180_v63  ;;  %v2624_v63 = vpop.permute.xlu2 %2623 }
 0x45c   : > { %v3001_v52 = vsel %vm2981_vm5, %v3607_v2, %v3000_v49  ;;  %v2614_v49 = vpop.permute.xlu0 %2613 }
 0x45d   : > { %v2710_v60 = vadd.f32 %v2589_v54, %v2181_v29  ;;  %v2634_v29 = vpop.permute.xlu1 %2633 }
 0x45f   : > { %v2876_v8 = vmax.f32 %v2875_v13, %v2710_v60  ;;  %v3049_v13 = vld [vmem:[%s5195_s9 + $0x50] sm:$0xff]  ;;  %v3048_v60 = vld [vmem:[%s5195_s9 + $0x48] sm:$0xff] }
 0x460   : > { %3060 = vmatpush.msrb.mxu0 %v3049_v13 }
 0x461   : > { %v2877_v18 = vrot.slane %v2876_v8, 4 }
 0x462   : > { %v2183_v34 = vpop.f32.mrf.mxu3  ;;  %3061 = vmatpush.msrb.mxu0 %v3048_v60 }
 0x463   : > { %v2878_v45 = vmax.f32 %v2876_v8, %v2877_v18  ;;  %v2184_v10 = vadd.f32 %v4998_v51, %v2183_v34 }
 0x464   : > { %v2629_v33 = vpop.permute.xlu0 %2628 }
 0x465   : > { %v2879_v7 = vrot.slane %v2878_v45, 2  ;;  %v2711_v53 = vadd.f32 %v2594_v32, %v2184_v10  ;;  %v3044_v10 = vld [vmem:[%s5195_s9 + $0x28] sm:$0xff] }
 0x467   : > { %v2880_v3 = vmax.f32 %v2878_v45, %v2879_v7  ;;  %v3047_v7 = vld [vmem:[%s5195_s9 + $0x40] sm:$0xff] }
 0x468   : > { %3062 = vmatpush.msrb.mxu0 %v3047_v7 }
 0x469   : > { %v2881_v11 = vrot.slane %v2880_v3, 1 }
 0x46a   : > { %v2186_v30 = vpop.f32.mrf.mxu3  ;;  %3063 = vmatpush.msrb.mxu0 %v3046_v47 }
 0x46b   : > { %v2882_v31 = vmax.f32 %v2880_v3, %v2881_v11  ;;  %v2187_v61 = vadd.f32 %v4998_v51, %v2186_v30 }
 0x46c   : > { %3064 = vmatpush.msrb.mxu0 %v3045_v41 }
 0x46d   : > { %3608 = vtanh.f32 %v2882_v31  ;;  %v2712_v17 = vadd.f32 %v2599_v16, %v2187_v61  ;;  %v3043_v31 = vld [vmem:[%s5195_s9 + $0x20] sm:$0xff]  ;;  %v2639_v61 = vpop.permute.xlu2 %2638 }
 0x46e   : > { %3065 = vmatpush.msrb.mxu0 %v3044_v10 }
 0x46f   : > { %v2883_v15 = vmax.f32 %v2711_v53, %v2712_v17 }
 0x470   : > { %3066 = vmatpush.msrb.mxu0 %v3043_v31 }
 0x472   : > { %v2189_v59 = vpop.f32.mrf.mxu3 }
 0x473   : > { %v3609_v37 = vpop.eup %3608  ;;  %v2190_v19 = vadd.f32 %v4998_v51, %v2189_v59  ;;  %v3041_v59 = vld [vmem:[%s5195_s9 + $0x10] sm:$0xff] }
 0x474   : > { %v3002_v0 = vsel %vm2983_vm6, %v3609_v37, %v3001_v52 }
 0x475   : > { %v2713_v1 = vadd.f32 %v2604_v43, %v2190_v19  ;;  %v3040_v43 = vld [vmem:[%s5195_s9 + $0x8] sm:$0xff] }
 0x477   : > { %v2884_v24 = vmax.f32 %v2883_v15, %v2713_v1  ;;  %v3042_v15 = vld [vmem:[%s5195_s9 + $0x18] sm:$0xff] }
 0x478   : > { %3067 = vmatpush.msrb.mxu0 %v3042_v15 }
 0x479   : > { %v2885_v27 = vrot.slane %v2884_v24, 4 }
 0x47a   : > { %3068 = vmatpush.msrb.mxu0 %v3041_v59 }
 0x47b   : > { %v2886_v44 = vmax.f32 %v2884_v24, %v2885_v27  ;;  %v2192_v28 = vpop.f32.mrf.mxu3  ;;  %v3039_v27 = vld [vmem:[%s5195_s9] sm:$0xff] }
 0x47c   : > { %v2193_v4 = vadd.f32 %v4998_v51, %v2192_v28  ;;  %3069 = vmatpush.msrb.mxu0 %v3040_v43 }
 0x47d   : > { %v2887_v14 = vrot.slane %v2886_v44, 2 }
 0x47e   : > { %v2714_v54 = vadd.f32 %v2609_v55, %v2193_v4  ;;  %3070 = vmatpush.msrb.mxu0 %v3039_v27  ;;  %v3027_v4 = vpop.f32.mrf.mxu0 }
 0x47f   : > { %v2888_v35 = vmax.f32 %v2886_v44, %v2887_v14 }
 0x481   : > { %v2889_v5 = vrot.slane %v2888_v35, 1 }
 0x483   : > { %v2890_v36 = vmax.f32 %v2888_v35, %v2889_v5  ;;  %v2195_v39 = vpop.f32.mrf.mxu3  ;;  %v2649_v5 = vpop.permute.xlu2 %2648 }
 0x484   : > { %v2196_v23 = vadd.f32 %v4998_v51, %v2195_v39 }
 0x485   : > { %3610 = vtanh.f32 %v2890_v36 }
 0x486   : > { %v2715_v62 = vadd.f32 %v2614_v49, %v2196_v23 }
 0x488   : > { %v2891_v45 = vmax.f32 %v2714_v54, %v2715_v62 }
 0x48b   : > { %v3611_v40 = vpop.eup %3610  ;;  %v2198_v12 = vpop.f32.mrf.mxu3 }
 0x48c   : > { %v5103_v25 = vsel %vm2985_vm7, %v3611_v40, %v3002_v0  ;;  %v2199_v58 = vadd.f32 %v4998_v51, %v2198_v12  ;;  %v2644_v0 = vpop.permute.xlu0 %2643 }
 0x48e   : > { %v2716_v52 = vadd.f32 %v2619_v48, %v2199_v58 }
 0x490   : > { %v2892_v6 = vmax.f32 %v2891_v45, %v2716_v52 }
 0x492   : > { %v2893_v30 = vrot.slane %v2892_v6, 4  ;;  %v3030_v13 = vpop.f32.mrf.mxu0 }
 0x493   : > { %v2201_v46 = vpop.f32.mrf.mxu3 }
 0x494   : > { %v2202_v20 = vadd.f32 %v4998_v51, %v2201_v46  ;;  %v2894_v53 = vmax.f32 %v2892_v6, %v2893_v30 }
 0x496   : > { %v2717_v8 = vadd.f32 %v2624_v63, %v2202_v20  ;;  %v2895_v1 = vrot.slane %v2894_v53, 2 }
 0x498   : > { %v2896_v36 = vmax.f32 %v2894_v53, %v2895_v1 }
 0x49b   : > { %v2204_v50 = vpop.f32.mrf.mxu3 }
 0x49c   : > { %v2205_v56 = vadd.f32 %v4998_v51, %v2204_v50  ;;  %v2897_v50 = vrot.slane %v2896_v36, 1 }
 0x49e   : > { %v2718_v2 = vadd.f32 %v2629_v33, %v2205_v56  ;;  %v2898_v48 = vmax.f32 %v2896_v36, %v2897_v50  ;;  %v416_v56 = vld [vmem:[%s5196_s10 + $0x4] ss:$0 sm:$0xff]  ;;  %v3085_v31 = vpop.permute.xlu0 %3084 }
 0x49f   : > { %v3028_v38 = vadd.f32 %v3027_v4, %v416_v56  ;;  %v3031_v63 = vadd.f32 %v3030_v13, %v416_v56 }
 0x4a0   : > { %v2899_v3 = vmax.f32 %v2717_v8, %v2718_v2  ;;  %3612 = vtanh.f32 %v2898_v48  ;;  %v3087_v59 = vpop.permute.xlu1 %3086 }
 0x4a3   : > { %v2207_v9 = vpop.f32.mrf.mxu3 }
 0x4a4   : > { %v2208_v42 = vadd.f32 %v4998_v51, %v2207_v9 }
 0x4a6   : > { %v2719_v18 = vadd.f32 %v2634_v29, %v2208_v42 }
 0x4a8   : > { %v2900_v11 = vmax.f32 %v2899_v3, %v2719_v18 }
 0x4aa   : > { %v2901_v32 = vrot.slane %v2900_v11, 4 }
 0x4ab   : > { %v2210_v34 = vpop.f32.mrf.mxu3 }
 0x4ac   : > { %v2902_v37 = vmax.f32 %v2900_v11, %v2901_v32  ;;  %v2211_v19 = vadd.f32 %v4998_v51, %v2210_v34 }
 0x4ae   : > { %v2903_v44 = vrot.slane %v2902_v37, 2  ;;  %v2720_v14 = vadd.f32 %v2639_v61, %v2211_v19 }
 0x4b0   : > { %v2904_v12 = vmax.f32 %v2902_v37, %v2903_v44 }
 0x4b2   : > { %v2905_v26 = vrot.slane %v2904_v12, 1 }
 0x4b3   : > { %v2213_v16 = vpop.f32.mrf.mxu3 }
 0x4b4   : > { %v2214_v17 = vadd.f32 %v4998_v51, %v2213_v16  ;;  %v2906_v21 = vmax.f32 %v2904_v12, %v2905_v26 }
 0x4b6   : > { %v2721_v24 = vadd.f32 %v2644_v0, %v2214_v17  ;;  %3614 = vtanh.f32 %v2906_v21 }
 0x4b8   : > { %v2907_v39 = vmax.f32 %v2720_v14, %v2721_v24 }
 0x4bb   : > { %v2216_v28 = vpop.f32.mrf.mxu3 }
 0x4bc   : > { %v2217_v35 = vadd.f32 %v4998_v51, %v2216_v28  ;;  %v3613_v51 = vpop.eup %3612 }
 0x4bd   : > { %v3615_v58 = vpop.eup %3614  ;;  %v3004_v20 = vsel %vm2987_vm8, %v3613_v51, %v5103_v25  ;;  %v417_v25 = vld [vmem:[%s5196_s10 + $0x5] ss:$0 sm:$0xff] }
 0x4be   : > { %v2722_v40 = vadd.f32 %v2649_v5, %v2217_v35  ;;  %v3005_v33 = vsel %vm2989_vm9, %v3615_v58, %v3004_v20  ;;  %v3089_v5 = vpop.permute.xlu2 %3088 }
 0x4c0   : > { %v2908_v46 = vmax.f32 %v2907_v39, %v2722_v40 }
 0x4c2   : > { %v2909_v49 = vrot.slane %v2908_v46, 4 }
 0x4c4   : > { %v2910_v55 = vmax.f32 %v2908_v46, %v2909_v49 }
 0x4c6   : > { %v2911_v22 = vrot.slane %v2910_v55, 2 }
 0x4c8   : > { %v2912_v9 = vmax.f32 %v2910_v55, %v2911_v22 }
 0x4ca   : > { %v2913_v23 = vrot.slane %v2912_v9, 1 }
 0x4cc   : > { %v2914_v57 = vmax.f32 %v2912_v9, %v2913_v23 }
 0x4ce   : > { %3616 = vtanh.f32 %v2914_v57 }
 0x4cf   : > { %3618 = vtanh.f32 %v3028_v38 }
 0x4d0   : > { %3620 = vtanh.f32 %v3031_v63 }
 0x4d4   : > { %v3617_v42 = vpop.eup %3616 }
 0x4d5   : > { %v3006_v62 = vsel %vm2991_vm10, %v3617_v42, %v3005_v33  ;;  %v3619_v2 = vpop.eup %3618 }
 0x4d6   : > { %3032 = vmatmul.f32.gmra.mxu0 %v3006_v62  ;;  %v3621_v29 = vpop.eup %3620 }
 0x4de   : > { %3071 = vmatmul.f32.vlgmr.msrb.gmra.mxu0 %v3619_v2 }
 0x4e6   : > { %3074 = vmatmul.f32.gmra.mxu0 %v3621_v29 }
 0x553   : > { %v3033_v54 = vpop.f32.mrf.mxu0 }
 0x554   : > { %v3034_v52 = vadd.f32 %v3033_v54, %v416_v56 }
 0x556   : > { %3622 = vtanh.f32 %v3034_v52 }
 0x55b   : > { %v3072_v60 = vpop.f32.mrf.mxu0 }
 0x55c   : > { %v3623_v8 = vpop.eup %3622  ;;  %v3073_v18 = vadd.f32 %v3072_v60, %v417_v25 }
 0x55d   : > { %3077 = vmatmul.f32.gmra.mxu0 %v3623_v8 }
 0x55e   : > { %3624 = vtanh.f32 %v3073_v18 }
 0x563   : > { %v3075_v34 = vpop.f32.mrf.mxu0 }
 0x564   : > { %v3625_v45 = vpop.eup %3624  ;;  %v3076_v7 = vadd.f32 %v3075_v34, %v417_v25 }
 0x565   : > { %v3096_v3 = vadd.f32 1.0, %v3625_v45  ;;  %v3093_v32 = vadd.f32 %v3625_v45, %v3085_v31 }
 0x566   : > { %3626 = vtanh.f32 %v3076_v7 }
 0x567   : > { %v3099_v6 = vmul.f32 3.5, %v3096_v3 }
 0x569   : > { %v3102_v47 = vadd.f32 -5.0, %v3099_v6 }
 0x56b   : > { %v3105_v41 = vmul.f32 1.442695, %v3102_v47 }
 0x56c   : > { %v3627_v11 = vpop.eup %3626 }
 0x56d   : > { %3628 = vpow2.f32 %v3105_v41  ;;  %v3097_v10 = vadd.f32 1.0, %v3627_v11  ;;  %v3094_v37 = vadd.f32 %v3627_v11, %v3087_v59 }
 0x56f   : > { %v3100_v30 = vmul.f32 3.5, %v3097_v10 }
 0x571   : > { %v3103_v61 = vadd.f32 -5.0, %v3100_v30 }
 0x573   : > { %v3629_v16 = vpop.eup %3628  ;;  %v3107_v53 = vmul.f32 1.442695, %v3103_v61 }
 0x574   : > { %v3112_v17 = vsel %vm3111_vm11, %v3093_v32, %v3629_v16 }
 0x575   : > { %3630 = vpow2.f32 %v3107_v53  ;;  %v3116_v15 = vsel %vm3115_vm12, %v3112_v17, 0.0 }
 0x576   : > { %3119 = vst [vmem:[%s406_s16] sm:$0xff] %v3116_v15 }
 0x57b   : > { %v3631_v19 = vpop.eup %3630 }
 0x57c   : > { %v3113_v43 = vsel %vm3111_vm11, %v3094_v37, %v3631_v19 }
 0x57d   : > { %v3117_v0 = vsel %vm3115_vm12, %v3113_v43, 0.0 }
 0x57e   : > { %3120 = vst [vmem:[%s406_s16 + $0x8] sm:$0xff] %v3117_v0 }
 0x5da   : > { %v3078_v1 = vpop.f32.mrf.mxu0 }
 0x5db   : > { %v3079_v24 = vadd.f32 %v3078_v1, %v417_v25 }
 0x5dd   : > { %3632 = vtanh.f32 %v3079_v24 }
 0x5e3   : > { %v3633_v27 = vpop.eup %3632 }
 0x5e4   : > { %v3098_v44 = vadd.f32 1.0, %v3633_v27  ;;  %v3095_v36 = vadd.f32 %v3633_v27, %v3089_v5 }
 0x5e6   : > { %v3101_v28 = vmul.f32 3.5, %v3098_v44 }
 0x5e8   : > { %v3104_v14 = vadd.f32 -5.0, %v3101_v28 }
 0x5ea   : > { %v3109_v35 = vmul.f32 1.442695, %v3104_v14 }
 0x5ec   : > { %3634 = vpow2.f32 %v3109_v35 }
 0x5f2   : > { %v3635_v39 = vpop.eup %3634 }
 0x5f3   : > { %v3114_v40 = vsel %vm3111_vm11, %v3095_v36, %v3635_v39 }
 0x5f4   : > { %v3118_v12 = vsel %vm3115_vm12, %v3114_v40, 0.0 }
 0x5f5   : > { %3121 = vst [vmem:[%s406_s16 + $0x10] sm:$0xff] %v3118_v12 }
 0x5f6 PF: > { %s21_s17 = sadd.s32 1, %s3646_s17  }
 0x5f7   : > { %p18_p4 = scmp.ge.s32.totalorder %s21_s17, 4  }
 0x5f9   :  { %20 = sbr.rel (!%p18_p4) target bundleno = 1 (0x1), region = 99 }

</bundles_post_ra>
